<compile_context>
chip_gen: v7x
topology: tpu7x:2x2x1
jax: 0.10.0
libtpu: 0.0.40
codegen_flags: <defaults>
</compile_context>

<pallas_src>
import jax
import jax.numpy as jnp
from jax import lax
from jax.experimental import pallas as pl
from jax.experimental.pallas import tpu as pltpu

IMAGE_SHAPE = (1, 28, 28)
IMAGE_SIZE = 784
PADDED_IMAGE_SIZE = 896          # 7 * 128 -> lane-dense final layer stores
BN_EPS = 1e-5
LEAKY_SLOPE = 0.01               # PyTorch nn.LeakyReLU default
HIDDEN = (256, 512, 1024)


def _generator_kernel(z_ref,
                      w1_ref, p1_ref,
                      w2_hbm, p2_ref,
                      w3_hbm, p3_ref,
                      w4_hbm, p4_ref,
                      out_ref,
                      w2_vmem, w3_vmem, w4_vmem, dma_sem):
    # W2/W3 copies start immediately (needed soonest); W4 (the largest) is
    # deferred until W2 has landed so it doesn't steal HBM bandwidth from it.
    cp2 = pltpu.make_async_copy(w2_hbm, w2_vmem, dma_sem.at[0])
    cp3 = pltpu.make_async_copy(w3_hbm, w3_vmem, dma_sem.at[1])
    cp4 = pltpu.make_async_copy(w4_hbm, w4_vmem, dma_sem.at[2])
    cp2.start()
    cp3.start()

    def dequant_bf16(wq_i8):
        # int8 -> f32 -> bf16: exact for |v| <= 127, guaranteed lowering path.
        return wq_i8.astype(jnp.float32).astype(jnp.bfloat16)

    def linear_bf16(x, w_bf16, bias):
        y = jnp.dot(x.astype(jnp.bfloat16), w_bf16,
                    preferred_element_type=jnp.float32)
        return y + bias

    def linear_int8(x, wq_i8, wscale, bias):
        # bf16 MXU matmul on the dequantized integer weights, f32 accumulate,
        # per-output-channel scale folded into one f32 FMA with the bias.
        y = jnp.dot(x.astype(jnp.bfloat16), dequant_bf16(wq_i8),
                    preferred_element_type=jnp.float32)
        return y * wscale + bias

    def leaky_relu(x):
        return jnp.maximum(x, LEAKY_SLOPE * x)   # valid because slope < 1

    def batchnorm(x, gamma, beta):
        # One-pass training-mode stats: E[x], E[x^2] (no centered temporary).
        mean = jnp.mean(x, axis=0, keepdims=True)                  # (1, N)
        mean_sq = jnp.mean(x * x, axis=0, keepdims=True)           # (1, N)
        var = jnp.maximum(mean_sq - mean * mean, 0.0)              # guard
        scale = gamma * lax.rsqrt(var + BN_EPS)                    # (1, N)
        shift = beta - mean * scale                                # (1, N)
        return x * scale + shift

    # Packed param rows: p1 = [bias, gamma, beta]
    #                    p2/p3 = [bias, gamma, beta, wscale]
    #                    p4 = [bias, wscale]
    # Layer 1 uses the small bf16 W1 that arrived via the automatic prologue.
    h = batchnorm(leaky_relu(linear_bf16(z_ref[...], w1_ref[...],
                                         p1_ref[0:1, :])),
                  p1_ref[1:2, :], p1_ref[2:3, :])

    cp2.wait()
    cp4.start()        # largest copy; only needed for the final layer
    h = batchnorm(leaky_relu(linear_int8(h, w2_vmem[...],
                                         p2_ref[3:4, :], p2_ref[0:1, :])),
                  p2_ref[1:2, :], p2_ref[2:3, :])

    cp3.wait()
    h = batchnorm(leaky_relu(linear_int8(h, w3_vmem[...],
                                         p3_ref[3:4, :], p3_ref[0:1, :])),
                  p3_ref[1:2, :], p3_ref[2:3, :])

    cp4.wait()
    out_ref[...] = linear_int8(h, w4_vmem[...], p4_ref[1:2, :], p4_ref[0:1, :])


@jax.jit
def generator_forward(z, params):
    """z: (B, input_size) f32  ->  (B, 1, 28, 28) f32"""
    B, input_size = z.shape
    w1, p1, w2q, p2, w3q, p3, w4q, p4 = params

    vmem = pl.BlockSpec(memory_space=pltpu.MemorySpace.VMEM)
    anym = pl.BlockSpec(memory_space=pl.ANY)   # raw HBM ref; DMA'd manually

    in_specs = [vmem,          # z
                vmem, vmem,    # w1 (small bf16), packed p1
                anym, vmem,    # w2 int8 (manual DMA), packed p2
                anym, vmem,    # w3 int8 (manual DMA), packed p3
                anym, vmem]    # w4 int8 (manual DMA), packed p4

    flops = 2 * B * (input_size * HIDDEN[0] + HIDDEN[0] * HIDDEN[1]
                     + HIDDEN[1] * HIDDEN[2] + HIDDEN[2] * PADDED_IMAGE_SIZE)
    bytes_accessed = (z.size * 4 + w1.size * 2
                      + w2q.size + w3q.size + w4q.size
                      + (p1.size + p2.size + p3.size + p4.size) * 4
                      + B * PADDED_IMAGE_SIZE * 4)
    cost = pl.CostEstimate(flops=flops,
                           transcendentals=sum(HIDDEN),   # 3 per-feature rsqrts
                           bytes_accessed=bytes_accessed)

    out_flat = pl.pallas_call(
        _generator_kernel,
        out_shape=jax.ShapeDtypeStruct((B, PADDED_IMAGE_SIZE), jnp.float32),
        in_specs=in_specs,
        out_specs=vmem,
        scratch_shapes=[
            pltpu.VMEM((HIDDEN[0], HIDDEN[1]), jnp.int8),            # W2
            pltpu.VMEM((HIDDEN[1], HIDDEN[2]), jnp.int8),            # W3
            pltpu.VMEM((HIDDEN[2], PADDED_IMAGE_SIZE), jnp.int8),    # W4
            pltpu.SemaphoreType.DMA((3,)),
        ],
        cost_estimate=cost,
    )(z, w1, p1, w2q, p2, w3q, p3, w4q, p4)

    # Same-jit crop + reshape: drops the zero lane-padding columns and matches
    # PyTorch's .view(-1, 1, 28, 28); XLA fuses it with the output writeback.
    return out_flat[:, :IMAGE_SIZE].reshape(-1, *IMAGE_SHAPE)


def _quantize_int8(w):
    """Per-output-channel symmetric int8 quantization of a (in, out) matrix."""
    amax = jnp.max(jnp.abs(w), axis=0, keepdims=True)        # (1, out)
    scale = jnp.where(amax > 0.0, amax / 127.0, 1.0)
    wq = jnp.round(w / scale).astype(jnp.int8)
    return wq, scale.astype(jnp.float32)


def init_generator_params(key, input_size):
    """Deterministic init matching the PyTorch layer shapes.

    Returns (w1_bf16, p1, w2_int8, p2, w3_int8, p3, w4_int8, p4) where the
    packed p arrays hold [bias, gamma, beta(, weight_scale)] rows in f32 and
    the final layer is zero-padded 784 -> 896 output features.
    """
    dims = [(input_size, HIDDEN[0]),
            (HIDDEN[0], HIDDEN[1]),
            (HIDDEN[1], HIDDEN[2]),
            (HIDDEN[2], IMAGE_SIZE)]
    keys = jax.random.split(key, 2 * len(dims))
    ws, bs = [], []
    for i, (fan_in, fan_out) in enumerate(dims):
        bound = 1.0 / float(fan_in) ** 0.5
        ws.append(jax.random.uniform(keys[2 * i], (fan_in, fan_out),
                                     minval=-bound, maxval=bound,
                                     dtype=jnp.float32))
        bs.append(jax.random.uniform(keys[2 * i + 1], (1, fan_out),
                                     minval=-bound, maxval=bound,
                                     dtype=jnp.float32))

    # Layer 1: small bf16 weight + packed (3, 256) = [bias, gamma, beta].
    w1 = ws[0].astype(jnp.bfloat16)
    p1 = jnp.concatenate([bs[0],
                          jnp.ones((1, HIDDEN[0]), jnp.float32),
                          jnp.zeros((1, HIDDEN[0]), jnp.float32)], axis=0)

    # Layers 2/3: int8 weights + packed (4, N) = [bias, gamma, beta, wscale].
    w2q, s2 = _quantize_int8(ws[1])
    p2 = jnp.concatenate([bs[1],
                          jnp.ones((1, HIDDEN[1]), jnp.float32),
                          jnp.zeros((1, HIDDEN[1]), jnp.float32),
                          s2], axis=0)
    w3q, s3 = _quantize_int8(ws[2])
    p3 = jnp.concatenate([bs[2],
                          jnp.ones((1, HIDDEN[2]), jnp.float32),
                          jnp.zeros((1, HIDDEN[2]), jnp.float32),
                          s3], axis=0)

    # Layer 4: zero-pad 784 -> 896 outputs (lane-dense stores), int8 weights,
    # packed (2, 896) = [bias, wscale].
    pad = PADDED_IMAGE_SIZE - IMAGE_SIZE
    w4 = jnp.pad(ws[3], ((0, 0), (0, pad)))
    b4 = jnp.pad(bs[3], ((0, 0), (0, pad)))
    w4q, s4 = _quantize_int8(w4)
    p4 = jnp.concatenate([b4, s4], axis=0)

    return (w1, p1, w2q, p2, w3q, p3, w4q, p4)


if __name__ == "__main__":
    key = jax.random.PRNGKey(0)
    k_params, k_noise = jax.random.split(key)

    batch = 8
    input_size = 64   # latent noise dimension
    # TODO(synk): PyTorch errors on BatchNorm1d with batch==1 in training mode;
    # this kernel instead returns var=0 -> rsqrt(eps) for that degenerate case.

    params = init_generator_params(k_params, input_size)
    z_noise = jax.random.normal(k_noise, (batch, input_size), dtype=jnp.float32)

    imgs = generator_forward(z_noise, params)
    imgs = jax.block_until_ready(imgs)

    assert imgs.shape == (batch, 1, 28, 28), imgs.shape
    assert imgs.dtype == jnp.float32
    assert bool(jnp.all(jnp.isfinite(imgs)))
    print("KERNEL_OK")
</pallas_src>

<mosaic_0001>
module attributes {stable_mosaic.version = 11 : i64} {
  func.func @_generator_kernel(%arg0: memref<8x64xf32, #tpu.memory_space<vmem>>, %arg1: memref<64x256xbf16, #tpu.memory_space<vmem>>, %arg2: memref<3x256xf32, #tpu.memory_space<vmem>>, %arg3: memref<256x512xi8, #tpu.memory_space<any>>, %arg4: memref<4x512xf32, #tpu.memory_space<vmem>>, %arg5: memref<512x1024xi8, #tpu.memory_space<any>>, %arg6: memref<4x1024xf32, #tpu.memory_space<vmem>>, %arg7: memref<1024x896xi8, #tpu.memory_space<any>>, %arg8: memref<2x896xf32, #tpu.memory_space<vmem>>, %arg9: memref<8x896xf32, #tpu.memory_space<vmem>>, %arg10: memref<256x512xi8, #tpu.memory_space<vmem>>, %arg11: memref<512x1024xi8, #tpu.memory_space<vmem>>, %arg12: memref<1024x896xi8, #tpu.memory_space<vmem>>, %arg13: memref<3x!tpu.dma_semaphore, #tpu.memory_space<semaphore_mem>>) attributes {dimension_semantics = [], scalar_prefetch = 0 : i64, scratch_operands = 4 : i64, tpu.core_type = #tpu.core_type<tc>} {
    %c0_i32 = arith.constant 0 : i32
    %0 = tpu.memref_slice %arg13[%c0_i32] : memref<3x!tpu.dma_semaphore, #tpu.memory_space<semaphore_mem>> -> memref<1x!tpu.dma_semaphore, #tpu.memory_space<semaphore_mem>>
    %1 = tpu.memref_squeeze %0 : memref<1x!tpu.dma_semaphore, #tpu.memory_space<semaphore_mem>> -> memref<!tpu.dma_semaphore, #tpu.memory_space<semaphore_mem>>
    tpu.enqueue_dma source(%arg3 : memref<256x512xi8, #tpu.memory_space<any>>) target(%arg10 : memref<256x512xi8, #tpu.memory_space<vmem>>) target_semaphore(%1 : memref<!tpu.dma_semaphore, #tpu.memory_space<semaphore_mem>>)
    %c1_i32 = arith.constant 1 : i32
    %2 = tpu.memref_slice %arg13[%c1_i32] : memref<3x!tpu.dma_semaphore, #tpu.memory_space<semaphore_mem>> -> memref<1x!tpu.dma_semaphore, #tpu.memory_space<semaphore_mem>>
    %3 = tpu.memref_squeeze %2 : memref<1x!tpu.dma_semaphore, #tpu.memory_space<semaphore_mem>> -> memref<!tpu.dma_semaphore, #tpu.memory_space<semaphore_mem>>
    tpu.enqueue_dma source(%arg5 : memref<512x1024xi8, #tpu.memory_space<any>>) target(%arg11 : memref<512x1024xi8, #tpu.memory_space<vmem>>) target_semaphore(%3 : memref<!tpu.dma_semaphore, #tpu.memory_space<semaphore_mem>>)
    %c0 = arith.constant 0 : index
    %c0_0 = arith.constant 0 : index
    %4 = vector.load %arg0[%c0, %c0_0] : memref<8x64xf32, #tpu.memory_space<vmem>>, vector<8x64xf32>
    %c0_1 = arith.constant 0 : index
    %c0_2 = arith.constant 0 : index
    %5 = vector.load %arg1[%c0_1, %c0_2] : memref<64x256xbf16, #tpu.memory_space<vmem>>, vector<64x256xbf16>
    %c0_3 = arith.constant 0 : index
    %c0_4 = arith.constant 0 : index
    %6 = vector.load %arg2[%c0_3, %c0_4] : memref<3x256xf32, #tpu.memory_space<vmem>>, vector<1x256xf32>
    %7 = arith.truncf %4 : vector<8x64xf32> to vector<8x64xbf16>
    %cst = arith.constant dense<0.000000e+00> : vector<8x256xf32>
    %8 = tpu.matmul %7, %5, %cst {dimension_numbers = #tpu.dot_dimension_numbers<[1], [0], [0], [1], [0, 0, 1, 1], [], []>} : vector<8x64xbf16>, vector<64x256xbf16>, vector<8x256xf32> -> vector<8x256xf32>
    %9 = vector.broadcast %6 : vector<1x256xf32> to vector<8x256xf32>
    %10 = arith.addf %8, %9 : vector<8x256xf32>
    %cst_5 = arith.constant 0.00999999977 : f32
    %11 = vector.broadcast %cst_5 : f32 to vector<8x256xf32>
    %12 = arith.mulf %11, %10 : vector<8x256xf32>
    %13 = arith.maximumf %10, %12 : vector<8x256xf32>
    %c1 = arith.constant 1 : index
    %c0_6 = arith.constant 0 : index
    %14 = vector.load %arg2[%c1, %c0_6] : memref<3x256xf32, #tpu.memory_space<vmem>>, vector<1x256xf32>
    %c2 = arith.constant 2 : index
    %c0_7 = arith.constant 0 : index
    %15 = vector.load %arg2[%c2, %c0_7] : memref<3x256xf32, #tpu.memory_space<vmem>>, vector<1x256xf32>
    %cst_8 = arith.constant dense<0.000000e+00> : vector<256xf32>
    %16 = vector.multi_reduction <add>, %13, %cst_8 [0] : vector<8x256xf32> to vector<256xf32>
    %17 = vector.shape_cast %16 : vector<256xf32> to vector<1x256xf32>
    %cst_9 = arith.constant 8.000000e+00 : f32
    %18 = vector.broadcast %cst_9 : f32 to vector<1x256xf32>
    %19 = arith.divf %17, %18 : vector<1x256xf32>
    %20 = arith.mulf %13, %13 : vector<8x256xf32>
    %cst_10 = arith.constant dense<0.000000e+00> : vector<256xf32>
    %21 = vector.multi_reduction <add>, %20, %cst_10 [0] : vector<8x256xf32> to vector<256xf32>
    %22 = vector.shape_cast %21 : vector<256xf32> to vector<1x256xf32>
    %cst_11 = arith.constant 8.000000e+00 : f32
    %23 = vector.broadcast %cst_11 : f32 to vector<1x256xf32>
    %24 = arith.divf %22, %23 : vector<1x256xf32>
    %25 = arith.mulf %19, %19 : vector<1x256xf32>
    %26 = arith.subf %24, %25 : vector<1x256xf32>
    %cst_12 = arith.constant 0.000000e+00 : f32
    %27 = vector.broadcast %cst_12 : f32 to vector<1x256xf32>
    %28 = arith.maximumf %26, %27 : vector<1x256xf32>
    %cst_13 = arith.constant 9.99999974E-6 : f32
    %29 = vector.broadcast %cst_13 : f32 to vector<1x256xf32>
    %30 = arith.addf %28, %29 : vector<1x256xf32>
    %31 = math.rsqrt %30 : vector<1x256xf32>
    %32 = arith.mulf %14, %31 : vector<1x256xf32>
    %33 = arith.mulf %19, %32 : vector<1x256xf32>
    %34 = arith.subf %15, %33 : vector<1x256xf32>
    %35 = vector.broadcast %32 : vector<1x256xf32> to vector<8x256xf32>
    %36 = arith.mulf %13, %35 : vector<8x256xf32>
    %37 = vector.broadcast %34 : vector<1x256xf32> to vector<8x256xf32>
    %38 = arith.addf %36, %37 : vector<8x256xf32>
    %c0_i32_14 = arith.constant 0 : i32
    %39 = tpu.memref_slice %arg13[%c0_i32_14] : memref<3x!tpu.dma_semaphore, #tpu.memory_space<semaphore_mem>> -> memref<1x!tpu.dma_semaphore, #tpu.memory_space<semaphore_mem>>
    %40 = tpu.memref_squeeze %39 : memref<1x!tpu.dma_semaphore, #tpu.memory_space<semaphore_mem>> -> memref<!tpu.dma_semaphore, #tpu.memory_space<semaphore_mem>>
    tpu.wait_dma2 semaphore(%40 : memref<!tpu.dma_semaphore, #tpu.memory_space<semaphore_mem>>) src(%arg3 : memref<256x512xi8, #tpu.memory_space<any>>) dst(%arg10 : memref<256x512xi8, #tpu.memory_space<vmem>>)
    %c2_i32 = arith.constant 2 : i32
    %41 = tpu.memref_slice %arg13[%c2_i32] : memref<3x!tpu.dma_semaphore, #tpu.memory_space<semaphore_mem>> -> memref<1x!tpu.dma_semaphore, #tpu.memory_space<semaphore_mem>>
    %42 = tpu.memref_squeeze %41 : memref<1x!tpu.dma_semaphore, #tpu.memory_space<semaphore_mem>> -> memref<!tpu.dma_semaphore, #tpu.memory_space<semaphore_mem>>
    tpu.enqueue_dma source(%arg7 : memref<1024x896xi8, #tpu.memory_space<any>>) target(%arg12 : memref<1024x896xi8, #tpu.memory_space<vmem>>) target_semaphore(%42 : memref<!tpu.dma_semaphore, #tpu.memory_space<semaphore_mem>>)
    %c0_15 = arith.constant 0 : index
    %c0_16 = arith.constant 0 : index
    %43 = vector.load %arg10[%c0_15, %c0_16] : memref<256x512xi8, #tpu.memory_space<vmem>>, vector<256x512xi8>
    %c3 = arith.constant 3 : index
    %c0_17 = arith.constant 0 : index
    %44 = vector.load %arg4[%c3, %c0_17] : memref<4x512xf32, #tpu.memory_space<vmem>>, vector<1x512xf32>
    %c0_18 = arith.constant 0 : index
    %c0_19 = arith.constant 0 : index
    %45 = vector.load %arg4[%c0_18, %c0_19] : memref<4x512xf32, #tpu.memory_space<vmem>>, vector<1x512xf32>
    %46 = arith.truncf %38 : vector<8x256xf32> to vector<8x256xbf16>
    %47 = arith.sitofp %43 : vector<256x512xi8> to vector<256x512xf32>
    %48 = arith.truncf %47 : vector<256x512xf32> to vector<256x512xbf16>
    %cst_20 = arith.constant dense<0.000000e+00> : vector<8x512xf32>
    %49 = tpu.matmul %46, %48, %cst_20 {dimension_numbers = #tpu.dot_dimension_numbers<[1], [0], [0], [1], [0, 0, 1, 1], [], []>} : vector<8x256xbf16>, vector<256x512xbf16>, vector<8x512xf32> -> vector<8x512xf32>
    %50 = vector.broadcast %44 : vector<1x512xf32> to vector<8x512xf32>
    %51 = arith.mulf %49, %50 : vector<8x512xf32>
    %52 = vector.broadcast %45 : vector<1x512xf32> to vector<8x512xf32>
    %53 = arith.addf %51, %52 : vector<8x512xf32>
    %cst_21 = arith.constant 0.00999999977 : f32
    %54 = vector.broadcast %cst_21 : f32 to vector<8x512xf32>
    %55 = arith.mulf %54, %53 : vector<8x512xf32>
    %56 = arith.maximumf %53, %55 : vector<8x512xf32>
    %c1_22 = arith.constant 1 : index
    %c0_23 = arith.constant 0 : index
    %57 = vector.load %arg4[%c1_22, %c0_23] : memref<4x512xf32, #tpu.memory_space<vmem>>, vector<1x512xf32>
    %c2_24 = arith.constant 2 : index
    %c0_25 = arith.constant 0 : index
    %58 = vector.load %arg4[%c2_24, %c0_25] : memref<4x512xf32, #tpu.memory_space<vmem>>, vector<1x512xf32>
    %cst_26 = arith.constant dense<0.000000e+00> : vector<512xf32>
    %59 = vector.multi_reduction <add>, %56, %cst_26 [0] : vector<8x512xf32> to vector<512xf32>
    %60 = vector.shape_cast %59 : vector<512xf32> to vector<1x512xf32>
    %cst_27 = arith.constant 8.000000e+00 : f32
    %61 = vector.broadcast %cst_27 : f32 to vector<1x512xf32>
    %62 = arith.divf %60, %61 : vector<1x512xf32>
    %63 = arith.mulf %56, %56 : vector<8x512xf32>
    %cst_28 = arith.constant dense<0.000000e+00> : vector<512xf32>
    %64 = vector.multi_reduction <add>, %63, %cst_28 [0] : vector<8x512xf32> to vector<512xf32>
    %65 = vector.shape_cast %64 : vector<512xf32> to vector<1x512xf32>
    %cst_29 = arith.constant 8.000000e+00 : f32
    %66 = vector.broadcast %cst_29 : f32 to vector<1x512xf32>
    %67 = arith.divf %65, %66 : vector<1x512xf32>
    %68 = arith.mulf %62, %62 : vector<1x512xf32>
    %69 = arith.subf %67, %68 : vector<1x512xf32>
    %cst_30 = arith.constant 0.000000e+00 : f32
    %70 = vector.broadcast %cst_30 : f32 to vector<1x512xf32>
    %71 = arith.maximumf %69, %70 : vector<1x512xf32>
    %cst_31 = arith.constant 9.99999974E-6 : f32
    %72 = vector.broadcast %cst_31 : f32 to vector<1x512xf32>
    %73 = arith.addf %71, %72 : vector<1x512xf32>
    %74 = math.rsqrt %73 : vector<1x512xf32>
    %75 = arith.mulf %57, %74 : vector<1x512xf32>
    %76 = arith.mulf %62, %75 : vector<1x512xf32>
    %77 = arith.subf %58, %76 : vector<1x512xf32>
    %78 = vector.broadcast %75 : vector<1x512xf32> to vector<8x512xf32>
    %79 = arith.mulf %56, %78 : vector<8x512xf32>
    %80 = vector.broadcast %77 : vector<1x512xf32> to vector<8x512xf32>
    %81 = arith.addf %79, %80 : vector<8x512xf32>
    %c1_i32_32 = arith.constant 1 : i32
    %82 = tpu.memref_slice %arg13[%c1_i32_32] : memref<3x!tpu.dma_semaphore, #tpu.memory_space<semaphore_mem>> -> memref<1x!tpu.dma_semaphore, #tpu.memory_space<semaphore_mem>>
    %83 = tpu.memref_squeeze %82 : memref<1x!tpu.dma_semaphore, #tpu.memory_space<semaphore_mem>> -> memref<!tpu.dma_semaphore, #tpu.memory_space<semaphore_mem>>
    tpu.wait_dma2 semaphore(%83 : memref<!tpu.dma_semaphore, #tpu.memory_space<semaphore_mem>>) src(%arg5 : memref<512x1024xi8, #tpu.memory_space<any>>) dst(%arg11 : memref<512x1024xi8, #tpu.memory_space<vmem>>)
    %c0_33 = arith.constant 0 : index
    %c0_34 = arith.constant 0 : index
    %84 = vector.load %arg11[%c0_33, %c0_34] : memref<512x1024xi8, #tpu.memory_space<vmem>>, vector<512x1024xi8>
    %c3_35 = arith.constant 3 : index
    %c0_36 = arith.constant 0 : index
    %85 = vector.load %arg6[%c3_35, %c0_36] : memref<4x1024xf32, #tpu.memory_space<vmem>>, vector<1x1024xf32>
    %c0_37 = arith.constant 0 : index
    %c0_38 = arith.constant 0 : index
    %86 = vector.load %arg6[%c0_37, %c0_38] : memref<4x1024xf32, #tpu.memory_space<vmem>>, vector<1x1024xf32>
    %87 = arith.truncf %81 : vector<8x512xf32> to vector<8x512xbf16>
    %88 = arith.sitofp %84 : vector<512x1024xi8> to vector<512x1024xf32>
    %89 = arith.truncf %88 : vector<512x1024xf32> to vector<512x1024xbf16>
    %cst_39 = arith.constant dense<0.000000e+00> : vector<8x1024xf32>
    %90 = tpu.matmul %87, %89, %cst_39 {dimension_numbers = #tpu.dot_dimension_numbers<[1], [0], [0], [1], [0, 0, 1, 1], [], []>} : vector<8x512xbf16>, vector<512x1024xbf16>, vector<8x1024xf32> -> vector<8x1024xf32>
    %91 = vector.broadcast %85 : vector<1x1024xf32> to vector<8x1024xf32>
    %92 = arith.mulf %90, %91 : vector<8x1024xf32>
    %93 = vector.broadcast %86 : vector<1x1024xf32> to vector<8x1024xf32>
    %94 = arith.addf %92, %93 : vector<8x1024xf32>
    %cst_40 = arith.constant 0.00999999977 : f32
    %95 = vector.broadcast %cst_40 : f32 to vector<8x1024xf32>
    %96 = arith.mulf %95, %94 : vector<8x1024xf32>
    %97 = arith.maximumf %94, %96 : vector<8x1024xf32>
    %c1_41 = arith.constant 1 : index
    %c0_42 = arith.constant 0 : index
    %98 = vector.load %arg6[%c1_41, %c0_42] : memref<4x1024xf32, #tpu.memory_space<vmem>>, vector<1x1024xf32>
    %c2_43 = arith.constant 2 : index
    %c0_44 = arith.constant 0 : index
    %99 = vector.load %arg6[%c2_43, %c0_44] : memref<4x1024xf32, #tpu.memory_space<vmem>>, vector<1x1024xf32>
    %cst_45 = arith.constant dense<0.000000e+00> : vector<1024xf32>
    %100 = vector.multi_reduction <add>, %97, %cst_45 [0] : vector<8x1024xf32> to vector<1024xf32>
    %101 = vector.shape_cast %100 : vector<1024xf32> to vector<1x1024xf32>
    %cst_46 = arith.constant 8.000000e+00 : f32
    %102 = vector.broadcast %cst_46 : f32 to vector<1x1024xf32>
    %103 = arith.divf %101, %102 : vector<1x1024xf32>
    %104 = arith.mulf %97, %97 : vector<8x1024xf32>
    %cst_47 = arith.constant dense<0.000000e+00> : vector<1024xf32>
    %105 = vector.multi_reduction <add>, %104, %cst_47 [0] : vector<8x1024xf32> to vector<1024xf32>
    %106 = vector.shape_cast %105 : vector<1024xf32> to vector<1x1024xf32>
    %cst_48 = arith.constant 8.000000e+00 : f32
    %107 = vector.broadcast %cst_48 : f32 to vector<1x1024xf32>
    %108 = arith.divf %106, %107 : vector<1x1024xf32>
    %109 = arith.mulf %103, %103 : vector<1x1024xf32>
    %110 = arith.subf %108, %109 : vector<1x1024xf32>
    %cst_49 = arith.constant 0.000000e+00 : f32
    %111 = vector.broadcast %cst_49 : f32 to vector<1x1024xf32>
    %112 = arith.maximumf %110, %111 : vector<1x1024xf32>
    %cst_50 = arith.constant 9.99999974E-6 : f32
    %113 = vector.broadcast %cst_50 : f32 to vector<1x1024xf32>
    %114 = arith.addf %112, %113 : vector<1x1024xf32>
    %115 = math.rsqrt %114 : vector<1x1024xf32>
    %116 = arith.mulf %98, %115 : vector<1x1024xf32>
    %117 = arith.mulf %103, %116 : vector<1x1024xf32>
    %118 = arith.subf %99, %117 : vector<1x1024xf32>
    %119 = vector.broadcast %116 : vector<1x1024xf32> to vector<8x1024xf32>
    %120 = arith.mulf %97, %119 : vector<8x1024xf32>
    %121 = vector.broadcast %118 : vector<1x1024xf32> to vector<8x1024xf32>
    %122 = arith.addf %120, %121 : vector<8x1024xf32>
    %c2_i32_51 = arith.constant 2 : i32
    %123 = tpu.memref_slice %arg13[%c2_i32_51] : memref<3x!tpu.dma_semaphore, #tpu.memory_space<semaphore_mem>> -> memref<1x!tpu.dma_semaphore, #tpu.memory_space<semaphore_mem>>
    %124 = tpu.memref_squeeze %123 : memref<1x!tpu.dma_semaphore, #tpu.memory_space<semaphore_mem>> -> memref<!tpu.dma_semaphore, #tpu.memory_space<semaphore_mem>>
    tpu.wait_dma2 semaphore(%124 : memref<!tpu.dma_semaphore, #tpu.memory_space<semaphore_mem>>) src(%arg7 : memref<1024x896xi8, #tpu.memory_space<any>>) dst(%arg12 : memref<1024x896xi8, #tpu.memory_space<vmem>>)
    %c0_52 = arith.constant 0 : index
    %c0_53 = arith.constant 0 : index
    %125 = vector.load %arg12[%c0_52, %c0_53] : memref<1024x896xi8, #tpu.memory_space<vmem>>, vector<1024x896xi8>
    %c1_54 = arith.constant 1 : index
    %c0_55 = arith.constant 0 : index
    %126 = vector.load %arg8[%c1_54, %c0_55] : memref<2x896xf32, #tpu.memory_space<vmem>>, vector<1x896xf32>
    %c0_56 = arith.constant 0 : index
    %c0_57 = arith.constant 0 : index
    %127 = vector.load %arg8[%c0_56, %c0_57] : memref<2x896xf32, #tpu.memory_space<vmem>>, vector<1x896xf32>
    %128 = arith.truncf %122 : vector<8x1024xf32> to vector<8x1024xbf16>
    %129 = arith.sitofp %125 : vector<1024x896xi8> to vector<1024x896xf32>
    %130 = arith.truncf %129 : vector<1024x896xf32> to vector<1024x896xbf16>
    %cst_58 = arith.constant dense<0.000000e+00> : vector<8x896xf32>
    %131 = tpu.matmul %128, %130, %cst_58 {dimension_numbers = #tpu.dot_dimension_numbers<[1], [0], [0], [1], [0, 0, 1, 1], [], []>} : vector<8x1024xbf16>, vector<1024x896xbf16>, vector<8x896xf32> -> vector<8x896xf32>
    %132 = vector.broadcast %126 : vector<1x896xf32> to vector<8x896xf32>
    %133 = arith.mulf %131, %132 : vector<8x896xf32>
    %134 = vector.broadcast %127 : vector<1x896xf32> to vector<8x896xf32>
    %135 = arith.addf %133, %134 : vector<8x896xf32>
    %c0_59 = arith.constant 0 : index
    %c0_60 = arith.constant 0 : index
    %136 = vector.load %arg9[%c0_59, %c0_60] : memref<8x896xf32, #tpu.memory_space<vmem>>, vector<8x896xf32>
    tpu.vector_store %arg9[%c0_59, %c0_60], %135 {strides = array<i32>} : memref<8x896xf32, #tpu.memory_space<vmem>>, vector<8x896xf32>,
    return
  }
}

</mosaic_0001>

<bundles_post_ra>
// kernel: generator_forward.1
= control target key start
LH: loop header
LB: loop body
LE: loop exit
PB: predicated region body
PF: predicated region fallthrough
CT: control target
= control target key end

     0   :  { %14 = vsyncpa [#allocation7], 0  ;;  %s4457_s0 = inlined_call_operand.hbm [shape: f32[8,64], index: 0, kind: input, shape index: {}]   ;;  %s4458_s1 = inlined_call_operand.hbm [shape: bf16[64,256], index: 1, kind: input, shape index: {}]   ;;  %s4459_s2 = inlined_call_operand.hbm [shape: f32[3,256], index: 2, kind: input, shape index: {}]   ;;  %s4460_s3 = inlined_call_operand.hbm [shape: s8[256,512], index: 3, kind: input, shape index: {}]   ;;  %s4461_s4 = inlined_call_operand.hbm [shape: f32[4,512], index: 4, kind: input, shape index: {}]   ;;  %s4462_s5 = inlined_call_operand.hbm [shape: s8[512,1024], index: 5, kind: input, shape index: {}]   ;;  %s4463_s6 = inlined_call_operand.hbm [shape: f32[4,1024], index: 6, kind: input, shape index: {}]   ;;  %s4464_s7 = inlined_call_operand.hbm [shape: s8[1024,896], index: 7, kind: input, shape index: {}]   ;;  %s4465_s8 = inlined_call_operand.vmem [shape: f32[2,896], index: 8, kind: input, shape index: {}]   ;;  %s4466_s9 = inlined_call_operand.vmem [shape: f32[8,896], index: 9, kind: output, shape index: {}]  }
   0x1   :  { %15 = vsyncpa [#allocation9], 0 }
   0x2   :  { %16 = vsyncpa [#allocation12], 0  ;;  %s3864_s30 = smov [#allocation8]   ;;  %s3676_s13 = scalar_lea.hbm %s4458_s1, 1024 }
   0x3   :  { %s32_s10 = sshll.u32 %s3864_s30, 4  ;;  %p3677_p0 = scmp.ne.s32.totalorder %s4458_s1, %s3676_s13  ;;  %s33_s10 = int_to_ptr.vmem [resolvable:$true] %s32_s10 }
   0x4   :  { %p3680_p1 = scmp.lt.u32.totalorder %s3676_s13, %s4458_s1 }
   0x6   :  { %p3682_p2 = pnand %p3680_p1, %p3677_p0 }
   0x8   :  { %3685 = shalt.err (!%p3682_p2)
}
   0x9   :  { %s3686_s18 = scalar_lea.vmem %s33_s10, 1024  ;;  %p3691_p4 = scmp.lt.s32.totalorder %s33_s10, %s33_s10 }
   0xa   :  { %p3687_p3 = scmp.ne.s32.totalorder %s33_s10, %s3686_s18  ;;  %p3692_p5 = scmp.lt.s32.totalorder %s3686_s18, %s3686_s18 }
   0xc   :  { %p3693_p6 = por %p3692_p5, %p3691_p4 }
   0xe   :  { %p3694_p7 = pnand %p3693_p6, %p3687_p3 }
  0x10   :  { %3697 = shalt.err (!%p3694_p7)
}
  0x11   :  { %s3865_s19 = smov 128   ;;  %s3866_s20 = smov 8  }
  0x12   :  { %38 = dma.hbm_to_vmem [thread:$0]  %s4458_s1, 1024, %s33_s10, [#allocation9], %s3865_s19, %s3865_s19, %s3866_s20  }
  0x13   :  { %s3867_s23 = smov [#allocation11]   ;;  %s3868_s25 = smov [#allocation6]  }
  0x14   :  { %s55_s24 = sshll.u32 %s3867_s23, 4  ;;  %s23_s26 = sshll.u32 %s3868_s25, 4  ;;  %s56_s24 = int_to_ptr.vmem [resolvable:$true] %s55_s24  ;;  %s24_s26 = int_to_ptr.vmem [resolvable:$true] %s23_s26 }
  0x15   :  { %s3698_s29 = scalar_lea.hbm %s4461_s4, 256 }
  0x16   :  { %p3699_p8 = scmp.ne.s32.totalorder %s4461_s4, %s3698_s29  ;;  %p3702_p9 = scmp.lt.u32.totalorder %s3698_s29, %s4461_s4 }
  0x18   :  { %p3704_p10 = pnand %p3702_p9, %p3699_p8 }
  0x1a   :  { %3707 = shalt.err (!%p3704_p10)
}
  0x1b   :  { %s3708_s1 = scalar_lea.vmem %s56_s24, 256  ;;  %p3713_p12 = scmp.lt.s32.totalorder %s56_s24, %s56_s24 }
  0x1c   :  { %p3709_p11 = scmp.ne.s32.totalorder %s56_s24, %s3708_s1  ;;  %p3714_p13 = scmp.lt.s32.totalorder %s3708_s1, %s3708_s1 }
  0x1e   :  { %p3715_p0 = por %p3714_p13, %p3713_p12 }
  0x20   :  { %p3716_p1 = pnand %p3715_p0, %p3709_p11 }
  0x22   :  { %3719 = shalt.err (!%p3716_p1)
}
  0x23   :  { %58 = dma.hbm_to_vmem [thread:$0]  %s4461_s4, 256, %s56_s24, [#allocation12]  }
  0x24   :  { %s3720_s17 = scalar_lea.hbm %s4457_s0, 128 }
  0x25   :  { %p3721_p2 = scmp.ne.s32.totalorder %s4457_s0, %s3720_s17  ;;  %p3724_p3 = scmp.lt.u32.totalorder %s3720_s17, %s4457_s0 }
  0x27   :  { %p3726_p4 = pnand %p3724_p3, %p3721_p2 }
  0x29   :  { %3729 = shalt.err (!%p3726_p4)
}
  0x2a   :  { %s3730_s22 = scalar_lea.vmem %s24_s26, 128  ;;  %p3735_p6 = scmp.lt.s32.totalorder %s24_s26, %s24_s26 }
  0x2b   :  { %p3731_p5 = scmp.ne.s32.totalorder %s24_s26, %s3730_s22  ;;  %p3736_p7 = scmp.lt.s32.totalorder %s3730_s22, %s3730_s22 }
  0x2d   :  { %p3737_p8 = por %p3736_p7, %p3735_p6 }
  0x2f   :  { %p3738_p9 = pnand %p3737_p8, %p3731_p5 }
  0x31   :  { %3741 = shalt.err (!%p3738_p9)
}
  0x32   :  { %26 = dma.hbm_to_vmem [thread:$0]  %s4457_s0, 128, %s24_s26, [#allocation7]  }
  0x33   :  { %s3869_s24 = smov [#allocation10]   ;;  %s3870_s27 = smov [#allocation13]  }
  0x34   :  { %s45_s25 = sshll.u32 %s3869_s24, 4  ;;  %s65_s28 = sshll.u32 %s3870_s27, 4  ;;  %s46_s25 = int_to_ptr.vmem [resolvable:$true] %s45_s25  ;;  %s66_s28 = int_to_ptr.vmem [resolvable:$true] %s65_s28 }
  0x35   :  { %s3742_s11 = scalar_lea.hbm %s4459_s2, 128 }
  0x36   :  { %p3743_p10 = scmp.ne.s32.totalorder %s4459_s2, %s3742_s11  ;;  %p3746_p11 = scmp.lt.u32.totalorder %s3742_s11, %s4459_s2 }
  0x38   :  { %p3748_p12 = pnand %p3746_p11, %p3743_p10 }
  0x3a   :  { %3751 = shalt.err (!%p3748_p12)
}
  0x3b   :  { %s3752_s0 = scalar_lea.vmem %s46_s25, 128  ;;  %p3757_p0 = scmp.lt.s32.totalorder %s46_s25, %s46_s25 }
  0x3c   :  { %p3753_p13 = scmp.ne.s32.totalorder %s46_s25, %s3752_s0  ;;  %p3758_p1 = scmp.lt.s32.totalorder %s3752_s0, %s3752_s0 }
  0x3e   :  { %p3759_p2 = por %p3758_p1, %p3757_p0 }
  0x40   :  { %p3760_p3 = pnand %p3759_p2, %p3753_p13 }
  0x42   :  { %3763 = shalt.err (!%p3760_p3)
}
  0x43   :  { %48 = dma.hbm_to_vmem [thread:$0]  %s4459_s2, 128, %s46_s25, [#allocation9]  }
  0x44   :  { %s3764_s17 = scalar_lea.hbm %s4463_s6, 512 }
  0x45   :  { %p3765_p4 = scmp.ne.s32.totalorder %s4463_s6, %s3764_s17  ;;  %p3768_p5 = scmp.lt.u32.totalorder %s3764_s17, %s4463_s6 }
  0x47   :  { %p3770_p6 = pnand %p3768_p5, %p3765_p4 }
  0x49   :  { %3773 = shalt.err (!%p3770_p6)
}
  0x4a   :  { %s3774_s22 = scalar_lea.vmem %s66_s28, 512  ;;  %p3779_p8 = scmp.lt.s32.totalorder %s66_s28, %s66_s28 }
  0x4b   :  { %p3775_p7 = scmp.ne.s32.totalorder %s66_s28, %s3774_s22  ;;  %p3780_p9 = scmp.lt.s32.totalorder %s3774_s22, %s3774_s22 }
  0x4d   :  { %p3781_p10 = por %p3780_p9, %p3779_p8 }
  0x4f   :  { %p3782_p11 = pnand %p3781_p10, %p3775_p7 }
  0x51   :  { %3785 = shalt.err (!%p3782_p11)
}
  0x52   :  { %68 = dma.hbm_to_vmem [thread:$0]  %s4463_s6, 512, %s66_s28, [#allocation12]  }
  0x53   :  { %3852 = dma.done.wait [#allocation7], 128  }
  0x54   :  { %3853 = vsyncadd [#allocation7], 4294967168 }
  0x55   :  { %3854 = dma.done.wait [#allocation9], 1152  }
  0x56   :  { %3855 = vsyncadd [#allocation9], 4294966144 }
  0x57   :  { %3856 = dma.done.wait [#allocation12], 768  }
  0x58   :  { %3857 = vsyncadd [#allocation12], 4294966528  ;;  %v3871_v0 = vmov 0   ;;  %v3636_v1 = vld [vmem:[#allocation8 + $0x4] ss:$8 sps:$4 sm:$0xff]   ;;  %v110_v9 = vld [vmem:[#allocation6] sm:$0xff] }
  0x59   :  { %208 = vmatprep.mubr.bf16.mxu0 %v3871_v0  ;;  %v3638_v2 = vld [vmem:[#allocation8] ss:$8 sps:$4 sm:$0xff]   ;;  %176 = vmatprep.subr.bf16.mxu0 %v3636_v1  ;;  %v3639_v3 = vld [vmem:[#allocation8 + $0x14] ss:$8 sps:$4 sm:$0xff]   ;;  %v3641_v4 = vld [vmem:[#allocation8 + $0x10] ss:$8 sps:$4 sm:$0xff]   ;;  %v120_v10 = vpack.c.bf16 %v110_v9, %v110_v9 }
  0x5a   :  { %177 = vmatpush1.bf16.msra.mxu0 %v3638_v2  ;;  %v3642_v5 = vld [vmem:[#allocation8 + $0x24] ss:$8 sps:$4 sm:$0xff]   ;;  %v3644_v6 = vld [vmem:[#allocation8 + $0x20] ss:$8 sps:$4 sm:$0xff]   ;;  %v3645_v7 = vld [vmem:[#allocation8 + $0x34] ss:$8 sps:$4 sm:$0xff]  }
  0x5b   :  { %178 = vmatprep.subr.bf16.mxu0 %v3639_v3  ;;  %v3647_v8 = vld [vmem:[#allocation8 + $0x30] ss:$8 sps:$4 sm:$0xff]   ;;  %vm172_vm0 = vcmask 523264   ;;  %s3872_s6 = smov [#allocation2]   ;;  %s3873_s24 = smov [#allocation3]  }
  0x5c   :  { %s94_s23 = sshll.u32 %s3872_s6, 4  ;;  %s106_s25 = sshll.u32 %s3873_s24, 4  ;;  %s95_s23 = int_to_ptr.vmem [resolvable:$true] %s94_s23  ;;  %s107_s25 = int_to_ptr.vmem [resolvable:$true] %s106_s25 }
  0x5d   :  { %s3786_s29 = scalar_lea.hbm %s4460_s3, 4096 }
  0x5e   :  { %179 = vmatpush1.bf16.msra.mxu0 %v3641_v4  ;;  %p3787_p12 = scmp.ne.s32.totalorder %s4460_s3, %s3786_s29  ;;  %p3790_p13 = scmp.lt.u32.totalorder %s3786_s29, %s4460_s3 }
  0x5f   :  { %180 = vmatprep.subr.bf16.mxu0 %v3642_v5 }
  0x60   :  { %p3792_p0 = pnand %p3790_p13, %p3787_p12 }
  0x62   :  { %181 = vmatpush1.bf16.msra.mxu0 %v3644_v6 }
  0x63   :  { %182 = vmatprep.subr.bf16.mxu0 %v3645_v7 }
  0x66   :  { %183 = vmatpush1.bf16.msra.mxu0 %v3647_v8 }
  0x69   :  { %3479 = vmatmul.mubr.msk.bf16.vlgmr.msra.gmra.mrb[0].mxu0 %vm172_vm0, %v120_v10 }
  0x6a   :  { %3795 = shalt.err (!%p3792_p0)  }
  0x6b   :  { %s3796_s1 = scalar_lea.vmem %s95_s23, 4096  ;;  %p3801_p2 = scmp.lt.s32.totalorder %s95_s23, %s95_s23 }
  0x6c   :  { %p3797_p1 = scmp.ne.s32.totalorder %s95_s23, %s3796_s1  ;;  %p3802_p3 = scmp.lt.s32.totalorder %s3796_s1, %s3796_s1 }
  0x6e   :  { %p3803_p4 = por %p3802_p3, %p3801_p2 }
  0x70   :  { %p3804_p5 = pnand %p3803_p4, %p3797_p1 }
  0x72   :  { %3807 = shalt.err (!%p3804_p5)  }
  0x73   :  { %97 = dma.hbm_to_vmem [thread:$0]  %s4460_s3, 4096, %s95_s23, [#allocation5] }
  0x74   :  { %s3808_s15 = scalar_lea.hbm %s4462_s5, 16384 }
  0x75   :  { %p3809_p6 = scmp.ne.s32.totalorder %s4462_s5, %s3808_s15  ;;  %p3812_p7 = scmp.lt.u32.totalorder %s3808_s15, %s4462_s5 }
  0x77   :  { %p3814_p8 = pnand %p3812_p7, %p3809_p6 }
  0x79   :  { %3817 = shalt.err (!%p3814_p8)  }
  0x7a   :  { %s3818_s20 = scalar_lea.vmem %s107_s25, 16384  ;;  %p3823_p10 = scmp.lt.s32.totalorder %s107_s25, %s107_s25 }
  0x7b   :  { %p3819_p9 = scmp.ne.s32.totalorder %s107_s25, %s3818_s20  ;;  %p3824_p11 = scmp.lt.s32.totalorder %s3818_s20, %s3818_s20 }
  0x7d   :  { %p3825_p12 = por %p3824_p11, %p3823_p10 }
  0x7f   :  { %p3826_p13 = pnand %p3825_p12, %p3819_p9 }
  0x81   :  { %3829 = shalt.err (!%p3826_p13)  }
  0x82   :  { %109 = dma.hbm_to_vmem [thread:$0]  %s4462_s5, 16384, %s107_s25, [#allocation5 + $0x1]  ;;  %v122_v11 = vlaneseq  ;;  %v119_v14 = vld [vmem:[#allocation10] ss:$4 sm:$0x3] }
  0x83   :  { %v3874_v2 = vmov 1966171168   ;;  %v222_v10 = vld [vmem:[#allocation10 + $0x1] ss:$4 sm:$0x3] }
  0x84   :  { %v4010_v12 = vshrl.u32 %v122_v11, 7  ;;  %v270_v3 = vunpack.c.l.s4 %v3874_v2 }
  0x86   :  { %v4013_v13 = vsub.s32 0, %v4010_v12  ;;  %v4016_v15 = vsub.s32 1, %v4010_v12  ;;  %v271_v4 = vunpack.c.0.s8 %v270_v3 }
  0x88   :  { %v125_v16 = vrot.slane %v119_v14, %v4013_v13  ;;  %v129_v17 = vrot.slane %v119_v14, %v4016_v15  ;;  %v4021_v6 = vsub.s32 %v271_v4, %v4010_v12 }
 0x13c   :  { %v210_v18 = vpop.f32.mrb[0].mxu0 }
 0x13d   :  { %v211_v19 = vadd.f32 %v210_v18, %v125_v16  ;;  %v212_v20 = vpop.f32.mrb[1].mxu0 }
 0x13e   :  { %v213_v21 = vadd.f32 %v212_v20, %v129_v17  ;;  %v214_v22 = vpop.f32.mrb[2].mxu0 }
 0x13f   :  { %v217_v23 = vmul.f32 0.01, %v211_v19  ;;  %v215_v24 = vpop.f32.mrb[3].mxu0 }
 0x140   :  { %v218_v25 = vmul.f32 0.01, %v213_v21  ;;  %v224_v24 = vld [vmem:[#allocation10 + $0x2] ss:$4 sm:$0x3] }
 0x141   :  { %v219_v26 = vmax.f32 %v211_v19, %v217_v23 }
 0x142   :  { %v220_v27 = vmax.f32 %v213_v21, %v218_v25 }
 0x143   :  { %v225_v28 = vrot.slane %v219_v26, 4  ;;  %v240_v29 = vmul.f32 %v219_v26, %v219_v26 }
 0x144   :  { %v231_v30 = vrot.slane %v220_v27, 4  ;;  %v241_v31 = vmul.f32 %v220_v27, %v220_v27 }
 0x145   :  { %v226_v32 = vadd.f32 %v225_v28, %v219_v26  ;;  %v242_v33 = vrot.slane %v240_v29, 4 }
 0x146   :  { %v232_v34 = vadd.f32 %v231_v30, %v220_v27  ;;  %v248_v35 = vrot.slane %v241_v31, 4 }
 0x147   :  { %v227_v36 = vrot.slane %v226_v32, 2  ;;  %v243_v37 = vadd.f32 %v242_v33, %v240_v29 }
 0x148   :  { %v233_v38 = vrot.slane %v232_v34, 2  ;;  %v249_v39 = vadd.f32 %v248_v35, %v241_v31 }
 0x149   :  { %v228_v40 = vadd.f32 %v227_v36, %v226_v32  ;;  %v244_v41 = vrot.slane %v243_v37, 2 }
 0x14a   :  { %v234_v42 = vadd.f32 %v233_v38, %v232_v34  ;;  %v250_v43 = vrot.slane %v249_v39, 2 }
 0x14b   :  { %v229_v44 = vrot.slane %v228_v40, 1  ;;  %v245_v45 = vadd.f32 %v244_v41, %v243_v37 }
 0x14c   :  { %v235_v46 = vrot.slane %v234_v42, 1  ;;  %v251_v47 = vadd.f32 %v250_v43, %v249_v39 }
 0x14d   :  { %v230_v48 = vadd.f32 %v229_v44, %v228_v40  ;;  %v246_v49 = vrot.slane %v245_v45, 1 }
 0x14e   :  { %v236_v50 = vadd.f32 %v235_v46, %v234_v42  ;;  %v252_v51 = vrot.slane %v251_v47, 1 }
 0x14f   :  { %v238_v52 = vmul.f32 0.125, %v230_v48  ;;  %v247_v53 = vadd.f32 %v246_v49, %v245_v45 }
 0x150   :  { %v239_v54 = vmul.f32 0.125, %v236_v50  ;;  %v253_v55 = vadd.f32 %v252_v51, %v251_v47 }
 0x151   :  { %v254_v56 = vmul.f32 0.125, %v247_v53  ;;  %v256_v57 = vmul.f32 %v238_v52, %v238_v52 }
 0x152   :  { %v255_v58 = vmul.f32 0.125, %v253_v55  ;;  %v257_v59 = vmul.f32 %v239_v54, %v239_v54 }
 0x153   :  { %v258_v60 = vsub.f32 %v254_v56, %v256_v57 }
 0x154   :  { %v259_v61 = vsub.f32 %v255_v58, %v257_v59 }
 0x155   :  { %v260_v62 = vmax.f32 %v258_v60, 0.0 }
 0x156   :  { %v261_v63 = vmax.f32 %v259_v61, 0.0 }
 0x157   :  { %v262_v0 = vadd.f32 1e-05, %v260_v62 }
 0x158   :  { %v263_v1 = vadd.f32 1e-05, %v261_v63 }
 0x159   :  { %3648 = vrsqrt.f32 %v262_v0 }
 0x15a   :  { %3650 = vrsqrt.f32 %v263_v1 }
 0x163   :  { %v3649_v5 = vpop.eup %3648 }
 0x164   :  { %v3651_v7 = vpop.eup %3650 }
 0x165   :  { %v268_v8 = vcombine.low %v3649_v5, %v3651_v7 }
 0x167   :  { %v275_v9 = vrot.slane %v268_v8, %v4021_v6 }
 0x169   :  { %v282_v11 = vrot.slane %v275_v9, %v4021_v6 }
 0x16b   :  { %v284_v14 = vmul.f32 %v282_v11, %v222_v10 }
 0x16d   :  { %v289_v16 = vrot.slane %v284_v14, %v4013_v13  ;;  %v293_v17 = vrot.slane %v284_v14, %v4016_v15 }
 0x16f   :  { %v296_v18 = vmul.f32 %v289_v16, %v238_v52  ;;  %v297_v19 = vmul.f32 %v293_v17, %v239_v54  ;;  %v317_v20 = vmul.f32 %v289_v16, %v219_v26  ;;  %v318_v21 = vmul.f32 %v293_v17, %v220_v27 }
 0x171   :  { %v300_v22 = vcombine.low %v296_v18, %v297_v19 }
 0x173   :  { %v307_v23 = vrot.slane %v300_v22, %v4021_v6 }
 0x175   :  { %v314_v25 = vrot.slane %v307_v23, %v4021_v6 }
 0x177   :  { %v316_v28 = vsub.f32 %v224_v24, %v314_v25 }
 0x179   :  { %v323_v29 = vrot.slane %v316_v28, %v4013_v13  ;;  %v327_v30 = vrot.slane %v316_v28, %v4016_v15 }
 0x17b   :  { %v4031_v31 = vadd.f32 %v323_v29, %v317_v20  ;;  %v331_v32 = vadd.f32 %v327_v30, %v318_v21 }
 0x17c   :  { %3858 = dma.done.wait [#allocation5], 4096 }
 0x17d   :  { %3859 = vsyncadd [#allocation5], 4294963200  ;;  %v4033_v33 = vpack.c.bf16 %v331_v32, %v331_v32  ;;  %v349_v26 = vld [vmem:[#allocation2 + $0x8] sm:$0xff]  ;;  %v348_v27 = vld [vmem:[#allocation2] sm:$0xff]  ;;  %v4038_v23 = vpack.c.bf16 %v4031_v31, %v4031_v31  ;;  %s3875_s5 = smov [#allocation4]   ;;  %s3830_s6 = scalar_lea.hbm %s4464_s7, 28672 }
 0x17e   :  { %v386_v34 = vunpack.c.l.s8.bf16 %v349_v26  ;;  %v390_v35 = vunpack.c.h.s8.bf16 %v349_v26  ;;  %v385_v36 = vunpack.c.l.s8.bf16 %v348_v27  ;;  %v353_v37 = vld [vmem:[#allocation2 + $0x28] sm:$0xff]  ;;  %v389_v38 = vunpack.c.h.s8.bf16 %v348_v27  ;;  %v352_v40 = vld [vmem:[#allocation2 + $0x20] sm:$0xff]  ;;  %v351_v19 = vld [vmem:[#allocation2 + $0x18] sm:$0xff]  ;;  %s344_s22 = sshll.u32 %s3875_s5, 4  ;;  %p3831_p0 = scmp.ne.s32.totalorder %s4464_s7, %s3830_s6  ;;  %s345_s22 = int_to_ptr.vmem [resolvable:$true] %s344_s22 }
 0x17f   :  { %481 = vmatprep.mubr.bf16.mxu0 %v4033_v33  ;;  %v394_v39 = vunpack.c.l.s8.bf16 %v353_v37  ;;  %v393_v41 = vunpack.c.l.s8.bf16 %v352_v40  ;;  %v398_v42 = vunpack.c.h.s8.bf16 %v353_v37  ;;  %v357_v43 = vld [vmem:[#allocation2 + $0x48] sm:$0xff]  ;;  %v397_v44 = vunpack.c.h.s8.bf16 %v352_v40  ;;  %v356_v46 = vld [vmem:[#allocation2 + $0x40] sm:$0xff]  ;;  %v350_v22 = vld [vmem:[#allocation2 + $0x10] sm:$0xff]  ;;  %p3834_p1 = scmp.lt.u32.totalorder %s3830_s6, %s4464_s7 }
 0x180   :  { %449 = vmatprep.subr.bf16.mxu0 %v386_v34  ;;  %v402_v45 = vunpack.c.l.s8.bf16 %v357_v43  ;;  %v401_v47 = vunpack.c.l.s8.bf16 %v356_v46  ;;  %v406_v48 = vunpack.c.h.s8.bf16 %v357_v43  ;;  %v361_v49 = vld [vmem:[#allocation2 + $0x68] sm:$0xff]  ;;  %v405_v50 = vunpack.c.h.s8.bf16 %v356_v46  ;;  %v360_v52 = vld [vmem:[#allocation2 + $0x60] sm:$0xff]  ;;  %v355_v28 = vld [vmem:[#allocation2 + $0x38] sm:$0xff] }
 0x181   :  { %450 = vmatpush1.bf16.msra.mxu0 %v385_v36  ;;  %v410_v51 = vunpack.c.l.s8.bf16 %v361_v49  ;;  %v409_v53 = vunpack.c.l.s8.bf16 %v360_v52  ;;  %v414_v54 = vunpack.c.h.s8.bf16 %v361_v49  ;;  %v365_v55 = vld [vmem:[#allocation2 + $0x88] sm:$0xff]  ;;  %v413_v56 = vunpack.c.h.s8.bf16 %v360_v52  ;;  %v364_v58 = vld [vmem:[#allocation2 + $0x80] sm:$0xff]  ;;  %v354_v32 = vld [vmem:[#allocation2 + $0x30] sm:$0xff]  ;;  %p3836_p2 = pnand %p3834_p1, %p3831_p0 }
 0x182   :  { %451 = vmatprep.subr.bf16.mxu0 %v390_v35  ;;  %v418_v57 = vunpack.c.l.s8.bf16 %v365_v55  ;;  %v417_v59 = vunpack.c.l.s8.bf16 %v364_v58  ;;  %v422_v60 = vunpack.c.h.s8.bf16 %v365_v55  ;;  %v369_v61 = vld [vmem:[#allocation2 + $0xa8] sm:$0xff]  ;;  %v421_v62 = vunpack.c.h.s8.bf16 %v364_v58  ;;  %v368_v0 = vld [vmem:[#allocation2 + $0xa0] sm:$0xff]  ;;  %v359_v31 = vld [vmem:[#allocation2 + $0x58] sm:$0xff] }
 0x183   :  { %v426_v63 = vunpack.c.l.s8.bf16 %v369_v61  ;;  %v425_v1 = vunpack.c.l.s8.bf16 %v368_v0  ;;  %v430_v2 = vunpack.c.h.s8.bf16 %v369_v61  ;;  %v373_v3 = vld [vmem:[#allocation2 + $0xc8] sm:$0xff]  ;;  %v429_v4 = vunpack.c.h.s8.bf16 %v368_v0  ;;  %v372_v7 = vld [vmem:[#allocation2 + $0xc0] sm:$0xff]  ;;  %v358_v36 = vld [vmem:[#allocation2 + $0x50] sm:$0xff] }
 0x184   :  { %v434_v5 = vunpack.c.l.s8.bf16 %v373_v3  ;;  %v433_v8 = vunpack.c.l.s8.bf16 %v372_v7  ;;  %v438_v9 = vunpack.c.h.s8.bf16 %v373_v3  ;;  %v377_v10 = vld [vmem:[#allocation2 + $0xe8] sm:$0xff]  ;;  %v437_v11 = vunpack.c.h.s8.bf16 %v372_v7  ;;  %v376_v16 = vld [vmem:[#allocation2 + $0xe0] sm:$0xff]  ;;  %v4045_v7 = vld [vmem:[#allocation11] ss:$4 sm:$0xf] }
 0x185   :  { %452 = vmatpush1.bf16.msra.mxu0 %v389_v38  ;;  %v442_v14 = vunpack.c.l.s8.bf16 %v377_v10  ;;  %v441_v17 = vunpack.c.l.s8.bf16 %v376_v16  ;;  %v446_v18 = vunpack.c.h.s8.bf16 %v377_v10  ;;  %v445_v20 = vunpack.c.h.s8.bf16 %v376_v16 }
 0x186   :  { %453 = vmatprep.subr.bf16.mxu0 %v394_v39  ;;  %v388_v21 = vunpack.c.l.s8.bf16 %v351_v19  ;;  %v387_v24 = vunpack.c.l.s8.bf16 %v350_v22  ;;  %v392_v25 = vunpack.c.h.s8.bf16 %v351_v19  ;;  %v391_v29 = vunpack.c.h.s8.bf16 %v350_v22  ;;  %v363_v39 = vld [vmem:[#allocation2 + $0x78] sm:$0xff] }
 0x187   :  { %v396_v30 = vunpack.c.l.s8.bf16 %v355_v28  ;;  %v395_v26 = vunpack.c.l.s8.bf16 %v354_v32  ;;  %v400_v27 = vunpack.c.h.s8.bf16 %v355_v28  ;;  %v399_v34 = vunpack.c.h.s8.bf16 %v354_v32 }
 0x188   :  { %v404_v35 = vunpack.c.l.s8.bf16 %v359_v31  ;;  %v403_v37 = vunpack.c.l.s8.bf16 %v358_v36  ;;  %v408_v38 = vunpack.c.h.s8.bf16 %v359_v31  ;;  %v412_v40 = vunpack.c.l.s8.bf16 %v363_v39 }
 0x189   :  { %454 = vmatpush1.bf16.msra.mxu0 %v393_v41  ;;  %v362_v41 = vld [vmem:[#allocation2 + $0x70] sm:$0xff]  ;;  %v416_v43 = vunpack.c.h.s8.bf16 %v363_v39  ;;  %v560_v10 = vrot.slane %v4045_v7, %v4013_v13 }
 0x18a   :  { %455 = vmatprep.subr.bf16.mxu0 %v398_v42  ;;  %v411_v42 = vunpack.c.l.s8.bf16 %v362_v41 }
 0x18d   :  { %456 = vmatpush1.bf16.msra.mxu0 %v397_v44  ;;  %v367_v44 = vld [vmem:[#allocation2 + $0x98] sm:$0xff] }
 0x18e   :  { %457 = vmatprep.subr.bf16.mxu0 %v402_v45  ;;  %v415_v45 = vunpack.c.h.s8.bf16 %v362_v41  ;;  %v420_v46 = vunpack.c.l.s8.bf16 %v367_v44  ;;  %v424_v49 = vunpack.c.h.s8.bf16 %v367_v44 }
 0x191   :  { %458 = vmatpush1.bf16.msra.mxu0 %v401_v47  ;;  %v366_v47 = vld [vmem:[#allocation2 + $0x90] sm:$0xff] }
 0x192   :  { %459 = vmatprep.subr.bf16.mxu0 %v406_v48  ;;  %v419_v48 = vunpack.c.l.s8.bf16 %v366_v47 }
 0x195   :  { %460 = vmatpush1.bf16.msra.mxu0 %v405_v50  ;;  %v371_v50 = vld [vmem:[#allocation2 + $0xb8] sm:$0xff] }
 0x196   :  { %461 = vmatprep.subr.bf16.mxu0 %v410_v51  ;;  %v423_v51 = vunpack.c.h.s8.bf16 %v366_v47  ;;  %v428_v52 = vunpack.c.l.s8.bf16 %v371_v50  ;;  %v432_v55 = vunpack.c.h.s8.bf16 %v371_v50 }
 0x199   :  { %462 = vmatpush1.bf16.msra.mxu0 %v409_v53  ;;  %v370_v53 = vld [vmem:[#allocation2 + $0xb0] sm:$0xff] }
 0x19a   :  { %463 = vmatprep.subr.bf16.mxu0 %v414_v54  ;;  %v427_v54 = vunpack.c.l.s8.bf16 %v370_v53 }
 0x19d   :  { %464 = vmatpush1.bf16.msra.mxu0 %v413_v56  ;;  %v375_v56 = vld [vmem:[#allocation2 + $0xd8] sm:$0xff] }
 0x19e   :  { %465 = vmatprep.subr.bf16.mxu0 %v418_v57  ;;  %v431_v57 = vunpack.c.h.s8.bf16 %v370_v53  ;;  %v436_v58 = vunpack.c.l.s8.bf16 %v375_v56  ;;  %v440_v61 = vunpack.c.h.s8.bf16 %v375_v56 }
 0x1a1   :  { %466 = vmatpush1.bf16.msra.mxu0 %v417_v59  ;;  %v374_v59 = vld [vmem:[#allocation2 + $0xd0] sm:$0xff] }
 0x1a2   :  { %467 = vmatprep.subr.bf16.mxu0 %v422_v60  ;;  %v435_v60 = vunpack.c.l.s8.bf16 %v374_v59 }
 0x1a5   :  { %468 = vmatpush1.bf16.msra.mxu0 %v421_v62  ;;  %v379_v62 = vld [vmem:[#allocation2 + $0xf8] sm:$0xff] }
 0x1a6   :  { %469 = vmatprep.subr.bf16.mxu0 %v426_v63  ;;  %v439_v63 = vunpack.c.h.s8.bf16 %v374_v59  ;;  %v444_v0 = vunpack.c.l.s8.bf16 %v379_v62  ;;  %v448_v3 = vunpack.c.h.s8.bf16 %v379_v62 }
 0x1a9   :  { %470 = vmatpush1.bf16.msra.mxu0 %v425_v1  ;;  %v378_v1 = vld [vmem:[#allocation2 + $0xf0] sm:$0xff] }
 0x1aa   :  { %471 = vmatprep.subr.bf16.mxu0 %v430_v2  ;;  %v443_v2 = vunpack.c.l.s8.bf16 %v378_v1 }
 0x1ad   :  { %472 = vmatpush1.bf16.msra.mxu0 %v429_v4  ;;  %v447_v4 = vunpack.c.h.s8.bf16 %v378_v1 }
 0x1ae   :  { %473 = vmatprep.subr.bf16.mxu0 %v434_v5  ;;  %v4043_v5 = vld [vmem:[#allocation11 + $0x3] ss:$4 sm:$0xf] }
 0x1b1   :  { %474 = vmatpush1.bf16.msra.mxu0 %v433_v8  ;;  %v535_v8 = vrot.slane %v4043_v5, %v4013_v13 }
 0x1b2   :  { %475 = vmatprep.subr.bf16.mxu0 %v438_v9  ;;  %v539_v9 = vrot.slane %v4043_v5, %v4016_v15 }
 0x1b5   :  { %476 = vmatpush1.bf16.msra.mxu0 %v437_v11 }
 0x1b6   :  { %477 = vmatprep.subr.bf16.mxu0 %v442_v14  ;;  %v564_v14 = vrot.slane %v4045_v7, %v4016_v15 }
 0x1b9   :  { %478 = vmatpush1.bf16.msra.mxu0 %v441_v17 }
 0x1ba   :  { %479 = vmatprep.subr.bf16.mxu0 %v446_v18 }
 0x1bd   :  { %480 = vmatpush1.bf16.msra.mxu0 %v445_v20 }
 0x1be   :  { %490 = vmatprep.subr.bf16.mxu0 %v388_v21 }
 0x1c0   :  { %482 = vmatmul.mubr.bf16.vlgmr.msra.gmra.mrb[4].mxu0 %v4038_v23 }
 0x1c1   :  { %491 = vmatpush1.bf16.msra.mxu0 %v387_v24  ;;  %522 = vmatprep.mubr.bf16.mxu0 %v4033_v33  ;;  %v407_v33 = vunpack.c.h.s8.bf16 %v358_v36 }
 0x1c2   :  { %492 = vmatprep.subr.bf16.mxu0 %v392_v25 }
 0x1c5   :  { %493 = vmatpush1.bf16.msra.mxu0 %v391_v29 }
 0x1c6   :  { %494 = vmatprep.subr.bf16.mxu0 %v396_v30 }
 0x1c9   :  { %495 = vmatpush1.bf16.msra.mxu0 %v395_v26 }
 0x1ca   :  { %496 = vmatprep.subr.bf16.mxu0 %v400_v27 }
 0x1cd   :  { %497 = vmatpush1.bf16.msra.mxu0 %v399_v34 }
 0x1ce   :  { %498 = vmatprep.subr.bf16.mxu0 %v404_v35 }
 0x1d1   :  { %499 = vmatpush1.bf16.msra.mxu0 %v403_v37 }
 0x1d2   :  { %500 = vmatprep.subr.bf16.mxu0 %v408_v38 }
 0x1d5   :  { %501 = vmatpush1.bf16.msra.mxu0 %v407_v33 }
 0x1d6   :  { %502 = vmatprep.subr.bf16.mxu0 %v412_v40 }
 0x1d9   :  { %503 = vmatpush1.bf16.msra.mxu0 %v411_v42 }
 0x1da   :  { %504 = vmatprep.subr.bf16.mxu0 %v416_v43 }
 0x1dd   :  { %505 = vmatpush1.bf16.msra.mxu0 %v415_v45 }
 0x1de   :  { %506 = vmatprep.subr.bf16.mxu0 %v420_v46 }
 0x1e1   :  { %507 = vmatpush1.bf16.msra.mxu0 %v419_v48 }
 0x1e2   :  { %508 = vmatprep.subr.bf16.mxu0 %v424_v49 }
 0x1e5   :  { %509 = vmatpush1.bf16.msra.mxu0 %v423_v51 }
 0x1e6   :  { %510 = vmatprep.subr.bf16.mxu0 %v428_v52 }
 0x1e9   :  { %511 = vmatpush1.bf16.msra.mxu0 %v427_v54 }
 0x1ea   :  { %512 = vmatprep.subr.bf16.mxu0 %v432_v55 }
 0x1ed   :  { %513 = vmatpush1.bf16.msra.mxu0 %v431_v57 }
 0x1ee   :  { %514 = vmatprep.subr.bf16.mxu0 %v436_v58 }
 0x1f1   :  { %515 = vmatpush1.bf16.msra.mxu0 %v435_v60 }
 0x1f2   :  { %516 = vmatprep.subr.bf16.mxu0 %v440_v61 }
 0x1f5   :  { %517 = vmatpush1.bf16.msra.mxu0 %v439_v63 }
 0x1f6   :  { %518 = vmatprep.subr.bf16.mxu0 %v444_v0 }
 0x1f9   :  { %519 = vmatpush1.bf16.msra.mxu0 %v443_v2 }
 0x1fa   :  { %520 = vmatprep.subr.bf16.mxu0 %v448_v3 }
 0x1fd   :  { %521 = vmatpush1.bf16.msra.mxu0 %v447_v4 }
 0x200   :  { %523 = vmatmul.mubr.bf16.vlgmr.msra.gmra.mrb[8].mxu0 %v4038_v23 }
 0x293   :  { %v483_v11 = vpop.f32.mrb[4].mxu0 }
 0x294   :  { %v552_v16 = vmul.f32 %v535_v8, %v483_v11  ;;  %v485_v17 = vpop.f32.mrb[5].mxu0 }
 0x295   :  { %v553_v18 = vmul.f32 %v539_v9, %v485_v17  ;;  %v487_v19 = vpop.f32.mrb[6].mxu0 }
 0x296   :  { %v577_v20 = vadd.f32 %v560_v10, %v552_v16  ;;  %v488_v21 = vpop.f32.mrb[7].mxu0 }
 0x297   :  { %v578_v22 = vadd.f32 %v564_v14, %v553_v18 }
 0x298   :  { %v581_v23 = vmul.f32 0.01, %v577_v20 }
 0x299   :  { %v582_v24 = vmul.f32 0.01, %v578_v22 }
 0x29a   :  { %3839 = shalt.err (!%p3836_p2)  }
 0x29b   :  { %s3840_s28 = scalar_lea.vmem %s345_s22, 28672  ;;  %p3845_p4 = scmp.lt.s32.totalorder %s345_s22, %s345_s22 }
 0x29c   :  { %p3841_p3 = scmp.ne.s32.totalorder %s345_s22, %s3840_s28  ;;  %p3846_p5 = scmp.lt.s32.totalorder %s3840_s28, %s3840_s28 }
 0x29e   :  { %p3847_p6 = por %p3846_p5, %p3845_p4 }
 0x2a0   :  { %p3848_p7 = pnand %p3847_p6, %p3841_p3 }
 0x2a2   :  { %3851 = shalt.err (!%p3848_p7)  }
 0x2a3   :  { %347 = dma.hbm_to_vmem [thread:$0]  %s4464_s7, 28672, %s345_s22, [#allocation5 + $0x2]  ;;  %v4067_v25 = vmax.f32 %v577_v20, %v581_v23  ;;  %v4069_v28 = vmax.f32 %v578_v22, %v582_v24  ;;  %v4094_v4 = vsub.s32 2, %v4010_v12  ;;  %v4097_v8 = vsub.s32 3, %v4010_v12 }
 0x2a5   :  { %v593_v29 = vrot.slane %v4067_v25, 4  ;;  %v621_v30 = vmul.f32 %v4067_v25, %v4067_v25  ;;  %v599_v32 = vrot.slane %v4069_v28, 4  ;;  %v622_v26 = vmul.f32 %v4069_v28, %v4069_v28 }
 0x2a6   :  { %v543_v9 = vrot.slane %v4043_v5, %v4094_v4  ;;  %v547_v10 = vrot.slane %v4043_v5, %v4097_v8  ;;  %v568_v11 = vrot.slane %v4045_v7, %v4094_v4  ;;  %v572_v16 = vrot.slane %v4045_v7, %v4097_v8 }
 0x2a7   :  { %v594_v27 = vadd.f32 %v593_v29, %v4067_v25  ;;  %v625_v31 = vrot.slane %v621_v30, 4  ;;  %v600_v34 = vadd.f32 %v599_v32, %v4069_v28  ;;  %v631_v35 = vrot.slane %v622_v26, 4 }
 0x2a9   :  { %v595_v36 = vrot.slane %v594_v27, 2  ;;  %v626_v37 = vadd.f32 %v625_v31, %v621_v30  ;;  %v601_v38 = vrot.slane %v600_v34, 2  ;;  %v632_v39 = vadd.f32 %v631_v35, %v622_v26 }
 0x2ab   :  { %v596_v33 = vadd.f32 %v595_v36, %v594_v27  ;;  %v627_v40 = vrot.slane %v626_v37, 2  ;;  %v602_v41 = vadd.f32 %v601_v38, %v600_v34  ;;  %v633_v42 = vrot.slane %v632_v39, 2 }
 0x2ad   :  { %v597_v43 = vrot.slane %v596_v33, 1  ;;  %v628_v44 = vadd.f32 %v627_v40, %v626_v37  ;;  %v603_v45 = vrot.slane %v602_v41, 1  ;;  %v634_v46 = vadd.f32 %v633_v42, %v632_v39 }
 0x2af   :  { %v598_v47 = vadd.f32 %v597_v43, %v596_v33  ;;  %v629_v48 = vrot.slane %v628_v44, 1  ;;  %v604_v49 = vadd.f32 %v603_v45, %v602_v41  ;;  %v635_v50 = vrot.slane %v634_v46, 1 }
 0x2b1   :  { %v4079_v51 = vmul.f32 0.125, %v598_v47  ;;  %v630_v52 = vadd.f32 %v629_v48, %v628_v44  ;;  %v4081_v53 = vmul.f32 0.125, %v604_v49  ;;  %v636_v54 = vadd.f32 %v635_v50, %v634_v46 }
 0x2b3   :  { %v649_v55 = vmul.f32 0.125, %v630_v52  ;;  %v653_v56 = vmul.f32 %v4079_v51, %v4079_v51  ;;  %v650_v57 = vmul.f32 0.125, %v636_v54  ;;  %v654_v58 = vmul.f32 %v4081_v53, %v4081_v53 }
 0x2b5   :  { %v657_v59 = vsub.f32 %v649_v55, %v653_v56  ;;  %v658_v60 = vsub.f32 %v650_v57, %v654_v58 }
 0x2b7   :  { %v661_v61 = vmax.f32 %v657_v59, 0.0  ;;  %v662_v62 = vmax.f32 %v658_v60, 0.0 }
 0x2b9   :  { %v665_v63 = vadd.f32 1e-05, %v661_v61  ;;  %v666_v0 = vadd.f32 1e-05, %v662_v62 }
 0x2bb   :  { %3652 = vrsqrt.f32 %v665_v63 }
 0x2bc   :  { %3654 = vrsqrt.f32 %v666_v0 }
 0x2c5   :  { %v4087_v1 = vpop.eup %3652 }
 0x2c6   :  { %v4089_v2 = vpop.eup %3654 }
 0x2c7   :  { %v677_v3 = vcombine.low %v4087_v1, %v4089_v2 }
 0x2d3   :  { %v524_v14 = vpop.f32.mrb[8].mxu0 }
 0x2d4   :  { %v554_v17 = vmul.f32 %v543_v9, %v524_v14  ;;  %v526_v18 = vpop.f32.mrb[9].mxu0 }
 0x2d5   :  { %v555_v19 = vmul.f32 %v547_v10, %v526_v18  ;;  %v528_v20 = vpop.f32.mrb[10].mxu0 }
 0x2d6   :  { %v579_v21 = vadd.f32 %v568_v11, %v554_v17  ;;  %v529_v22 = vpop.f32.mrb[11].mxu0 }
 0x2d7   :  { %v580_v23 = vadd.f32 %v572_v16, %v555_v19  ;;  %v685_v16 = vrot.slane %v677_v3, %v4021_v6  ;;  %v590_v19 = vld [vmem:[#allocation11 + $0x1] ss:$4 sm:$0xf] }
 0x2d8   :  { %v583_v24 = vmul.f32 0.01, %v579_v21 }
 0x2d9   :  { %v584_v29 = vmul.f32 0.01, %v580_v23 }
 0x2da   :  { %v587_v30 = vmax.f32 %v579_v21, %v583_v24 }
 0x2db   :  { %v588_v32 = vmax.f32 %v580_v23, %v584_v29 }
 0x2dc   :  { %v605_v26 = vrot.slane %v587_v30, 4  ;;  %v623_v5 = vmul.f32 %v587_v30, %v587_v30 }
 0x2dd   :  { %v611_v27 = vrot.slane %v588_v32, 4  ;;  %v624_v31 = vmul.f32 %v588_v32, %v588_v32 }
 0x2de   :  { %v606_v34 = vadd.f32 %v605_v26, %v587_v30  ;;  %v637_v35 = vrot.slane %v623_v5, 4 }
 0x2df   :  { %v612_v36 = vadd.f32 %v611_v27, %v588_v32  ;;  %v643_v37 = vrot.slane %v624_v31, 4 }
 0x2e0   :  { %v607_v7 = vrot.slane %v606_v34, 2  ;;  %v638_v38 = vadd.f32 %v637_v35, %v623_v5 }
 0x2e1   :  { %v613_v39 = vrot.slane %v612_v36, 2  ;;  %v644_v33 = vadd.f32 %v643_v37, %v624_v31 }
 0x2e2   :  { %v608_v40 = vadd.f32 %v607_v7, %v606_v34  ;;  %v639_v41 = vrot.slane %v638_v38, 2 }
 0x2e3   :  { %v614_v42 = vadd.f32 %v613_v39, %v612_v36  ;;  %v645_v43 = vrot.slane %v644_v33, 2 }
 0x2e4   :  { %v609_v44 = vrot.slane %v608_v40, 1  ;;  %v640_v45 = vadd.f32 %v639_v41, %v638_v38 }
 0x2e5   :  { %v615_v46 = vrot.slane %v614_v42, 1  ;;  %v646_v47 = vadd.f32 %v645_v43, %v644_v33 }
 0x2e6   :  { %v610_v48 = vadd.f32 %v609_v44, %v608_v40  ;;  %v641_v49 = vrot.slane %v640_v45, 1  ;;  %v592_v40 = vld [vmem:[#allocation11 + $0x2] ss:$4 sm:$0xf] }
 0x2e7   :  { %v616_v50 = vadd.f32 %v615_v46, %v614_v42  ;;  %v647_v52 = vrot.slane %v646_v47, 1 }
 0x2e8   :  { %v619_v54 = vmul.f32 0.125, %v610_v48  ;;  %v642_v55 = vadd.f32 %v641_v49, %v640_v45 }
 0x2e9   :  { %v620_v56 = vmul.f32 0.125, %v616_v50  ;;  %v648_v57 = vadd.f32 %v647_v52, %v646_v47 }
 0x2ea   :  { %v651_v58 = vmul.f32 0.125, %v642_v55  ;;  %v655_v59 = vmul.f32 %v619_v54, %v619_v54 }
 0x2eb   :  { %v652_v60 = vmul.f32 0.125, %v648_v57  ;;  %v656_v61 = vmul.f32 %v620_v56, %v620_v56 }
 0x2ec   :  { %v659_v62 = vsub.f32 %v651_v58, %v655_v59 }
 0x2ed   :  { %v660_v63 = vsub.f32 %v652_v60, %v656_v61 }
 0x2ee   :  { %v663_v0 = vmax.f32 %v659_v62, 0.0 }
 0x2ef   :  { %v664_v1 = vmax.f32 %v660_v63, 0.0 }
 0x2f0   :  { %v667_v2 = vadd.f32 1e-05, %v663_v0 }
 0x2f1   :  { %v668_v9 = vadd.f32 1e-05, %v664_v1 }
 0x2f2   :  { %3656 = vrsqrt.f32 %v667_v2 }
 0x2f3   :  { %3658 = vrsqrt.f32 %v668_v9 }
 0x2fc   :  { %v3657_v10 = vpop.eup %3656 }
 0x2fd   :  { %v3659_v11 = vpop.eup %3658 }
 0x2fe   :  { %v678_v14 = vcombine.low %v3657_v10, %v3659_v11 }
 0x300   :  { %v692_v17 = vrot.slane %v678_v14, %v4021_v6 }
 0x302   :  { %v693_v18 = vcombine.low %v685_v16, %v692_v17 }
 0x304   :  { %v700_v20 = vrot.slane %v693_v18, %v4021_v6 }
 0x306   :  { %v702_v21 = vmul.f32 %v700_v20, %v590_v19 }
 0x308   :  { %v707_v22 = vrot.slane %v702_v21, %v4013_v13  ;;  %v711_v23 = vrot.slane %v702_v21, %v4016_v15  ;;  %v715_v24 = vrot.slane %v702_v21, %v4094_v4  ;;  %v719_v29 = vrot.slane %v702_v21, %v4097_v8 }
 0x30a   :  { %v724_v26 = vmul.f32 %v707_v22, %v4079_v51  ;;  %v725_v5 = vmul.f32 %v711_v23, %v4081_v53  ;;  %v726_v3 = vmul.f32 %v715_v24, %v619_v54  ;;  %v727_v27 = vmul.f32 %v719_v29, %v620_v56 }
 0x30b   :  { %v758_v31 = vmul.f32 %v707_v22, %v4067_v25  ;;  %v759_v34 = vmul.f32 %v711_v23, %v4069_v28  ;;  %v760_v35 = vmul.f32 %v715_v24, %v587_v30  ;;  %v761_v36 = vmul.f32 %v719_v29, %v588_v32 }
 0x30c   :  { %v732_v37 = vcombine.low %v724_v26, %v725_v5  ;;  %v733_v7 = vcombine.low %v726_v3, %v727_v27 }
 0x30e   :  { %v740_v38 = vrot.slane %v732_v37, %v4021_v6  ;;  %v747_v39 = vrot.slane %v733_v7, %v4021_v6 }
 0x310   :  { %v748_v33 = vcombine.low %v740_v38, %v747_v39 }
 0x312   :  { %v755_v51 = vrot.slane %v748_v33, %v4021_v6 }
 0x314   :  { %v757_v41 = vsub.f32 %v592_v40, %v755_v51 }
 0x316   :  { %v766_v53 = vrot.slane %v757_v41, %v4013_v13  ;;  %v770_v42 = vrot.slane %v757_v41, %v4016_v15  ;;  %v774_v25 = vrot.slane %v757_v41, %v4094_v4  ;;  %v778_v28 = vrot.slane %v757_v41, %v4097_v8 }
 0x318   :  { %v4125_v30 = vadd.f32 %v766_v53, %v758_v31  ;;  %v784_v32 = vadd.f32 %v770_v42, %v759_v34  ;;  %v4127_v43 = vadd.f32 %v774_v25, %v760_v35  ;;  %v4129_v44 = vadd.f32 %v778_v28, %v761_v36 }
 0x319   :  { %3860 = dma.done.wait [#allocation5 + $0x1], 16384 }
 0x31a   :  { %3861 = vsyncadd [#allocation5 + $0x1], 4294950912  ;;  %v4131_v45 = vpack.c.bf16 %v784_v32, %v784_v32  ;;  %v792_v46 = vld [vmem:[#allocation3 + $0x8] sm:$0xff]  ;;  %v794_v47 = vld [vmem:[#allocation3 + $0x18] sm:$0xff] }
 0x31b   :  { %v791_v48 = vld [vmem:[#allocation3] sm:$0xff]  ;;  %v927_v49 = vunpack.c.l.s8.bf16 %v792_v46  ;;  %v935_v50 = vunpack.c.h.s8.bf16 %v792_v46  ;;  %v929_v52 = vunpack.c.l.s8.bf16 %v794_v47  ;;  %v937_v54 = vunpack.c.h.s8.bf16 %v794_v47  ;;  %v793_v55 = vld [vmem:[#allocation3 + $0x10] sm:$0xff]  ;;  %v800_v58 = vld [vmem:[#allocation3 + $0x48] sm:$0xff] }
 0x31c   :  { %1214 = vmatprep.mubr.bf16.mxu1 %v4131_v45  ;;  %1296 = vmatprep.mubr.bf16.mxu0 %v4131_v45  ;;  %v926_v56 = vunpack.c.l.s8.bf16 %v791_v48  ;;  %v928_v57 = vunpack.c.l.s8.bf16 %v793_v55  ;;  %v802_v59 = vld [vmem:[#allocation3 + $0x58] sm:$0xff]  ;;  %v934_v60 = vunpack.c.h.s8.bf16 %v791_v48  ;;  %v936_v61 = vunpack.c.h.s8.bf16 %v793_v55  ;;  %v799_v0 = vld [vmem:[#allocation3 + $0x40] sm:$0xff]  ;;  %v801_v1 = vld [vmem:[#allocation3 + $0x50] sm:$0xff] }
 0x31d   :  { %1182 = vmatprep.subr.bf16.mxu1 %v927_v49  ;;  %1264 = vmatprep.subr.bf16.mxu0 %v929_v52  ;;  %v943_v62 = vunpack.c.l.s8.bf16 %v800_v58  ;;  %v945_v63 = vunpack.c.l.s8.bf16 %v802_v59  ;;  %v942_v2 = vunpack.c.l.s8.bf16 %v799_v0  ;;  %v944_v9 = vunpack.c.l.s8.bf16 %v801_v1  ;;  %v808_v14 = vld [vmem:[#allocation3 + $0x88] sm:$0xff]  ;;  %v810_v16 = vld [vmem:[#allocation3 + $0x98] sm:$0xff]  ;;  %v807_v21 = vld [vmem:[#allocation3 + $0x80] sm:$0xff] }
 0x31e   :  { %1183 = vmatpush1.bf16.msra.mxu1 %v926_v56  ;;  %1265 = vmatpush1.bf16.msra.mxu0 %v928_v57  ;;  %v951_v10 = vunpack.c.h.s8.bf16 %v800_v58  ;;  %v953_v11 = vunpack.c.h.s8.bf16 %v802_v59  ;;  %v950_v17 = vunpack.c.h.s8.bf16 %v799_v0  ;;  %v952_v18 = vunpack.c.h.s8.bf16 %v801_v1  ;;  %v809_v22 = vld [vmem:[#allocation3 + $0x90] sm:$0xff]  ;;  %v816_v5 = vld [vmem:[#allocation3 + $0xc8] sm:$0xff]  ;;  %v818_v3 = vld [vmem:[#allocation3 + $0xd8] sm:$0xff] }
 0x31f   :  { %1184 = vmatprep.subr.bf16.mxu1 %v935_v50  ;;  %1266 = vmatprep.subr.bf16.mxu0 %v937_v54  ;;  %v959_v19 = vunpack.c.l.s8.bf16 %v808_v14  ;;  %v961_v20 = vunpack.c.l.s8.bf16 %v810_v16  ;;  %v958_v23 = vunpack.c.l.s8.bf16 %v807_v21  ;;  %v960_v24 = vunpack.c.l.s8.bf16 %v809_v22  ;;  %v815_v36 = vld [vmem:[#allocation3 + $0xc0] sm:$0xff]  ;;  %v817_v37 = vld [vmem:[#allocation3 + $0xd0] sm:$0xff]  ;;  %v824_v40 = vld [vmem:[#allocation3 + $0x108] sm:$0xff] }
 0x320   :  { %v967_v29 = vunpack.c.h.s8.bf16 %v808_v14  ;;  %v969_v26 = vunpack.c.h.s8.bf16 %v810_v16  ;;  %v966_v27 = vunpack.c.h.s8.bf16 %v807_v21  ;;  %v968_v31 = vunpack.c.h.s8.bf16 %v809_v22  ;;  %v826_v51 = vld [vmem:[#allocation3 + $0x118] sm:$0xff]  ;;  %v823_v28 = vld [vmem:[#allocation3 + $0x100] sm:$0xff]  ;;  %v825_v32 = vld [vmem:[#allocation3 + $0x110] sm:$0xff] }
 0x321   :  { %v975_v34 = vunpack.c.l.s8.bf16 %v816_v5  ;;  %v977_v35 = vunpack.c.l.s8.bf16 %v818_v3  ;;  %v974_v7 = vunpack.c.l.s8.bf16 %v815_v36  ;;  %v976_v38 = vunpack.c.l.s8.bf16 %v817_v37  ;;  %v832_v50 = vld [vmem:[#allocation3 + $0x148] sm:$0xff]  ;;  %v834_v52 = vld [vmem:[#allocation3 + $0x158] sm:$0xff]  ;;  %v831_v58 = vld [vmem:[#allocation3 + $0x140] sm:$0xff] }
 0x322   :  { %1185 = vmatpush1.bf16.msra.mxu1 %v934_v60  ;;  %1267 = vmatpush1.bf16.msra.mxu0 %v936_v61  ;;  %v983_v39 = vunpack.c.h.s8.bf16 %v816_v5  ;;  %v985_v33 = vunpack.c.h.s8.bf16 %v818_v3  ;;  %v982_v41 = vunpack.c.h.s8.bf16 %v815_v36  ;;  %v984_v53 = vunpack.c.h.s8.bf16 %v817_v37  ;;  %v833_v59 = vld [vmem:[#allocation3 + $0x150] sm:$0xff]  ;;  %v840_v0 = vld [vmem:[#allocation3 + $0x188] sm:$0xff]  ;;  %v842_v1 = vld [vmem:[#allocation3 + $0x198] sm:$0xff] }
 0x323   :  { %1186 = vmatprep.subr.bf16.mxu1 %v943_v62  ;;  %1268 = vmatprep.subr.bf16.mxu0 %v945_v63  ;;  %v991_v42 = vunpack.c.l.s8.bf16 %v824_v40  ;;  %v993_v25 = vunpack.c.l.s8.bf16 %v826_v51  ;;  %v990_v46 = vunpack.c.l.s8.bf16 %v823_v28  ;;  %v992_v47 = vunpack.c.l.s8.bf16 %v825_v32  ;;  %v839_v14 = vld [vmem:[#allocation3 + $0x180] sm:$0xff]  ;;  %v841_v16 = vld [vmem:[#allocation3 + $0x190] sm:$0xff]  ;;  %v848_v21 = vld [vmem:[#allocation3 + $0x1c8] sm:$0xff] }
 0x324   :  { %v999_v48 = vunpack.c.h.s8.bf16 %v824_v40  ;;  %v1001_v49 = vunpack.c.h.s8.bf16 %v826_v51  ;;  %v998_v54 = vunpack.c.h.s8.bf16 %v823_v28  ;;  %v1000_v55 = vunpack.c.h.s8.bf16 %v825_v32  ;;  %v850_v22 = vld [vmem:[#allocation3 + $0x1d8] sm:$0xff]  ;;  %v847_v5 = vld [vmem:[#allocation3 + $0x1c0] sm:$0xff]  ;;  %v849_v3 = vld [vmem:[#allocation3 + $0x1d0] sm:$0xff] }
 0x325   :  { %v1007_v56 = vunpack.c.l.s8.bf16 %v832_v50  ;;  %v1009_v57 = vunpack.c.l.s8.bf16 %v834_v52  ;;  %v1006_v60 = vunpack.c.l.s8.bf16 %v831_v58  ;;  %v1008_v61 = vunpack.c.l.s8.bf16 %v833_v59  ;;  %v856_v36 = vld [vmem:[#allocation3 + $0x208] sm:$0xff]  ;;  %v858_v37 = vld [vmem:[#allocation3 + $0x218] sm:$0xff]  ;;  %v855_v40 = vld [vmem:[#allocation3 + $0x200] sm:$0xff] }
 0x326   :  { %1187 = vmatpush1.bf16.msra.mxu1 %v942_v2  ;;  %1269 = vmatpush1.bf16.msra.mxu0 %v944_v9  ;;  %v1015_v62 = vunpack.c.h.s8.bf16 %v832_v50  ;;  %v1017_v63 = vunpack.c.h.s8.bf16 %v834_v52  ;;  %v1014_v2 = vunpack.c.h.s8.bf16 %v831_v58  ;;  %v1016_v9 = vunpack.c.h.s8.bf16 %v833_v59  ;;  %v857_v51 = vld [vmem:[#allocation3 + $0x210] sm:$0xff]  ;;  %v864_v32 = vld [vmem:[#allocation3 + $0x248] sm:$0xff]  ;;  %v863_v52 = vld [vmem:[#allocation3 + $0x240] sm:$0xff] }
 0x327   :  { %1188 = vmatprep.subr.bf16.mxu1 %v951_v10  ;;  %1270 = vmatprep.subr.bf16.mxu0 %v953_v11  ;;  %v1023_v10 = vunpack.c.l.s8.bf16 %v840_v0  ;;  %v1025_v11 = vunpack.c.l.s8.bf16 %v842_v1  ;;  %v1065_v28 = vunpack.c.h.s8.bf16 %v858_v37  ;;  %v872_v58 = vld [vmem:[#allocation3 + $0x288] sm:$0xff]  ;;  %v874_v59 = vld [vmem:[#allocation3 + $0x298] sm:$0xff] }
 0x32a   :  { %1189 = vmatpush1.bf16.msra.mxu1 %v950_v17  ;;  %1271 = vmatpush1.bf16.msra.mxu0 %v952_v18  ;;  %v1022_v17 = vunpack.c.l.s8.bf16 %v839_v14  ;;  %v1024_v18 = vunpack.c.l.s8.bf16 %v841_v16 }
 0x32b   :  { %1190 = vmatprep.subr.bf16.mxu1 %v959_v19  ;;  %1272 = vmatprep.subr.bf16.mxu0 %v961_v20  ;;  %v1031_v19 = vunpack.c.h.s8.bf16 %v840_v0  ;;  %v1033_v20 = vunpack.c.h.s8.bf16 %v842_v1  ;;  %v871_v0 = vld [vmem:[#allocation3 + $0x280] sm:$0xff]  ;;  %v873_v1 = vld [vmem:[#allocation3 + $0x290] sm:$0xff] }
 0x32e   :  { %1191 = vmatpush1.bf16.msra.mxu1 %v958_v23  ;;  %1273 = vmatpush1.bf16.msra.mxu0 %v960_v24  ;;  %v1030_v23 = vunpack.c.h.s8.bf16 %v839_v14  ;;  %v1032_v24 = vunpack.c.h.s8.bf16 %v841_v16  ;;  %v880_v14 = vld [vmem:[#allocation3 + $0x2c8] sm:$0xff]  ;;  %v882_v16 = vld [vmem:[#allocation3 + $0x2d8] sm:$0xff] }
 0x32f   :  { %1192 = vmatprep.subr.bf16.mxu1 %v967_v29  ;;  %1274 = vmatprep.subr.bf16.mxu0 %v969_v26  ;;  %v1039_v29 = vunpack.c.l.s8.bf16 %v848_v21  ;;  %v1041_v26 = vunpack.c.l.s8.bf16 %v850_v22 }
 0x332   :  { %1193 = vmatpush1.bf16.msra.mxu1 %v966_v27  ;;  %1275 = vmatpush1.bf16.msra.mxu0 %v968_v31  ;;  %v1038_v27 = vunpack.c.l.s8.bf16 %v847_v5  ;;  %v1040_v31 = vunpack.c.l.s8.bf16 %v849_v3 }
 0x333   :  { %1194 = vmatprep.subr.bf16.mxu1 %v975_v34  ;;  %1276 = vmatprep.subr.bf16.mxu0 %v977_v35  ;;  %v1047_v34 = vunpack.c.h.s8.bf16 %v848_v21  ;;  %v1049_v35 = vunpack.c.h.s8.bf16 %v850_v22  ;;  %v879_v21 = vld [vmem:[#allocation3 + $0x2c0] sm:$0xff]  ;;  %v881_v22 = vld [vmem:[#allocation3 + $0x2d0] sm:$0xff] }
 0x336   :  { %1195 = vmatpush1.bf16.msra.mxu1 %v974_v7  ;;  %1277 = vmatpush1.bf16.msra.mxu0 %v976_v38  ;;  %v1046_v7 = vunpack.c.h.s8.bf16 %v847_v5  ;;  %v1048_v38 = vunpack.c.h.s8.bf16 %v849_v3  ;;  %v888_v5 = vld [vmem:[#allocation3 + $0x308] sm:$0xff]  ;;  %v890_v3 = vld [vmem:[#allocation3 + $0x318] sm:$0xff] }
 0x337   :  { %1196 = vmatprep.subr.bf16.mxu1 %v983_v39  ;;  %1278 = vmatprep.subr.bf16.mxu0 %v985_v33  ;;  %v1055_v39 = vunpack.c.l.s8.bf16 %v856_v36  ;;  %v1057_v33 = vunpack.c.l.s8.bf16 %v858_v37  ;;  %v889_v37 = vld [vmem:[#allocation3 + $0x310] sm:$0xff] }
 0x33a   :  { %1197 = vmatpush1.bf16.msra.mxu1 %v982_v41  ;;  %1279 = vmatpush1.bf16.msra.mxu0 %v984_v53  ;;  %v4137_v41 = vpack.c.bf16 %v4125_v30, %v4125_v30  ;;  %v1054_v53 = vunpack.c.l.s8.bf16 %v855_v40  ;;  %v1062_v30 = vunpack.c.h.s8.bf16 %v855_v40  ;;  %v896_v40 = vld [vmem:[#allocation3 + $0x348] sm:$0xff] }
 0x33b   :  { %1198 = vmatprep.subr.bf16.mxu1 %v991_v42  ;;  %1280 = vmatprep.subr.bf16.mxu0 %v993_v25  ;;  %v1056_v42 = vunpack.c.l.s8.bf16 %v857_v51  ;;  %v1063_v25 = vunpack.c.h.s8.bf16 %v856_v36  ;;  %v887_v36 = vld [vmem:[#allocation3 + $0x300] sm:$0xff] }
 0x33e   :  { %1199 = vmatpush1.bf16.msra.mxu1 %v990_v46  ;;  %1281 = vmatpush1.bf16.msra.mxu0 %v992_v47  ;;  %v866_v46 = vld [vmem:[#allocation3 + $0x258] sm:$0xff]  ;;  %v4141_v47 = vpack.c.bf16 %v4129_v44, %v4129_v44  ;;  %v1070_v44 = vunpack.c.l.s8.bf16 %v863_v52 }
 0x33f   :  { %1200 = vmatprep.subr.bf16.mxu1 %v999_v48  ;;  %1282 = vmatprep.subr.bf16.mxu0 %v1001_v49  ;;  %v1064_v48 = vunpack.c.h.s8.bf16 %v857_v51  ;;  %v1071_v49 = vunpack.c.l.s8.bf16 %v864_v32  ;;  %v1073_v50 = vunpack.c.l.s8.bf16 %v866_v46  ;;  %v898_v51 = vld [vmem:[#allocation3 + $0x358] sm:$0xff] }
 0x342   :  { %1201 = vmatpush1.bf16.msra.mxu1 %v998_v54  ;;  %1283 = vmatpush1.bf16.msra.mxu0 %v1000_v55  ;;  %v865_v54 = vld [vmem:[#allocation3 + $0x250] sm:$0xff] }
 0x343   :  { %1202 = vmatprep.subr.bf16.mxu1 %v1007_v56  ;;  %1284 = vmatprep.subr.bf16.mxu0 %v1009_v57  ;;  %v1072_v55 = vunpack.c.l.s8.bf16 %v865_v54  ;;  %v1079_v56 = vunpack.c.h.s8.bf16 %v864_v32  ;;  %v1081_v57 = vunpack.c.h.s8.bf16 %v866_v46  ;;  %v895_v32 = vld [vmem:[#allocation3 + $0x340] sm:$0xff]  ;;  %v897_v46 = vld [vmem:[#allocation3 + $0x350] sm:$0xff] }
 0x346   :  { %1203 = vmatpush1.bf16.msra.mxu1 %v1006_v60  ;;  %1285 = vmatpush1.bf16.msra.mxu0 %v1008_v61  ;;  %v1078_v60 = vunpack.c.h.s8.bf16 %v863_v52  ;;  %v1080_v61 = vunpack.c.h.s8.bf16 %v865_v54  ;;  %v904_v52 = vld [vmem:[#allocation3 + $0x388] sm:$0xff]  ;;  %v906_v54 = vld [vmem:[#allocation3 + $0x398] sm:$0xff] }
 0x347   :  { %1204 = vmatprep.subr.bf16.mxu1 %v1015_v62  ;;  %1286 = vmatprep.subr.bf16.mxu0 %v1017_v63  ;;  %v1087_v62 = vunpack.c.l.s8.bf16 %v872_v58  ;;  %v1089_v63 = vunpack.c.l.s8.bf16 %v874_v59 }
 0x34a   :  { %1205 = vmatpush1.bf16.msra.mxu1 %v1014_v2  ;;  %1287 = vmatpush1.bf16.msra.mxu0 %v1016_v9  ;;  %v1086_v2 = vunpack.c.l.s8.bf16 %v871_v0  ;;  %v1088_v9 = vunpack.c.l.s8.bf16 %v873_v1 }
 0x34b   :  { %1206 = vmatprep.subr.bf16.mxu1 %v1023_v10  ;;  %1288 = vmatprep.subr.bf16.mxu0 %v1025_v11  ;;  %v1095_v10 = vunpack.c.h.s8.bf16 %v872_v58  ;;  %v1097_v11 = vunpack.c.h.s8.bf16 %v874_v59  ;;  %v903_v58 = vld [vmem:[#allocation3 + $0x380] sm:$0xff]  ;;  %v905_v59 = vld [vmem:[#allocation3 + $0x390] sm:$0xff] }
 0x34e   :  { %1207 = vmatpush1.bf16.msra.mxu1 %v1022_v17  ;;  %1289 = vmatpush1.bf16.msra.mxu0 %v1024_v18  ;;  %v1094_v17 = vunpack.c.h.s8.bf16 %v871_v0  ;;  %v1096_v18 = vunpack.c.h.s8.bf16 %v873_v1  ;;  %v912_v0 = vld [vmem:[#allocation3 + $0x3c8] sm:$0xff]  ;;  %v914_v1 = vld [vmem:[#allocation3 + $0x3d8] sm:$0xff] }
 0x34f   :  { %1208 = vmatprep.subr.bf16.mxu1 %v1031_v19  ;;  %1290 = vmatprep.subr.bf16.mxu0 %v1033_v20  ;;  %v1103_v19 = vunpack.c.l.s8.bf16 %v880_v14  ;;  %v1105_v20 = vunpack.c.l.s8.bf16 %v882_v16 }
 0x352   :  { %1209 = vmatpush1.bf16.msra.mxu1 %v1030_v23  ;;  %1291 = vmatpush1.bf16.msra.mxu0 %v1032_v24  ;;  %v1102_v23 = vunpack.c.l.s8.bf16 %v879_v21  ;;  %v1104_v24 = vunpack.c.l.s8.bf16 %v881_v22 }
 0x353   :  { %1210 = vmatprep.subr.bf16.mxu1 %v1039_v29  ;;  %1292 = vmatprep.subr.bf16.mxu0 %v1041_v26  ;;  %v1111_v29 = vunpack.c.h.s8.bf16 %v880_v14  ;;  %v1113_v26 = vunpack.c.h.s8.bf16 %v882_v16  ;;  %v911_v14 = vld [vmem:[#allocation3 + $0x3c0] sm:$0xff]  ;;  %v913_v16 = vld [vmem:[#allocation3 + $0x3d0] sm:$0xff] }
 0x356   :  { %1211 = vmatpush1.bf16.msra.mxu1 %v1038_v27  ;;  %1293 = vmatpush1.bf16.msra.mxu0 %v1040_v31  ;;  %v1110_v27 = vunpack.c.h.s8.bf16 %v879_v21  ;;  %v1112_v31 = vunpack.c.h.s8.bf16 %v881_v22  ;;  %v796_v21 = vld [vmem:[#allocation3 + $0x28] sm:$0xff]  ;;  %v798_v22 = vld [vmem:[#allocation3 + $0x38] sm:$0xff] }
 0x357   :  { %1212 = vmatprep.subr.bf16.mxu1 %v1047_v34  ;;  %1294 = vmatprep.subr.bf16.mxu0 %v1049_v35  ;;  %v1119_v34 = vunpack.c.l.s8.bf16 %v888_v5  ;;  %v1121_v35 = vunpack.c.l.s8.bf16 %v890_v3 }
 0x35a   :  { %1213 = vmatpush1.bf16.msra.mxu1 %v1046_v7  ;;  %1295 = vmatpush1.bf16.msra.mxu0 %v1048_v38  ;;  %v1118_v7 = vunpack.c.l.s8.bf16 %v887_v36  ;;  %v1120_v38 = vunpack.c.l.s8.bf16 %v889_v37 }
 0x35b   :  { %1223 = vmatprep.subr.bf16.mxu1 %v1055_v39  ;;  %1305 = vmatprep.subr.bf16.mxu0 %v1057_v33  ;;  %v1127_v39 = vunpack.c.h.s8.bf16 %v888_v5  ;;  %v1129_v33 = vunpack.c.h.s8.bf16 %v890_v3  ;;  %v795_v5 = vld [vmem:[#allocation3 + $0x20] sm:$0xff]  ;;  %v797_v3 = vld [vmem:[#allocation3 + $0x30] sm:$0xff] }
 0x35d   :  { %1215 = vmatmul.mubr.bf16.vlgmr.msra.gmra.mrb[0].mxu1 %v4137_v41  ;;  %1297 = vmatmul.mubr.bf16.vlgmr.msra.gmra.mrb[12].mxu0 %v4137_v41 }
 0x35e   :  { %1224 = vmatpush1.bf16.msra.mxu1 %v1054_v53  ;;  %1306 = vmatpush1.bf16.msra.mxu0 %v1056_v42  ;;  %v1126_v53 = vunpack.c.h.s8.bf16 %v887_v36  ;;  %v1128_v42 = vunpack.c.h.s8.bf16 %v889_v37  ;;  %v941_v36 = vunpack.c.h.s8.bf16 %v798_v22  ;;  %v804_v37 = vld [vmem:[#allocation3 + $0x68] sm:$0xff] }
 0x35f   :  { %1225 = vmatprep.subr.bf16.mxu1 %v1063_v25  ;;  %1307 = vmatprep.subr.bf16.mxu0 %v1065_v28  ;;  %v1135_v25 = vunpack.c.l.s8.bf16 %v896_v40  ;;  %v1137_v28 = vunpack.c.l.s8.bf16 %v898_v51 }
 0x360   :  { %1255 = vmatprep.mubr.bf16.mxu1 %v4141_v47  ;;  %1337 = vmatprep.mubr.bf16.mxu0 %v4141_v47 }
 0x362   :  { %1226 = vmatpush1.bf16.msra.mxu1 %v1062_v30  ;;  %1308 = vmatpush1.bf16.msra.mxu0 %v1064_v48  ;;  %v1134_v30 = vunpack.c.l.s8.bf16 %v895_v32  ;;  %v1136_v48 = vunpack.c.l.s8.bf16 %v897_v46 }
 0x363   :  { %1227 = vmatprep.subr.bf16.mxu1 %v1071_v49  ;;  %1309 = vmatprep.subr.bf16.mxu0 %v1073_v50  ;;  %v1143_v49 = vunpack.c.h.s8.bf16 %v896_v40  ;;  %v1145_v50 = vunpack.c.h.s8.bf16 %v898_v51  ;;  %v803_v40 = vld [vmem:[#allocation3 + $0x60] sm:$0xff]  ;;  %v805_v51 = vld [vmem:[#allocation3 + $0x70] sm:$0xff] }
 0x366   :  { %1228 = vmatpush1.bf16.msra.mxu1 %v1070_v44  ;;  %1310 = vmatpush1.bf16.msra.mxu0 %v1072_v55  ;;  %v1142_v44 = vunpack.c.h.s8.bf16 %v895_v32  ;;  %v1144_v55 = vunpack.c.h.s8.bf16 %v897_v46  ;;  %v812_v32 = vld [vmem:[#allocation3 + $0xa8] sm:$0xff]  ;;  %v814_v46 = vld [vmem:[#allocation3 + $0xb8] sm:$0xff] }
 0x367   :  { %1229 = vmatprep.subr.bf16.mxu1 %v1079_v56  ;;  %1311 = vmatprep.subr.bf16.mxu0 %v1081_v57  ;;  %v1151_v56 = vunpack.c.l.s8.bf16 %v904_v52  ;;  %v1153_v57 = vunpack.c.l.s8.bf16 %v906_v54 }
 0x36a   :  { %1230 = vmatpush1.bf16.msra.mxu1 %v1078_v60  ;;  %1312 = vmatpush1.bf16.msra.mxu0 %v1080_v61  ;;  %v1150_v60 = vunpack.c.l.s8.bf16 %v903_v58  ;;  %v1152_v61 = vunpack.c.l.s8.bf16 %v905_v59 }
 0x36b   :  { %1231 = vmatprep.subr.bf16.mxu1 %v1087_v62  ;;  %1313 = vmatprep.subr.bf16.mxu0 %v1089_v63  ;;  %v1159_v62 = vunpack.c.h.s8.bf16 %v904_v52  ;;  %v1161_v63 = vunpack.c.h.s8.bf16 %v906_v54  ;;  %v811_v52 = vld [vmem:[#allocation3 + $0xa0] sm:$0xff] }
 0x36c   :  { %v962_v54 = vunpack.c.l.s8.bf16 %v811_v52 }
 0x36e   :  { %1232 = vmatpush1.bf16.msra.mxu1 %v1086_v2  ;;  %1314 = vmatpush1.bf16.msra.mxu0 %v1088_v9  ;;  %v1158_v2 = vunpack.c.h.s8.bf16 %v903_v58  ;;  %v1160_v9 = vunpack.c.h.s8.bf16 %v905_v59  ;;  %v822_v58 = vld [vmem:[#allocation3 + $0xf8] sm:$0xff]  ;;  %v970_v59 = vunpack.c.h.s8.bf16 %v811_v52 }
 0x36f   :  { %1233 = vmatprep.subr.bf16.mxu1 %v1095_v10  ;;  %1315 = vmatprep.subr.bf16.mxu0 %v1097_v11  ;;  %v1167_v10 = vunpack.c.l.s8.bf16 %v912_v0  ;;  %v1169_v11 = vunpack.c.l.s8.bf16 %v914_v1  ;;  %v854_v52 = vld [vmem:[#allocation3 + $0x1f8] sm:$0xff] }
 0x372   :  { %1234 = vmatpush1.bf16.msra.mxu1 %v1094_v17  ;;  %1316 = vmatpush1.bf16.msra.mxu0 %v1096_v18  ;;  %v1166_v17 = vunpack.c.l.s8.bf16 %v911_v14  ;;  %v1168_v18 = vunpack.c.l.s8.bf16 %v913_v16 }
 0x373   :  { %1235 = vmatprep.subr.bf16.mxu1 %v1103_v19  ;;  %1317 = vmatprep.subr.bf16.mxu0 %v1105_v20  ;;  %v1175_v19 = vunpack.c.h.s8.bf16 %v912_v0  ;;  %v1177_v20 = vunpack.c.h.s8.bf16 %v914_v1  ;;  %v821_v0 = vld [vmem:[#allocation3 + $0xf0] sm:$0xff] }
 0x376   :  { %1236 = vmatpush1.bf16.msra.mxu1 %v1102_v23  ;;  %1318 = vmatpush1.bf16.msra.mxu0 %v1104_v24  ;;  %v1174_v23 = vunpack.c.h.s8.bf16 %v911_v14  ;;  %v1176_v24 = vunpack.c.h.s8.bf16 %v913_v16  ;;  %v830_v14 = vld [vmem:[#allocation3 + $0x138] sm:$0xff] }
 0x377   :  { %1237 = vmatprep.subr.bf16.mxu1 %v1111_v29  ;;  %1319 = vmatprep.subr.bf16.mxu0 %v1113_v26  ;;  %v931_v29 = vunpack.c.l.s8.bf16 %v796_v21  ;;  %v933_v26 = vunpack.c.l.s8.bf16 %v798_v22 }
 0x37a   :  { %1238 = vmatpush1.bf16.msra.mxu1 %v1110_v27  ;;  %1320 = vmatpush1.bf16.msra.mxu0 %v1112_v31  ;;  %v4149_v27 = vpack.c.bf16 %v4127_v43, %v4127_v43  ;;  %v930_v31 = vunpack.c.l.s8.bf16 %v795_v5  ;;  %v947_v43 = vunpack.c.l.s8.bf16 %v804_v37 }
 0x37b   :  { %1239 = vmatprep.subr.bf16.mxu1 %v1119_v34  ;;  %1321 = vmatprep.subr.bf16.mxu0 %v1121_v35  ;;  %v932_v34 = vunpack.c.l.s8.bf16 %v797_v3  ;;  %v939_v35 = vunpack.c.h.s8.bf16 %v796_v21  ;;  %v829_v21 = vld [vmem:[#allocation3 + $0x130] sm:$0xff] }
 0x37e   :  { %1240 = vmatpush1.bf16.msra.mxu1 %v1118_v7  ;;  %1322 = vmatpush1.bf16.msra.mxu0 %v1120_v38  ;;  %v806_v7 = vld [vmem:[#allocation3 + $0x78] sm:$0xff]  ;;  %v938_v38 = vunpack.c.h.s8.bf16 %v795_v5 }
 0x37f   :  { %1241 = vmatprep.subr.bf16.mxu1 %v1127_v39  ;;  %1323 = vmatprep.subr.bf16.mxu0 %v1129_v33  ;;  %v940_v39 = vunpack.c.h.s8.bf16 %v797_v3  ;;  %v949_v33 = vunpack.c.l.s8.bf16 %v806_v7  ;;  %v838_v5 = vld [vmem:[#allocation3 + $0x178] sm:$0xff] }
 0x382   :  { %1242 = vmatpush1.bf16.msra.mxu1 %v1126_v53  ;;  %1324 = vmatpush1.bf16.msra.mxu0 %v1128_v42  ;;  %v946_v53 = vunpack.c.l.s8.bf16 %v803_v40  ;;  %v948_v42 = vunpack.c.l.s8.bf16 %v805_v51 }
 0x383   :  { %1243 = vmatprep.subr.bf16.mxu1 %v1135_v25  ;;  %1325 = vmatprep.subr.bf16.mxu0 %v1137_v28  ;;  %v955_v25 = vunpack.c.h.s8.bf16 %v804_v37  ;;  %v957_v28 = vunpack.c.h.s8.bf16 %v806_v7  ;;  %v837_v37 = vld [vmem:[#allocation3 + $0x170] sm:$0xff] }
 0x386   :  { %1244 = vmatpush1.bf16.msra.mxu1 %v1134_v30  ;;  %1326 = vmatpush1.bf16.msra.mxu0 %v1136_v48  ;;  %v954_v30 = vunpack.c.h.s8.bf16 %v803_v40  ;;  %v956_v48 = vunpack.c.h.s8.bf16 %v805_v51  ;;  %v846_v40 = vld [vmem:[#allocation3 + $0x1b8] sm:$0xff] }
 0x387   :  { %1245 = vmatprep.subr.bf16.mxu1 %v1143_v49  ;;  %1327 = vmatprep.subr.bf16.mxu0 %v1145_v50  ;;  %v963_v49 = vunpack.c.l.s8.bf16 %v812_v32  ;;  %v965_v50 = vunpack.c.l.s8.bf16 %v814_v46 }
 0x38a   :  { %1246 = vmatpush1.bf16.msra.mxu1 %v1142_v44  ;;  %1328 = vmatpush1.bf16.msra.mxu0 %v1144_v55  ;;  %v971_v55 = vunpack.c.h.s8.bf16 %v812_v32  ;;  %v845_v32 = vld [vmem:[#allocation3 + $0x1b0] sm:$0xff] }
 0x38b   :  { %1247 = vmatprep.subr.bf16.mxu1 %v1151_v56  ;;  %1329 = vmatprep.subr.bf16.mxu0 %v1153_v57  ;;  %v973_v56 = vunpack.c.h.s8.bf16 %v814_v46  ;;  %v820_v57 = vld [vmem:[#allocation3 + $0xe8] sm:$0xff] }
 0x38e   :  { %1248 = vmatpush1.bf16.msra.mxu1 %v1150_v60  ;;  %1330 = vmatpush1.bf16.msra.mxu0 %v1152_v61  ;;  %v979_v61 = vunpack.c.l.s8.bf16 %v820_v57 }
 0x38f   :  { %1249 = vmatprep.subr.bf16.mxu1 %v1159_v62  ;;  %1331 = vmatprep.subr.bf16.mxu0 %v1161_v63  ;;  %v981_v62 = vunpack.c.l.s8.bf16 %v822_v58  ;;  %v819_v63 = vld [vmem:[#allocation3 + $0xe0] sm:$0xff] }
 0x390   :  { %v978_v1 = vunpack.c.l.s8.bf16 %v819_v63  ;;  %v986_v16 = vunpack.c.h.s8.bf16 %v819_v63  ;;  %v862_v63 = vld [vmem:[#allocation3 + $0x238] sm:$0xff] }
 0x392   :  { %1250 = vmatpush1.bf16.msra.mxu1 %v1158_v2  ;;  %1332 = vmatpush1.bf16.msra.mxu0 %v1160_v9  ;;  %v980_v2 = vunpack.c.l.s8.bf16 %v821_v0  ;;  %v987_v9 = vunpack.c.h.s8.bf16 %v820_v57  ;;  %v853_v57 = vld [vmem:[#allocation3 + $0x1f0] sm:$0xff] }
 0x393   :  { %1251 = vmatprep.subr.bf16.mxu1 %v1167_v10  ;;  %1333 = vmatprep.subr.bf16.mxu0 %v1169_v11  ;;  %v989_v10 = vunpack.c.h.s8.bf16 %v822_v58  ;;  %v828_v11 = vld [vmem:[#allocation3 + $0x128] sm:$0xff] }
 0x396   :  { %1252 = vmatpush1.bf16.msra.mxu1 %v1166_v17  ;;  %1334 = vmatpush1.bf16.msra.mxu0 %v1168_v18  ;;  %v988_v17 = vunpack.c.h.s8.bf16 %v821_v0  ;;  %v995_v18 = vunpack.c.l.s8.bf16 %v828_v11 }
 0x397   :  { %1253 = vmatprep.subr.bf16.mxu1 %v1175_v19  ;;  %1335 = vmatprep.subr.bf16.mxu0 %v1177_v20  ;;  %v997_v19 = vunpack.c.l.s8.bf16 %v830_v14  ;;  %v827_v20 = vld [vmem:[#allocation3 + $0x120] sm:$0xff] }
 0x398   :  { %v994_v22 = vunpack.c.l.s8.bf16 %v827_v20  ;;  %v1002_v3 = vunpack.c.h.s8.bf16 %v827_v20  ;;  %v870_v20 = vld [vmem:[#allocation3 + $0x278] sm:$0xff] }
 0x39a   :  { %1254 = vmatpush1.bf16.msra.mxu1 %v1174_v23  ;;  %1336 = vmatpush1.bf16.msra.mxu0 %v1176_v24  ;;  %v996_v23 = vunpack.c.l.s8.bf16 %v829_v21  ;;  %v1003_v24 = vunpack.c.h.s8.bf16 %v828_v11  ;;  %v861_v11 = vld [vmem:[#allocation3 + $0x230] sm:$0xff] }
 0x39b   :  { %1346 = vmatprep.subr.bf16.mxu1 %v931_v29  ;;  %1428 = vmatprep.subr.bf16.mxu0 %v933_v26  ;;  %v1005_v29 = vunpack.c.h.s8.bf16 %v830_v14  ;;  %v836_v26 = vld [vmem:[#allocation3 + $0x168] sm:$0xff] }
 0x39d   :  { %1256 = vmatmul.mubr.bf16.vlgmr.msra.gmra.mrb[0].mxu1 %v4149_v27  ;;  %1338 = vmatmul.mubr.bf16.vlgmr.msra.gmra.mrb[12].mxu0 %v4149_v27 }
 0x39e   :  { %1347 = vmatpush1.bf16.msra.mxu1 %v930_v31  ;;  %1429 = vmatpush1.bf16.msra.mxu0 %v932_v34  ;;  %v1004_v31 = vunpack.c.h.s8.bf16 %v829_v21  ;;  %v1011_v34 = vunpack.c.l.s8.bf16 %v836_v26 }
 0x39f   :  { %1348 = vmatprep.subr.bf16.mxu1 %v939_v35  ;;  %1430 = vmatprep.subr.bf16.mxu0 %v941_v36  ;;  %v1013_v35 = vunpack.c.l.s8.bf16 %v838_v5  ;;  %v835_v36 = vld [vmem:[#allocation3 + $0x160] sm:$0xff] }
 0x3a0   :  { %1378 = vmatprep.mubr.bf16.mxu1 %v4131_v45  ;;  %1460 = vmatprep.mubr.bf16.mxu0 %v4131_v45  ;;  %v813_v45 = vld [vmem:[#allocation3 + $0xb0] sm:$0xff]  ;;  %v1010_v7 = vunpack.c.l.s8.bf16 %v835_v36  ;;  %v1018_v51 = vunpack.c.h.s8.bf16 %v835_v36 }
 0x3a1   :  { %v964_v44 = vunpack.c.l.s8.bf16 %v813_v45  ;;  %v972_v60 = vunpack.c.h.s8.bf16 %v813_v45 }
 0x3a2   :  { %1349 = vmatpush1.bf16.msra.mxu1 %v938_v38  ;;  %1431 = vmatpush1.bf16.msra.mxu0 %v940_v39  ;;  %v1012_v38 = vunpack.c.l.s8.bf16 %v837_v37  ;;  %v1019_v39 = vunpack.c.h.s8.bf16 %v836_v26  ;;  %v869_v26 = vld [vmem:[#allocation3 + $0x270] sm:$0xff] }
 0x3a3   :  { %1350 = vmatprep.subr.bf16.mxu1 %v947_v43  ;;  %1432 = vmatprep.subr.bf16.mxu0 %v949_v33  ;;  %v1021_v43 = vunpack.c.h.s8.bf16 %v838_v5  ;;  %v844_v33 = vld [vmem:[#allocation3 + $0x1a8] sm:$0xff] }
 0x3a6   :  { %1351 = vmatpush1.bf16.msra.mxu1 %v946_v53  ;;  %1433 = vmatpush1.bf16.msra.mxu0 %v948_v42  ;;  %v1020_v53 = vunpack.c.h.s8.bf16 %v837_v37  ;;  %v1027_v42 = vunpack.c.l.s8.bf16 %v844_v33  ;;  %v1084_v37 = vunpack.c.h.s8.bf16 %v869_v26 }
 0x3a7   :  { %1352 = vmatprep.subr.bf16.mxu1 %v955_v25  ;;  %1434 = vmatprep.subr.bf16.mxu0 %v957_v28  ;;  %v1029_v25 = vunpack.c.l.s8.bf16 %v846_v40  ;;  %v843_v28 = vld [vmem:[#allocation3 + $0x1a0] sm:$0xff] }
 0x3a8   :  { %v1026_v46 = vunpack.c.l.s8.bf16 %v843_v28  ;;  %v1034_v45 = vunpack.c.h.s8.bf16 %v843_v28 }
 0x3aa   :  { %1353 = vmatpush1.bf16.msra.mxu1 %v954_v30  ;;  %1435 = vmatpush1.bf16.msra.mxu0 %v956_v48  ;;  %v1028_v30 = vunpack.c.l.s8.bf16 %v845_v32  ;;  %v1035_v48 = vunpack.c.h.s8.bf16 %v844_v33 }
 0x3ab   :  { %1354 = vmatprep.subr.bf16.mxu1 %v963_v49  ;;  %1436 = vmatprep.subr.bf16.mxu0 %v965_v50  ;;  %v1037_v49 = vunpack.c.h.s8.bf16 %v846_v40  ;;  %v852_v50 = vld [vmem:[#allocation3 + $0x1e8] sm:$0xff] }
 0x3ae   :  { %1355 = vmatpush1.bf16.msra.mxu1 %v962_v54  ;;  %1437 = vmatpush1.bf16.msra.mxu0 %v964_v44  ;;  %v1036_v54 = vunpack.c.h.s8.bf16 %v845_v32  ;;  %v1043_v44 = vunpack.c.l.s8.bf16 %v852_v50 }
 0x3af   :  { %1356 = vmatprep.subr.bf16.mxu1 %v971_v55  ;;  %1438 = vmatprep.subr.bf16.mxu0 %v973_v56  ;;  %v1045_v55 = vunpack.c.l.s8.bf16 %v854_v52  ;;  %v851_v56 = vld [vmem:[#allocation3 + $0x1e0] sm:$0xff] }
 0x3b0   :  { %v1042_v58 = vunpack.c.l.s8.bf16 %v851_v56  ;;  %v1050_v0 = vunpack.c.h.s8.bf16 %v851_v56 }
 0x3b2   :  { %1357 = vmatpush1.bf16.msra.mxu1 %v970_v59  ;;  %1439 = vmatpush1.bf16.msra.mxu0 %v972_v60  ;;  %v1044_v59 = vunpack.c.l.s8.bf16 %v853_v57  ;;  %v1051_v60 = vunpack.c.h.s8.bf16 %v852_v50 }
 0x3b3   :  { %1358 = vmatprep.subr.bf16.mxu1 %v979_v61  ;;  %1440 = vmatprep.subr.bf16.mxu0 %v981_v62  ;;  %v1053_v61 = vunpack.c.h.s8.bf16 %v854_v52  ;;  %v860_v62 = vld [vmem:[#allocation3 + $0x228] sm:$0xff] }
 0x3b6   :  { %1359 = vmatpush1.bf16.msra.mxu1 %v978_v1  ;;  %1441 = vmatpush1.bf16.msra.mxu0 %v980_v2  ;;  %v1052_v1 = vunpack.c.h.s8.bf16 %v853_v57  ;;  %v1059_v2 = vunpack.c.l.s8.bf16 %v860_v62 }
 0x3b7   :  { %1360 = vmatprep.subr.bf16.mxu1 %v987_v9  ;;  %1442 = vmatprep.subr.bf16.mxu0 %v989_v10  ;;  %v1061_v9 = vunpack.c.l.s8.bf16 %v862_v63  ;;  %v859_v10 = vld [vmem:[#allocation3 + $0x220] sm:$0xff] }
 0x3b8   :  { %v1058_v14 = vunpack.c.l.s8.bf16 %v859_v10  ;;  %v1066_v21 = vunpack.c.h.s8.bf16 %v859_v10 }
 0x3ba   :  { %1361 = vmatpush1.bf16.msra.mxu1 %v986_v16  ;;  %1443 = vmatpush1.bf16.msra.mxu0 %v988_v17  ;;  %v1060_v16 = vunpack.c.l.s8.bf16 %v861_v11  ;;  %v1067_v17 = vunpack.c.h.s8.bf16 %v860_v62 }
 0x3bb   :  { %1362 = vmatprep.subr.bf16.mxu1 %v995_v18  ;;  %1444 = vmatprep.subr.bf16.mxu0 %v997_v19  ;;  %v1069_v18 = vunpack.c.h.s8.bf16 %v862_v63  ;;  %v868_v19 = vld [vmem:[#allocation3 + $0x268] sm:$0xff] }
 0x3be   :  { %1363 = vmatpush1.bf16.msra.mxu1 %v994_v22  ;;  %1445 = vmatpush1.bf16.msra.mxu0 %v996_v23  ;;  %v1068_v22 = vunpack.c.h.s8.bf16 %v861_v11  ;;  %v1075_v23 = vunpack.c.l.s8.bf16 %v868_v19 }
 0x3bf   :  { %1364 = vmatprep.subr.bf16.mxu1 %v1003_v24  ;;  %1446 = vmatprep.subr.bf16.mxu0 %v1005_v29  ;;  %v1077_v24 = vunpack.c.l.s8.bf16 %v870_v20  ;;  %v867_v29 = vld [vmem:[#allocation3 + $0x260] sm:$0xff] }
 0x3c0   :  { %v1074_v5 = vunpack.c.l.s8.bf16 %v867_v29  ;;  %v1082_v36 = vunpack.c.h.s8.bf16 %v867_v29 }
 0x3c2   :  { %1365 = vmatpush1.bf16.msra.mxu1 %v1002_v3  ;;  %1447 = vmatpush1.bf16.msra.mxu0 %v1004_v31  ;;  %v1076_v3 = vunpack.c.l.s8.bf16 %v869_v26  ;;  %v1085_v31 = vunpack.c.h.s8.bf16 %v870_v20 }
 0x3c3   :  { %1366 = vmatprep.subr.bf16.mxu1 %v1011_v34  ;;  %1448 = vmatprep.subr.bf16.mxu0 %v1013_v35  ;;  %v876_v34 = vld [vmem:[#allocation3 + $0x2a8] sm:$0xff]  ;;  %v878_v35 = vld [vmem:[#allocation3 + $0x2b8] sm:$0xff] }
 0x3c4   :  { %v1099_v40 = vunpack.c.h.s8.bf16 %v876_v34 }
 0x3c6   :  { %1367 = vmatpush1.bf16.msra.mxu1 %v1010_v7  ;;  %1449 = vmatpush1.bf16.msra.mxu0 %v1012_v38  ;;  %v1091_v7 = vunpack.c.l.s8.bf16 %v876_v34  ;;  %v1093_v38 = vunpack.c.l.s8.bf16 %v878_v35 }
 0x3c7   :  { %1368 = vmatprep.subr.bf16.mxu1 %v1019_v39  ;;  %1450 = vmatprep.subr.bf16.mxu0 %v1021_v43  ;;  %v875_v39 = vld [vmem:[#allocation3 + $0x2a0] sm:$0xff] }
 0x3c8   :  { %v1090_v43 = vunpack.c.l.s8.bf16 %v875_v39 }
 0x3ca   :  { %1369 = vmatpush1.bf16.msra.mxu1 %v1018_v51  ;;  %1451 = vmatpush1.bf16.msra.mxu0 %v1020_v53  ;;  %v1101_v51 = vunpack.c.h.s8.bf16 %v878_v35  ;;  %v884_v53 = vld [vmem:[#allocation3 + $0x2e8] sm:$0xff] }
 0x3cb   :  { %1370 = vmatprep.subr.bf16.mxu1 %v1027_v42  ;;  %1452 = vmatprep.subr.bf16.mxu0 %v1029_v25  ;;  %v886_v42 = vld [vmem:[#allocation3 + $0x2f8] sm:$0xff]  ;;  %v1098_v25 = vunpack.c.h.s8.bf16 %v875_v39  ;;  %v1107_v32 = vunpack.c.l.s8.bf16 %v884_v53  ;;  %v1115_v52 = vunpack.c.h.s8.bf16 %v884_v53 }
 0x3ce   :  { %1371 = vmatpush1.bf16.msra.mxu1 %v1026_v46  ;;  %1453 = vmatpush1.bf16.msra.mxu0 %v1028_v30  ;;  %v1109_v46 = vunpack.c.l.s8.bf16 %v886_v42  ;;  %v883_v30 = vld [vmem:[#allocation3 + $0x2e0] sm:$0xff] }
 0x3cf   :  { %1372 = vmatprep.subr.bf16.mxu1 %v1035_v48  ;;  %1454 = vmatprep.subr.bf16.mxu0 %v1037_v49  ;;  %v885_v48 = vld [vmem:[#allocation3 + $0x2f0] sm:$0xff]  ;;  %v1106_v49 = vunpack.c.l.s8.bf16 %v883_v30 }
 0x3d0   :  { %v1108_v50 = vunpack.c.l.s8.bf16 %v885_v48  ;;  %v1116_v56 = vunpack.c.h.s8.bf16 %v885_v48 }
 0x3d2   :  { %1373 = vmatpush1.bf16.msra.mxu1 %v1034_v45  ;;  %1455 = vmatpush1.bf16.msra.mxu0 %v1036_v54  ;;  %v1117_v45 = vunpack.c.h.s8.bf16 %v886_v42  ;;  %v892_v54 = vld [vmem:[#allocation3 + $0x328] sm:$0xff] }
 0x3d3   :  { %1374 = vmatprep.subr.bf16.mxu1 %v1043_v44  ;;  %1456 = vmatprep.subr.bf16.mxu0 %v1045_v55  ;;  %v894_v44 = vld [vmem:[#allocation3 + $0x338] sm:$0xff]  ;;  %v1114_v55 = vunpack.c.h.s8.bf16 %v883_v30  ;;  %v1123_v57 = vunpack.c.l.s8.bf16 %v892_v54  ;;  %v1131_v63 = vunpack.c.h.s8.bf16 %v892_v54 }
 0x3d4   :  { %v4163_v30 = vld [vmem:[#allocation13] ss:$4 sm:$0xff] }
 0x3d6   :  { %1375 = vmatpush1.bf16.msra.mxu1 %v1042_v58  ;;  %1457 = vmatpush1.bf16.msra.mxu0 %v1044_v59  ;;  %v1125_v58 = vunpack.c.l.s8.bf16 %v894_v44  ;;  %v891_v59 = vld [vmem:[#allocation3 + $0x320] sm:$0xff] }
 0x3d7   :  { %1376 = vmatprep.subr.bf16.mxu1 %v1051_v60  ;;  %1458 = vmatprep.subr.bf16.mxu0 %v1053_v61  ;;  %v893_v60 = vld [vmem:[#allocation3 + $0x330] sm:$0xff]  ;;  %v1122_v61 = vunpack.c.l.s8.bf16 %v891_v59 }
 0x3d8   :  { %v1124_v62 = vunpack.c.l.s8.bf16 %v893_v60  ;;  %v1132_v10 = vunpack.c.h.s8.bf16 %v893_v60 }
 0x3da   :  { %1377 = vmatpush1.bf16.msra.mxu1 %v1050_v0  ;;  %1459 = vmatpush1.bf16.msra.mxu0 %v1052_v1  ;;  %v1133_v0 = vunpack.c.h.s8.bf16 %v894_v44  ;;  %v900_v1 = vld [vmem:[#allocation3 + $0x368] sm:$0xff] }
 0x3db   :  { %1387 = vmatprep.subr.bf16.mxu1 %v1059_v2  ;;  %1469 = vmatprep.subr.bf16.mxu0 %v1061_v9  ;;  %v902_v2 = vld [vmem:[#allocation3 + $0x378] sm:$0xff]  ;;  %v1130_v9 = vunpack.c.h.s8.bf16 %v891_v59  ;;  %v1139_v11 = vunpack.c.l.s8.bf16 %v900_v1  ;;  %v1147_v20 = vunpack.c.h.s8.bf16 %v900_v1 }
 0x3dd   :  { %1379 = vmatmul.mubr.bf16.vlgmr.msra.gmra.mrb[4].mxu1 %v4137_v41  ;;  %1461 = vmatmul.mubr.bf16.vlgmr.msra.gmra.mrb[16].mxu0 %v4137_v41  ;;  %v1083_v41 = vunpack.c.h.s8.bf16 %v868_v19 }
 0x3de   :  { %1388 = vmatpush1.bf16.msra.mxu1 %v1058_v14  ;;  %1470 = vmatpush1.bf16.msra.mxu0 %v1060_v16  ;;  %v1141_v14 = vunpack.c.l.s8.bf16 %v902_v2  ;;  %v899_v16 = vld [vmem:[#allocation3 + $0x360] sm:$0xff] }
 0x3df   :  { %1389 = vmatprep.subr.bf16.mxu1 %v1067_v17  ;;  %1471 = vmatprep.subr.bf16.mxu0 %v1069_v18  ;;  %v901_v17 = vld [vmem:[#allocation3 + $0x370] sm:$0xff]  ;;  %v1138_v18 = vunpack.c.l.s8.bf16 %v899_v16 }
 0x3e0   :  { %1419 = vmatprep.mubr.bf16.mxu1 %v4141_v47  ;;  %1501 = vmatprep.mubr.bf16.mxu0 %v4141_v47  ;;  %v877_v47 = vld [vmem:[#allocation3 + $0x2b0] sm:$0xff]  ;;  %v1140_v19 = vunpack.c.l.s8.bf16 %v901_v17  ;;  %v1148_v29 = vunpack.c.h.s8.bf16 %v901_v17 }
 0x3e1   :  { %v1092_v33 = vunpack.c.l.s8.bf16 %v877_v47  ;;  %v1100_v28 = vunpack.c.h.s8.bf16 %v877_v47 }
 0x3e2   :  { %1390 = vmatpush1.bf16.msra.mxu1 %v1066_v21  ;;  %1472 = vmatpush1.bf16.msra.mxu0 %v1068_v22  ;;  %v1149_v21 = vunpack.c.h.s8.bf16 %v902_v2  ;;  %v908_v22 = vld [vmem:[#allocation3 + $0x3a8] sm:$0xff] }
 0x3e3   :  { %1391 = vmatprep.subr.bf16.mxu1 %v1075_v23  ;;  %1473 = vmatprep.subr.bf16.mxu0 %v1077_v24  ;;  %v910_v23 = vld [vmem:[#allocation3 + $0x3b8] sm:$0xff]  ;;  %v1146_v24 = vunpack.c.h.s8.bf16 %v899_v16  ;;  %v1155_v26 = vunpack.c.l.s8.bf16 %v908_v22  ;;  %v1163_v35 = vunpack.c.h.s8.bf16 %v908_v22 }
 0x3e6   :  { %1392 = vmatpush1.bf16.msra.mxu1 %v1074_v5  ;;  %1474 = vmatpush1.bf16.msra.mxu0 %v1076_v3  ;;  %v1157_v5 = vunpack.c.l.s8.bf16 %v910_v23  ;;  %v907_v3 = vld [vmem:[#allocation3 + $0x3a0] sm:$0xff] }
 0x3e7   :  { %1393 = vmatprep.subr.bf16.mxu1 %v1083_v41  ;;  %1475 = vmatprep.subr.bf16.mxu0 %v1085_v31  ;;  %v909_v41 = vld [vmem:[#allocation3 + $0x3b0] sm:$0xff]  ;;  %v1154_v31 = vunpack.c.l.s8.bf16 %v907_v3 }
 0x3e8   :  { %v1156_v34 = vunpack.c.l.s8.bf16 %v909_v41  ;;  %v1164_v39 = vunpack.c.h.s8.bf16 %v909_v41 }
 0x3ea   :  { %1394 = vmatpush1.bf16.msra.mxu1 %v1082_v36  ;;  %1476 = vmatpush1.bf16.msra.mxu0 %v1084_v37  ;;  %v1165_v36 = vunpack.c.h.s8.bf16 %v910_v23  ;;  %v916_v37 = vld [vmem:[#allocation3 + $0x3e8] sm:$0xff] }
 0x3eb   :  { %1395 = vmatprep.subr.bf16.mxu1 %v1091_v7  ;;  %1477 = vmatprep.subr.bf16.mxu0 %v1093_v38  ;;  %v918_v7 = vld [vmem:[#allocation3 + $0x3f8] sm:$0xff]  ;;  %v1162_v38 = vunpack.c.h.s8.bf16 %v907_v3  ;;  %v1171_v47 = vunpack.c.l.s8.bf16 %v916_v37  ;;  %v1179_v42 = vunpack.c.h.s8.bf16 %v916_v37 }
 0x3ee   :  { %1396 = vmatpush1.bf16.msra.mxu1 %v1090_v43  ;;  %1478 = vmatpush1.bf16.msra.mxu0 %v1092_v33  ;;  %v1173_v43 = vunpack.c.l.s8.bf16 %v918_v7  ;;  %v915_v33 = vld [vmem:[#allocation3 + $0x3e0] sm:$0xff] }
 0x3ef   :  { %1397 = vmatprep.subr.bf16.mxu1 %v1099_v40  ;;  %1479 = vmatprep.subr.bf16.mxu0 %v1101_v51  ;;  %v917_v40 = vld [vmem:[#allocation3 + $0x3f0] sm:$0xff]  ;;  %v1170_v51 = vunpack.c.l.s8.bf16 %v915_v33 }
 0x3f0   :  { %v1172_v53 = vunpack.c.l.s8.bf16 %v917_v40 }
 0x3f2   :  { %1398 = vmatpush1.bf16.msra.mxu1 %v1098_v25  ;;  %1480 = vmatpush1.bf16.msra.mxu0 %v1100_v28  ;;  %v1181_v25 = vunpack.c.h.s8.bf16 %v918_v7  ;;  %v1178_v28 = vunpack.c.h.s8.bf16 %v915_v33 }
 0x3f3   :  { %1399 = vmatprep.subr.bf16.mxu1 %v1107_v32  ;;  %1481 = vmatprep.subr.bf16.mxu0 %v1109_v46  ;;  %v1180_v32 = vunpack.c.h.s8.bf16 %v917_v40  ;;  %v4161_v46 = vld [vmem:[#allocation13 + $0x3] ss:$4 sm:$0xff] }
 0x3f4   :  { %v1514_v48 = vrot.slane %v4161_v46, %v4013_v13 }
 0x3f6   :  { %1400 = vmatpush1.bf16.msra.mxu1 %v1106_v49  ;;  %1482 = vmatpush1.bf16.msra.mxu0 %v1108_v50  ;;  %v1522_v49 = vrot.slane %v4161_v46, %v4094_v4  ;;  %v1518_v50 = vrot.slane %v4161_v46, %v4016_v15 }
 0x3f7   :  { %1401 = vmatprep.subr.bf16.mxu1 %v1115_v52  ;;  %1483 = vmatprep.subr.bf16.mxu0 %v1117_v45  ;;  %v1526_v52 = vrot.slane %v4161_v46, %v4097_v8  ;;  %v1563_v45 = vrot.slane %v4163_v30, %v4013_v13 }
 0x3fa   :  { %1402 = vmatpush1.bf16.msra.mxu1 %v1114_v55  ;;  %1484 = vmatpush1.bf16.msra.mxu0 %v1116_v56  ;;  %v1567_v55 = vrot.slane %v4163_v30, %v4016_v15  ;;  %v1575_v56 = vrot.slane %v4163_v30, %v4097_v8 }
 0x3fb   :  { %1403 = vmatprep.subr.bf16.mxu1 %v1123_v57  ;;  %1485 = vmatprep.subr.bf16.mxu0 %v1125_v58 }
 0x3fe   :  { %1404 = vmatpush1.bf16.msra.mxu1 %v1122_v61  ;;  %1486 = vmatpush1.bf16.msra.mxu0 %v1124_v62 }
 0x3ff   :  { %1405 = vmatprep.subr.bf16.mxu1 %v1131_v63  ;;  %1487 = vmatprep.subr.bf16.mxu0 %v1133_v0 }
 0x402   :  { %1406 = vmatpush1.bf16.msra.mxu1 %v1130_v9  ;;  %1488 = vmatpush1.bf16.msra.mxu0 %v1132_v10 }
 0x403   :  { %1407 = vmatprep.subr.bf16.mxu1 %v1139_v11  ;;  %1489 = vmatprep.subr.bf16.mxu0 %v1141_v14 }
 0x406   :  { %1408 = vmatpush1.bf16.msra.mxu1 %v1138_v18  ;;  %1490 = vmatpush1.bf16.msra.mxu0 %v1140_v19 }
 0x407   :  { %1409 = vmatprep.subr.bf16.mxu1 %v1147_v20  ;;  %1491 = vmatprep.subr.bf16.mxu0 %v1149_v21 }
 0x40a   :  { %1410 = vmatpush1.bf16.msra.mxu1 %v1146_v24  ;;  %1492 = vmatpush1.bf16.msra.mxu0 %v1148_v29 }
 0x40b   :  { %1411 = vmatprep.subr.bf16.mxu1 %v1155_v26  ;;  %1493 = vmatprep.subr.bf16.mxu0 %v1157_v5 }
 0x40e   :  { %1412 = vmatpush1.bf16.msra.mxu1 %v1154_v31  ;;  %1494 = vmatpush1.bf16.msra.mxu0 %v1156_v34 }
 0x40f   :  { %1413 = vmatprep.subr.bf16.mxu1 %v1163_v35  ;;  %1495 = vmatprep.subr.bf16.mxu0 %v1165_v36 }
 0x412   :  { %1414 = vmatpush1.bf16.msra.mxu1 %v1162_v38  ;;  %1496 = vmatpush1.bf16.msra.mxu0 %v1164_v39 }
 0x413   :  { %1415 = vmatprep.subr.bf16.mxu1 %v1171_v47  ;;  %1497 = vmatprep.subr.bf16.mxu0 %v1173_v43 }
 0x416   :  { %1416 = vmatpush1.bf16.msra.mxu1 %v1170_v51  ;;  %1498 = vmatpush1.bf16.msra.mxu0 %v1172_v53 }
 0x417   :  { %1417 = vmatprep.subr.bf16.mxu1 %v1179_v42  ;;  %1499 = vmatprep.subr.bf16.mxu0 %v1181_v25 }
 0x41a   :  { %1418 = vmatpush1.bf16.msra.mxu1 %v1178_v28  ;;  %1500 = vmatpush1.bf16.msra.mxu0 %v1180_v32 }
 0x41d   :  { %1420 = vmatmul.mubr.bf16.vlgmr.msra.gmra.mrb[4].mxu1 %v4149_v27  ;;  %1502 = vmatmul.mubr.bf16.vlgmr.msra.gmra.mrb[16].mxu0 %v4149_v27  ;;  %v1571_v27 = vrot.slane %v4163_v30, %v4094_v4 }
 0x470   :  { %v1257_v54 = vpop.f32.mrb[0].mxu1  ;;  %v1339_v44 = vpop.f32.mrb[12].mxu0 }
 0x471   :  { %v1551_v57 = vmul.f32 %v1514_v48, %v1257_v54  ;;  %v1553_v58 = vmul.f32 %v1522_v49, %v1339_v44  ;;  %v1259_v59 = vpop.f32.mrb[1].mxu1  ;;  %v1341_v60 = vpop.f32.mrb[13].mxu0 }
 0x472   :  { %v1552_v61 = vmul.f32 %v1518_v50, %v1259_v59  ;;  %v1554_v62 = vmul.f32 %v1526_v52, %v1341_v60  ;;  %v1261_v63 = vpop.f32.mrb[2].mxu1  ;;  %v1343_v0 = vpop.f32.mrb[14].mxu0 }
 0x473   :  { %v1600_v1 = vadd.f32 %v1563_v45, %v1551_v57  ;;  %v1602_v2 = vadd.f32 %v1571_v27, %v1553_v58  ;;  %v1262_v9 = vpop.f32.mrb[3].mxu1  ;;  %v1344_v10 = vpop.f32.mrb[15].mxu0 }
 0x474   :  { %v1601_v11 = vadd.f32 %v1567_v55, %v1552_v61  ;;  %v1603_v14 = vadd.f32 %v1575_v56, %v1554_v62 }
 0x475   :  { %v1608_v16 = vmul.f32 0.01, %v1600_v1  ;;  %v1610_v17 = vmul.f32 0.01, %v1602_v2 }
 0x476   :  { %v1609_v18 = vmul.f32 0.01, %v1601_v11  ;;  %v1611_v19 = vmul.f32 0.01, %v1603_v14 }
 0x477   :  { %v4181_v20 = vmax.f32 %v1600_v1, %v1608_v16  ;;  %v4183_v21 = vmax.f32 %v1602_v2, %v1610_v17 }
 0x478   :  { %v4185_v22 = vmax.f32 %v1601_v11, %v1609_v18  ;;  %v4187_v23 = vmax.f32 %v1603_v14, %v1611_v19 }
 0x479   :  { %v1628_v24 = vrot.slane %v4181_v20, 4  ;;  %v1684_v29 = vmul.f32 %v4181_v20, %v4181_v20  ;;  %v1640_v26 = vrot.slane %v4183_v21, 4  ;;  %v1686_v5 = vmul.f32 %v4183_v21, %v4183_v21 }
 0x47a   :  { %v1634_v3 = vrot.slane %v4185_v22, 4  ;;  %v1685_v41 = vmul.f32 %v4185_v22, %v4185_v22  ;;  %v1646_v31 = vrot.slane %v4187_v23, 4  ;;  %v1687_v34 = vmul.f32 %v4187_v23, %v4187_v23 }
 0x47b   :  { %v1629_v35 = vadd.f32 %v1628_v24, %v4181_v20  ;;  %v1692_v36 = vrot.slane %v1684_v29, 4  ;;  %v1641_v37 = vadd.f32 %v1640_v26, %v4183_v21  ;;  %v1704_v7 = vrot.slane %v1686_v5, 4 }
 0x47c   :  { %v1635_v38 = vadd.f32 %v1634_v3, %v4185_v22  ;;  %v1698_v39 = vrot.slane %v1685_v41, 4  ;;  %v1647_v47 = vadd.f32 %v1646_v31, %v4187_v23  ;;  %v1710_v43 = vrot.slane %v1687_v34, 4 }
 0x47d   :  { %v1630_v33 = vrot.slane %v1629_v35, 2  ;;  %v1693_v40 = vadd.f32 %v1692_v36, %v1684_v29  ;;  %v1642_v51 = vrot.slane %v1641_v37, 2  ;;  %v1705_v53 = vadd.f32 %v1704_v7, %v1686_v5 }
 0x47e   :  { %v1636_v42 = vrot.slane %v1635_v38, 2  ;;  %v1699_v25 = vadd.f32 %v1698_v39, %v1685_v41  ;;  %v1648_v28 = vrot.slane %v1647_v47, 2  ;;  %v1711_v32 = vadd.f32 %v1710_v43, %v1687_v34 }
 0x47f   :  { %v1631_v48 = vadd.f32 %v1630_v33, %v1629_v35  ;;  %v1694_v49 = vrot.slane %v1693_v40, 2  ;;  %v1643_v50 = vadd.f32 %v1642_v51, %v1641_v37  ;;  %v1706_v52 = vrot.slane %v1705_v53, 2 }
 0x480   :  { %v1637_v45 = vadd.f32 %v1636_v42, %v1635_v38  ;;  %v1700_v27 = vrot.slane %v1699_v25, 2  ;;  %v1649_v54 = vadd.f32 %v1648_v28, %v1647_v47  ;;  %v1712_v44 = vrot.slane %v1711_v32, 2 }
 0x481   :  { %v1632_v55 = vrot.slane %v1631_v48, 1  ;;  %v1695_v56 = vadd.f32 %v1694_v49, %v1693_v40  ;;  %v1644_v57 = vrot.slane %v1643_v50, 1  ;;  %v1707_v58 = vadd.f32 %v1706_v52, %v1705_v53 }
 0x482   :  { %v1638_v59 = vrot.slane %v1637_v45, 1  ;;  %v1701_v60 = vadd.f32 %v1700_v27, %v1699_v25  ;;  %v1650_v61 = vrot.slane %v1649_v54, 1  ;;  %v1713_v62 = vadd.f32 %v1712_v44, %v1711_v32 }
 0x483   :  { %v1633_v63 = vadd.f32 %v1632_v55, %v1631_v48  ;;  %v1696_v0 = vrot.slane %v1695_v56, 1  ;;  %v1645_v1 = vadd.f32 %v1644_v57, %v1643_v50  ;;  %v1708_v2 = vrot.slane %v1707_v58, 1 }
 0x484   :  { %v1639_v9 = vadd.f32 %v1638_v59, %v1637_v45  ;;  %v1702_v10 = vrot.slane %v1701_v60, 1  ;;  %v1651_v11 = vadd.f32 %v1650_v61, %v1649_v54  ;;  %v1714_v14 = vrot.slane %v1713_v62, 1 }
 0x485   :  { %v4205_v16 = vmul.f32 0.125, %v1633_v63  ;;  %v1697_v17 = vadd.f32 %v1696_v0, %v1695_v56  ;;  %v4207_v18 = vmul.f32 0.125, %v1645_v1  ;;  %v1709_v19 = vadd.f32 %v1708_v2, %v1707_v58 }
 0x486   :  { %v4209_v24 = vmul.f32 0.125, %v1639_v9  ;;  %v1703_v29 = vadd.f32 %v1702_v10, %v1701_v60  ;;  %v4211_v26 = vmul.f32 0.125, %v1651_v11  ;;  %v1715_v5 = vadd.f32 %v1714_v14, %v1713_v62 }
 0x487   :  { %v1740_v3 = vmul.f32 0.125, %v1697_v17  ;;  %v1748_v41 = vmul.f32 %v4205_v16, %v4205_v16  ;;  %v1742_v31 = vmul.f32 0.125, %v1709_v19  ;;  %v1750_v34 = vmul.f32 %v4207_v18, %v4207_v18 }
 0x488   :  { %v1741_v35 = vmul.f32 0.125, %v1703_v29  ;;  %v1749_v36 = vmul.f32 %v4209_v24, %v4209_v24  ;;  %v1743_v37 = vmul.f32 0.125, %v1715_v5  ;;  %v1751_v7 = vmul.f32 %v4211_v26, %v4211_v26 }
 0x489   :  { %v1756_v38 = vsub.f32 %v1740_v3, %v1748_v41  ;;  %v1758_v39 = vsub.f32 %v1742_v31, %v1750_v34  ;;  %v4230_v56 = vsub.s32 4, %v4010_v12  ;;  %v4233_v57 = vsub.s32 6, %v4010_v12 }
 0x48a   :  { %v1757_v47 = vsub.f32 %v1741_v35, %v1749_v36  ;;  %v1759_v43 = vsub.f32 %v1743_v37, %v1751_v7  ;;  %v4236_v58 = vsub.s32 5, %v4010_v12  ;;  %v4239_v59 = vsub.s32 7, %v4010_v12 }
 0x48b   :  { %v1764_v33 = vmax.f32 %v1756_v38, 0.0  ;;  %v1766_v40 = vmax.f32 %v1758_v39, 0.0  ;;  %v1530_v60 = vrot.slane %v4161_v46, %v4230_v56  ;;  %v1538_v61 = vrot.slane %v4161_v46, %v4233_v57 }
 0x48c   :  { %v1765_v51 = vmax.f32 %v1757_v47, 0.0  ;;  %v1767_v53 = vmax.f32 %v1759_v43, 0.0  ;;  %v1534_v62 = vrot.slane %v4161_v46, %v4236_v58  ;;  %v1542_v63 = vrot.slane %v4161_v46, %v4239_v59 }
 0x48d   :  { %v1772_v42 = vadd.f32 1e-05, %v1764_v33  ;;  %v1774_v25 = vadd.f32 1e-05, %v1766_v40  ;;  %v1579_v0 = vrot.slane %v4163_v30, %v4230_v56  ;;  %v1587_v1 = vrot.slane %v4163_v30, %v4233_v57 }
 0x48e   :  { %v1773_v28 = vadd.f32 1e-05, %v1765_v51  ;;  %v1775_v32 = vadd.f32 1e-05, %v1767_v53  ;;  %v1583_v9 = vrot.slane %v4163_v30, %v4236_v58  ;;  %v1591_v10 = vrot.slane %v4163_v30, %v4239_v59 }
 0x48f   :  { %3660 = vrsqrt.f32 %v1772_v42 }
 0x490   :  { %3662 = vrsqrt.f32 %v1774_v25 }
 0x491   :  { %3664 = vrsqrt.f32 %v1773_v28 }
 0x492   :  { %3666 = vrsqrt.f32 %v1775_v32 }
 0x499   :  { %v3661_v48 = vpop.eup %3660 }
 0x49a   :  { %v3663_v49 = vpop.eup %3662 }
 0x49b   :  { %v3665_v50 = vpop.eup %3664 }
 0x49c   :  { %v3667_v52 = vpop.eup %3666  ;;  %v1796_v45 = vcombine.low %v3661_v48, %v3665_v50 }
 0x49d   :  { %v1797_v27 = vcombine.low %v3663_v49, %v3667_v52 }
 0x49e   :  { %v4222_v54 = vrot.slane %v1796_v45, %v4021_v6 }
 0x49f   :  { %v4225_v44 = vrot.slane %v1797_v27, %v4021_v6 }
 0x4a1   :  { %v1828_v55 = vcombine.low %v4222_v54, %v4225_v44 }
 0x4f0   :  { %v1421_v12 = vpop.f32.mrb[4].mxu1  ;;  %v1503_v2 = vpop.f32.mrb[16].mxu0 }
 0x4f1   :  { %v1555_v11 = vmul.f32 %v1530_v60, %v1421_v12  ;;  %v1557_v14 = vmul.f32 %v1538_v61, %v1503_v2  ;;  %v1423_v17 = vpop.f32.mrb[5].mxu1  ;;  %v1505_v19 = vpop.f32.mrb[17].mxu0 }
 0x4f2   :  { %v1556_v29 = vmul.f32 %v1534_v62, %v1423_v17  ;;  %v1558_v46 = vmul.f32 %v1542_v63, %v1505_v19  ;;  %v1425_v5 = vpop.f32.mrb[6].mxu1  ;;  %v1507_v3 = vpop.f32.mrb[18].mxu0 }
 0x4f3   :  { %v1604_v41 = vadd.f32 %v1579_v0, %v1555_v11  ;;  %v1606_v31 = vadd.f32 %v1587_v1, %v1557_v14  ;;  %v1426_v34 = vpop.f32.mrb[7].mxu1  ;;  %v1508_v35 = vpop.f32.mrb[19].mxu0 }
 0x4f4   :  { %v1605_v36 = vadd.f32 %v1583_v9, %v1556_v29  ;;  %v1607_v37 = vadd.f32 %v1591_v10, %v1558_v46 }
 0x4f5   :  { %v1612_v7 = vmul.f32 0.01, %v1604_v41  ;;  %v1614_v38 = vmul.f32 0.01, %v1606_v31 }
 0x4f6   :  { %v1613_v39 = vmul.f32 0.01, %v1605_v36  ;;  %v1615_v47 = vmul.f32 0.01, %v1607_v37 }
 0x4f7   :  { %v4257_v43 = vmax.f32 %v1604_v41, %v1612_v7  ;;  %v4259_v30 = vmax.f32 %v1606_v31, %v1614_v38 }
 0x4f8   :  { %v4261_v33 = vmax.f32 %v1605_v36, %v1613_v39  ;;  %v4263_v40 = vmax.f32 %v1607_v37, %v1615_v47 }
 0x4f9   :  { %v1652_v51 = vrot.slane %v4257_v43, 4  ;;  %v1688_v53 = vmul.f32 %v4257_v43, %v4257_v43  ;;  %v1664_v42 = vrot.slane %v4259_v30, 4  ;;  %v1690_v25 = vmul.f32 %v4259_v30, %v4259_v30 }
 0x4fa   :  { %v1658_v28 = vrot.slane %v4261_v33, 4  ;;  %v1689_v32 = vmul.f32 %v4261_v33, %v4261_v33  ;;  %v1670_v48 = vrot.slane %v4263_v40, 4  ;;  %v1691_v49 = vmul.f32 %v4263_v40, %v4263_v40 }
 0x4fb   :  { %v1653_v50 = vadd.f32 %v1652_v51, %v4257_v43  ;;  %v1716_v52 = vrot.slane %v1688_v53, 4  ;;  %v1665_v45 = vadd.f32 %v1664_v42, %v4259_v30  ;;  %v1728_v27 = vrot.slane %v1690_v25, 4 }
 0x4fc   :  { %v1659_v60 = vadd.f32 %v1658_v28, %v4261_v33  ;;  %v1722_v61 = vrot.slane %v1689_v32, 4  ;;  %v1671_v62 = vadd.f32 %v1670_v48, %v4263_v40  ;;  %v1734_v63 = vrot.slane %v1691_v49, 4 }
 0x4fd   :  { %v1654_v0 = vrot.slane %v1653_v50, 2  ;;  %v1717_v1 = vadd.f32 %v1716_v52, %v1688_v53  ;;  %v1666_v12 = vrot.slane %v1665_v45, 2  ;;  %v1729_v2 = vadd.f32 %v1728_v27, %v1690_v25 }
 0x4fe   :  { %v1660_v9 = vrot.slane %v1659_v60, 2  ;;  %v1723_v10 = vadd.f32 %v1722_v61, %v1689_v32  ;;  %v1672_v11 = vrot.slane %v1671_v62, 2  ;;  %v1735_v14 = vadd.f32 %v1734_v63, %v1691_v49 }
 0x4ff   :  { %v1655_v17 = vadd.f32 %v1654_v0, %v1653_v50  ;;  %v1718_v19 = vrot.slane %v1717_v1, 2  ;;  %v1667_v29 = vadd.f32 %v1666_v12, %v1665_v45  ;;  %v1730_v46 = vrot.slane %v1729_v2, 2 }
 0x500   :  { %v1661_v5 = vadd.f32 %v1660_v9, %v1659_v60  ;;  %v1724_v3 = vrot.slane %v1723_v10, 2  ;;  %v1673_v41 = vadd.f32 %v1672_v11, %v1671_v62  ;;  %v1736_v31 = vrot.slane %v1735_v14, 2 }
 0x501   :  { %v1656_v34 = vrot.slane %v1655_v17, 1  ;;  %v1719_v35 = vadd.f32 %v1718_v19, %v1717_v1  ;;  %v1668_v36 = vrot.slane %v1667_v29, 1  ;;  %v1731_v37 = vadd.f32 %v1730_v46, %v1729_v2 }
 0x502   :  { %v1662_v7 = vrot.slane %v1661_v5, 1  ;;  %v1725_v38 = vadd.f32 %v1724_v3, %v1723_v10  ;;  %v1674_v39 = vrot.slane %v1673_v41, 1  ;;  %v1737_v47 = vadd.f32 %v1736_v31, %v1735_v14 }
 0x503   :  { %v1657_v51 = vadd.f32 %v1656_v34, %v1655_v17  ;;  %v1720_v53 = vrot.slane %v1719_v35, 1  ;;  %v1669_v42 = vadd.f32 %v1668_v36, %v1667_v29  ;;  %v1732_v25 = vrot.slane %v1731_v37, 1 }
 0x504   :  { %v1663_v28 = vadd.f32 %v1662_v7, %v1661_v5  ;;  %v1726_v32 = vrot.slane %v1725_v38, 1  ;;  %v1675_v48 = vadd.f32 %v1674_v39, %v1673_v41  ;;  %v1738_v49 = vrot.slane %v1737_v47, 1 }
 0x505   :  { %v1680_v50 = vmul.f32 0.125, %v1657_v51  ;;  %v1721_v52 = vadd.f32 %v1720_v53, %v1719_v35  ;;  %v1682_v45 = vmul.f32 0.125, %v1669_v42  ;;  %v1733_v27 = vadd.f32 %v1732_v25, %v1731_v37 }
 0x506   :  { %v1681_v60 = vmul.f32 0.125, %v1663_v28  ;;  %v1727_v61 = vadd.f32 %v1726_v32, %v1725_v38  ;;  %v1683_v62 = vmul.f32 0.125, %v1675_v48  ;;  %v1739_v63 = vadd.f32 %v1738_v49, %v1737_v47  ;;  %v1625_v49 = vld [vmem:[#allocation13 + $0x1] ss:$4 sm:$0xff] }
 0x507   :  { %v1744_v0 = vmul.f32 0.125, %v1721_v52  ;;  %v1752_v1 = vmul.f32 %v1680_v50, %v1680_v50  ;;  %v1746_v12 = vmul.f32 0.125, %v1733_v27  ;;  %v1754_v2 = vmul.f32 %v1682_v45, %v1682_v45 }
 0x508   :  { %v1745_v9 = vmul.f32 0.125, %v1727_v61  ;;  %v1753_v10 = vmul.f32 %v1681_v60, %v1681_v60  ;;  %v1747_v11 = vmul.f32 0.125, %v1739_v63  ;;  %v1755_v14 = vmul.f32 %v1683_v62, %v1683_v62 }
 0x509   :  { %v1760_v17 = vsub.f32 %v1744_v0, %v1752_v1  ;;  %v1762_v19 = vsub.f32 %v1746_v12, %v1754_v2  ;;  %v1836_v32 = vrot.slane %v1828_v55, %v4021_v6 }
 0x50a   :  { %v1761_v29 = vsub.f32 %v1745_v9, %v1753_v10  ;;  %v1763_v46 = vsub.f32 %v1747_v11, %v1755_v14 }
 0x50b   :  { %v1768_v5 = vmax.f32 %v1760_v17, 0.0  ;;  %v1770_v3 = vmax.f32 %v1762_v19, 0.0 }
 0x50c   :  { %v1769_v41 = vmax.f32 %v1761_v29, 0.0  ;;  %v1771_v31 = vmax.f32 %v1763_v46, 0.0 }
 0x50d   :  { %v1776_v34 = vadd.f32 1e-05, %v1768_v5  ;;  %v1778_v35 = vadd.f32 1e-05, %v1770_v3 }
 0x50e   :  { %v1777_v36 = vadd.f32 1e-05, %v1769_v41  ;;  %v1779_v37 = vadd.f32 1e-05, %v1771_v31 }
 0x50f   :  { %3668 = vrsqrt.f32 %v1776_v34 }
 0x510   :  { %3670 = vrsqrt.f32 %v1778_v35 }
 0x511   :  { %3672 = vrsqrt.f32 %v1777_v36 }
 0x512   :  { %3674 = vrsqrt.f32 %v1779_v37  ;;  %v1627_v37 = vld [vmem:[#allocation13 + $0x2] ss:$4 sm:$0xff] }
 0x519   :  { %v3669_v7 = vpop.eup %3668 }
 0x51a   :  { %v3671_v38 = vpop.eup %3670 }
 0x51b   :  { %v3673_v39 = vpop.eup %3672 }
 0x51c   :  { %v3675_v47 = vpop.eup %3674  ;;  %v1798_v51 = vcombine.low %v3669_v7, %v3673_v39 }
 0x51d   :  { %v1799_v53 = vcombine.low %v3671_v38, %v3675_v47 }
 0x51e   :  { %v1820_v42 = vrot.slane %v1798_v51, %v4021_v6 }
 0x51f   :  { %v1827_v25 = vrot.slane %v1799_v53, %v4021_v6 }
 0x521   :  { %v1829_v28 = vcombine.low %v1820_v42, %v1827_v25 }
 0x523   :  { %v1843_v48 = vrot.slane %v1829_v28, %v4021_v6 }
 0x525   :  { %v1844_v52 = vcombine.low %v1836_v32, %v1843_v48 }
 0x527   :  { %v1846_v27 = vmul.f32 %v1844_v52, %v1625_v49 }
 0x529   :  { %v1851_v61 = vrot.slane %v1846_v27, %v4013_v13  ;;  %v1855_v63 = vrot.slane %v1846_v27, %v4016_v15  ;;  %v1859_v0 = vrot.slane %v1846_v27, %v4094_v4  ;;  %v1863_v1 = vrot.slane %v1846_v27, %v4097_v8 }
 0x52a   :  { %v1867_v12 = vrot.slane %v1846_v27, %v4230_v56  ;;  %v1871_v2 = vrot.slane %v1846_v27, %v4236_v58  ;;  %v1875_v54 = vrot.slane %v1846_v27, %v4233_v57  ;;  %v1879_v44 = vrot.slane %v1846_v27, %v4239_v59 }
 0x52b   :  { %v1888_v55 = vmul.f32 %v1851_v61, %v4205_v16  ;;  %v1889_v9 = vmul.f32 %v1855_v63, %v4209_v24  ;;  %v1890_v10 = vmul.f32 %v1859_v0, %v4207_v18  ;;  %v1891_v11 = vmul.f32 %v1863_v1, %v4211_v26 }
 0x52c   :  { %v1892_v14 = vmul.f32 %v1867_v12, %v1680_v50  ;;  %v1893_v17 = vmul.f32 %v1871_v2, %v1681_v60  ;;  %v1894_v19 = vmul.f32 %v1875_v54, %v1682_v45  ;;  %v1895_v29 = vmul.f32 %v1879_v44, %v1683_v62 }
 0x52d   :  { %v1904_v46 = vcombine.low %v1888_v55, %v1889_v9  ;;  %v1905_v5 = vcombine.low %v1890_v10, %v1891_v11  ;;  %v1955_v3 = vmul.f32 %v1851_v61, %v4181_v20  ;;  %v1956_v41 = vmul.f32 %v1855_v63, %v4185_v22 }
 0x52e   :  { %v1906_v31 = vcombine.low %v1892_v14, %v1893_v17  ;;  %v1907_v34 = vcombine.low %v1894_v19, %v1895_v29  ;;  %v1957_v16 = vmul.f32 %v1859_v0, %v4183_v21  ;;  %v1958_v24 = vmul.f32 %v1863_v1, %v4187_v23 }
 0x52f   :  { %v1914_v18 = vrot.slane %v1904_v46, %v4021_v6  ;;  %v1921_v26 = vrot.slane %v1905_v5, %v4021_v6  ;;  %v1959_v50 = vmul.f32 %v1867_v12, %v4257_v43  ;;  %v1960_v45 = vmul.f32 %v1871_v2, %v4261_v33 }
 0x530   :  { %v1928_v60 = vrot.slane %v1906_v31, %v4021_v6  ;;  %v1935_v20 = vrot.slane %v1907_v34, %v4021_v6  ;;  %v1961_v22 = vmul.f32 %v1875_v54, %v4259_v30  ;;  %v1962_v62 = vmul.f32 %v1879_v44, %v4263_v40 }
 0x531   :  { %v1936_v35 = vcombine.low %v1914_v18, %v1921_v26 }
 0x532   :  { %v1937_v21 = vcombine.low %v1928_v60, %v1935_v20 }
 0x533   :  { %v1944_v23 = vrot.slane %v1936_v35, %v4021_v6 }
 0x534   :  { %v1951_v36 = vrot.slane %v1937_v21, %v4021_v6 }
 0x536   :  { %v1952_v7 = vcombine.low %v1944_v23, %v1951_v36 }
 0x538   :  { %v1954_v38 = vsub.f32 %v1627_v37, %v1952_v7 }
 0x53a   :  { %v1967_v43 = vrot.slane %v1954_v38, %v4013_v13  ;;  %v1971_v33 = vrot.slane %v1954_v38, %v4016_v15  ;;  %v1975_v39 = vrot.slane %v1954_v38, %v4094_v4  ;;  %v1979_v47 = vrot.slane %v1954_v38, %v4097_v8 }
 0x53b   :  { %v1983_v30 = vrot.slane %v1954_v38, %v4230_v56  ;;  %v1987_v40 = vrot.slane %v1954_v38, %v4236_v58  ;;  %v1991_v51 = vrot.slane %v1954_v38, %v4233_v57  ;;  %v1995_v53 = vrot.slane %v1954_v38, %v4239_v59 }
 0x53c   :  { %v4322_v6 = vadd.f32 %v1967_v43, %v1955_v3  ;;  %v2005_v42 = vadd.f32 %v1971_v33, %v1956_v41  ;;  %v4324_v25 = vadd.f32 %v1975_v39, %v1957_v16  ;;  %v4326_v28 = vadd.f32 %v1979_v47, %v1958_v24 }
 0x53d   :  { %v4328_v32 = vadd.f32 %v1983_v30, %v1959_v50  ;;  %v4330_v48 = vadd.f32 %v1987_v40, %v1960_v45  ;;  %v4332_v49 = vadd.f32 %v1991_v51, %v1961_v22  ;;  %v4334_v52 = vadd.f32 %v1995_v53, %v1962_v62 }
 0x53e   :  { %3862 = dma.done.wait [#allocation5 + $0x2], 28672 }
 0x53f   :  { %3863 = vsyncadd [#allocation5 + $0x2], 4294938624  ;;  %v4336_v27 = vpack.c.bf16 %v2005_v42, %v2005_v42  ;;  %v2017_v59 = vld [vmem:[#allocation4 + $0x8] sm:$0xff]  ;;  %v2019_v61 = vld [vmem:[#allocation4 + $0x18] sm:$0xff] }
 0x540   :  { %v2016_v63 = vld [vmem:[#allocation4] sm:$0xff]  ;;  %v2252_v0 = vunpack.c.l.s8.bf16 %v2017_v59  ;;  %v2259_v1 = vunpack.c.h.s8.bf16 %v2017_v59  ;;  %v2254_v12 = vunpack.c.l.s8.bf16 %v2019_v61  ;;  %v2261_v2 = vunpack.c.h.s8.bf16 %v2019_v61  ;;  %v2018_v54 = vld [vmem:[#allocation4 + $0x10] sm:$0xff]  ;;  %v2023_v29 = vld [vmem:[#allocation4 + $0x38] sm:$0xff] }
 0x541   :  { %2731 = vmatprep.mubr.bf16.mxu1 %v4336_v27  ;;  %2895 = vmatprep.mubr.bf16.mxu0 %v4336_v27  ;;  %v2251_v44 = vunpack.c.l.s8.bf16 %v2016_v63  ;;  %v2253_v55 = vunpack.c.l.s8.bf16 %v2018_v54  ;;  %v2024_v9 = vld [vmem:[#allocation4 + $0x40] sm:$0xff]  ;;  %v2026_v10 = vld [vmem:[#allocation4 + $0x50] sm:$0xff]  ;;  %v2258_v11 = vunpack.c.h.s8.bf16 %v2016_v63  ;;  %v2260_v14 = vunpack.c.h.s8.bf16 %v2018_v54  ;;  %v2025_v46 = vld [vmem:[#allocation4 + $0x48] sm:$0xff] }
 0x542   :  { %2699 = vmatprep.subr.bf16.mxu1 %v2252_v0  ;;  %2863 = vmatprep.subr.bf16.mxu0 %v2254_v12  ;;  %v2266_v17 = vunpack.c.l.s8.bf16 %v2024_v9  ;;  %v2268_v19 = vunpack.c.l.s8.bf16 %v2026_v10  ;;  %v2265_v5 = vunpack.c.l.s8.bf16 %v2023_v29  ;;  %v2267_v3 = vunpack.c.l.s8.bf16 %v2025_v46  ;;  %v2031_v34 = vld [vmem:[#allocation4 + $0x78] sm:$0xff]  ;;  %v2033_v16 = vld [vmem:[#allocation4 + $0x88] sm:$0xff]  ;;  %v2030_v45 = vld [vmem:[#allocation4 + $0x70] sm:$0xff] }
 0x543   :  { %2700 = vmatpush1.bf16.msra.mxu1 %v2251_v44  ;;  %2864 = vmatpush1.bf16.msra.mxu0 %v2253_v55  ;;  %v2273_v41 = vunpack.c.h.s8.bf16 %v2024_v9  ;;  %v2275_v31 = vunpack.c.h.s8.bf16 %v2026_v10  ;;  %v2272_v24 = vunpack.c.h.s8.bf16 %v2023_v29  ;;  %v2274_v18 = vunpack.c.h.s8.bf16 %v2025_v46  ;;  %v2032_v60 = vld [vmem:[#allocation4 + $0x80] sm:$0xff]  ;;  %v2038_v21 = vld [vmem:[#allocation4 + $0xb0] sm:$0xff]  ;;  %v2037_v43 = vld [vmem:[#allocation4 + $0xa8] sm:$0xff] }
 0x544   :  { %2701 = vmatprep.subr.bf16.mxu1 %v2259_v1  ;;  %2865 = vmatprep.subr.bf16.mxu0 %v2261_v2  ;;  %v2280_v26 = vunpack.c.l.s8.bf16 %v2031_v34  ;;  %v2282_v50 = vunpack.c.l.s8.bf16 %v2033_v16  ;;  %v2279_v20 = vunpack.c.l.s8.bf16 %v2030_v45  ;;  %v2281_v22 = vunpack.c.l.s8.bf16 %v2032_v60  ;;  %v2040_v23 = vld [vmem:[#allocation4 + $0xc0] sm:$0xff]  ;;  %v2039_v33 = vld [vmem:[#allocation4 + $0xb8] sm:$0xff]  ;;  %v2045_v51 = vld [vmem:[#allocation4 + $0xe8] sm:$0xff] }
 0x545   :  { %v2287_v62 = vunpack.c.h.s8.bf16 %v2031_v34  ;;  %v2289_v35 = vunpack.c.h.s8.bf16 %v2033_v16  ;;  %v2286_v36 = vunpack.c.h.s8.bf16 %v2030_v45  ;;  %v2288_v37 = vunpack.c.h.s8.bf16 %v2032_v60  ;;  %v2047_v53 = vld [vmem:[#allocation4 + $0xf8] sm:$0xff]  ;;  %v2044_v0 = vld [vmem:[#allocation4 + $0xe0] sm:$0xff]  ;;  %v2046_v1 = vld [vmem:[#allocation4 + $0xf0] sm:$0xff] }
 0x546   :  { %v2294_v7 = vunpack.c.l.s8.bf16 %v2038_v21  ;;  %v2296_v38 = vunpack.c.l.s8.bf16 %v2040_v23  ;;  %v2293_v39 = vunpack.c.l.s8.bf16 %v2037_v43  ;;  %v2295_v47 = vunpack.c.l.s8.bf16 %v2039_v33  ;;  %v2052_v55 = vld [vmem:[#allocation4 + $0x120] sm:$0xff]  ;;  %v2054_v9 = vld [vmem:[#allocation4 + $0x130] sm:$0xff]  ;;  %v2053_v29 = vld [vmem:[#allocation4 + $0x128] sm:$0xff] }
 0x547   :  { %2702 = vmatpush1.bf16.msra.mxu1 %v2258_v11  ;;  %2866 = vmatpush1.bf16.msra.mxu0 %v2260_v14  ;;  %v2301_v30 = vunpack.c.h.s8.bf16 %v2038_v21  ;;  %v2303_v40 = vunpack.c.h.s8.bf16 %v2040_v23  ;;  %v2300_v42 = vunpack.c.h.s8.bf16 %v2037_v43  ;;  %v2302_v59 = vunpack.c.h.s8.bf16 %v2039_v33  ;;  %v2061_v34 = vld [vmem:[#allocation4 + $0x168] sm:$0xff]  ;;  %v2060_v45 = vld [vmem:[#allocation4 + $0x160] sm:$0xff]  ;;  %v2067_v43 = vld [vmem:[#allocation4 + $0x198] sm:$0xff] }
 0x548   :  { %2703 = vmatprep.subr.bf16.mxu1 %v2266_v17  ;;  %2867 = vmatprep.subr.bf16.mxu0 %v2268_v19  ;;  %v2308_v61 = vunpack.c.l.s8.bf16 %v2045_v51  ;;  %v2310_v63 = vunpack.c.l.s8.bf16 %v2047_v53  ;;  %v2307_v12 = vunpack.c.l.s8.bf16 %v2044_v0  ;;  %v2309_v2 = vunpack.c.l.s8.bf16 %v2046_v1  ;;  %v2051_v19 = vld [vmem:[#allocation4 + $0x118] sm:$0xff]  ;;  %v2068_v21 = vld [vmem:[#allocation4 + $0x1a0] sm:$0xff] }
 0x549   :  { %v2315_v54 = vunpack.c.h.s8.bf16 %v2045_v51  ;;  %v2317_v44 = vunpack.c.h.s8.bf16 %v2047_v53  ;;  %v2314_v10 = vunpack.c.h.s8.bf16 %v2044_v0  ;;  %v2316_v11 = vunpack.c.h.s8.bf16 %v2046_v1  ;;  %v2075_v51 = vld [vmem:[#allocation4 + $0x1d8] sm:$0xff]  ;;  %v2074_v0 = vld [vmem:[#allocation4 + $0x1d0] sm:$0xff] }
 0x54a   :  { %v2322_v14 = vunpack.c.l.s8.bf16 %v2052_v55  ;;  %v2324_v17 = vunpack.c.l.s8.bf16 %v2054_v9  ;;  %v2321_v46 = vunpack.c.l.s8.bf16 %v2051_v19  ;;  %v2328_v16 = vunpack.c.h.s8.bf16 %v2051_v19  ;;  %v2079_v19 = vld [vmem:[#allocation4 + $0x1f8] sm:$0xff] }
 0x54b   :  { %2704 = vmatpush1.bf16.msra.mxu1 %v2265_v5  ;;  %2868 = vmatpush1.bf16.msra.mxu0 %v2267_v3  ;;  %v2323_v5 = vunpack.c.l.s8.bf16 %v2053_v29  ;;  %v2329_v3 = vunpack.c.h.s8.bf16 %v2052_v55  ;;  %v4342_v1 = vpack.c.bf16 %v4322_v6, %v4322_v6  ;;  %v2080_v55 = vld [vmem:[#allocation4 + $0x200] sm:$0xff] }
 0x54c   :  { %2705 = vmatprep.subr.bf16.mxu1 %v2273_v41  ;;  %2869 = vmatprep.subr.bf16.mxu0 %v2275_v31  ;;  %v2331_v41 = vunpack.c.h.s8.bf16 %v2054_v9  ;;  %v2059_v31 = vld [vmem:[#allocation4 + $0x158] sm:$0xff]  ;;  %v2082_v9 = vld [vmem:[#allocation4 + $0x210] sm:$0xff] }
 0x54f   :  { %2706 = vmatpush1.bf16.msra.mxu1 %v2272_v24  ;;  %2870 = vmatpush1.bf16.msra.mxu0 %v2274_v18  ;;  %v2330_v24 = vunpack.c.h.s8.bf16 %v2053_v29  ;;  %v2336_v18 = vunpack.c.l.s8.bf16 %v2059_v31  ;;  %v2081_v29 = vld [vmem:[#allocation4 + $0x208] sm:$0xff] }
 0x550   :  { %2707 = vmatprep.subr.bf16.mxu1 %v2280_v26  ;;  %2871 = vmatprep.subr.bf16.mxu0 %v2282_v50  ;;  %v2338_v26 = vunpack.c.l.s8.bf16 %v2061_v34  ;;  %v2058_v50 = vld [vmem:[#allocation4 + $0x150] sm:$0xff] }
 0x551   :  { %v2335_v60 = vunpack.c.l.s8.bf16 %v2058_v50  ;;  %v2342_v23 = vunpack.c.h.s8.bf16 %v2058_v50  ;;  %v2088_v50 = vld [vmem:[#allocation4 + $0x240] sm:$0xff] }
 0x553   :  { %2708 = vmatpush1.bf16.msra.mxu1 %v2279_v20  ;;  %2872 = vmatpush1.bf16.msra.mxu0 %v2281_v22  ;;  %v2337_v20 = vunpack.c.l.s8.bf16 %v2060_v45  ;;  %v2343_v22 = vunpack.c.h.s8.bf16 %v2059_v31  ;;  %v2089_v31 = vld [vmem:[#allocation4 + $0x248] sm:$0xff] }
 0x554   :  { %2709 = vmatprep.subr.bf16.mxu1 %v2287_v62  ;;  %2873 = vmatprep.subr.bf16.mxu0 %v2289_v35  ;;  %v2345_v62 = vunpack.c.h.s8.bf16 %v2061_v34  ;;  %v2066_v35 = vld [vmem:[#allocation4 + $0x190] sm:$0xff]  ;;  %v2384_v34 = vunpack.c.h.s8.bf16 %v2079_v19 }
 0x557   :  { %2710 = vmatpush1.bf16.msra.mxu1 %v2286_v36  ;;  %2874 = vmatpush1.bf16.msra.mxu0 %v2288_v37  ;;  %v2344_v36 = vunpack.c.h.s8.bf16 %v2060_v45  ;;  %v2350_v37 = vunpack.c.l.s8.bf16 %v2066_v35 }
 0x558   :  { %2711 = vmatprep.subr.bf16.mxu1 %v2294_v7  ;;  %2875 = vmatprep.subr.bf16.mxu0 %v2296_v38  ;;  %v2352_v7 = vunpack.c.l.s8.bf16 %v2068_v21  ;;  %v2065_v38 = vld [vmem:[#allocation4 + $0x188] sm:$0xff] }
 0x559   :  { %v2349_v33 = vunpack.c.l.s8.bf16 %v2065_v38  ;;  %v2356_v53 = vunpack.c.h.s8.bf16 %v2065_v38  ;;  %v2095_v38 = vld [vmem:[#allocation4 + $0x278] sm:$0xff] }
 0x55b   :  { %2712 = vmatpush1.bf16.msra.mxu1 %v2293_v39  ;;  %2876 = vmatpush1.bf16.msra.mxu0 %v2295_v47  ;;  %v2351_v39 = vunpack.c.l.s8.bf16 %v2067_v43  ;;  %v2357_v47 = vunpack.c.h.s8.bf16 %v2066_v35  ;;  %v2096_v35 = vld [vmem:[#allocation4 + $0x280] sm:$0xff] }
 0x55c   :  { %2713 = vmatprep.subr.bf16.mxu1 %v2301_v30  ;;  %2877 = vmatprep.subr.bf16.mxu0 %v2303_v40  ;;  %v2359_v30 = vunpack.c.h.s8.bf16 %v2068_v21  ;;  %v2073_v40 = vld [vmem:[#allocation4 + $0x1c8] sm:$0xff] }
 0x55f   :  { %2714 = vmatpush1.bf16.msra.mxu1 %v2300_v42  ;;  %2878 = vmatpush1.bf16.msra.mxu0 %v2302_v59  ;;  %v2358_v42 = vunpack.c.h.s8.bf16 %v2067_v43  ;;  %v2364_v59 = vunpack.c.l.s8.bf16 %v2073_v40 }
 0x560   :  { %2715 = vmatprep.subr.bf16.mxu1 %v2308_v61  ;;  %2879 = vmatprep.subr.bf16.mxu0 %v2310_v63  ;;  %v2366_v61 = vunpack.c.l.s8.bf16 %v2075_v51  ;;  %v2072_v63 = vld [vmem:[#allocation4 + $0x1c0] sm:$0xff] }
 0x561   :  { %v2370_v6 = vunpack.c.h.s8.bf16 %v2072_v63 }
 0x563   :  { %2716 = vmatpush1.bf16.msra.mxu1 %v2307_v12  ;;  %2880 = vmatpush1.bf16.msra.mxu0 %v2309_v2  ;;  %v2363_v12 = vunpack.c.l.s8.bf16 %v2072_v63  ;;  %v2365_v2 = vunpack.c.l.s8.bf16 %v2074_v0  ;;  %v2102_v63 = vld [vmem:[#allocation4 + $0x2b0] sm:$0xff] }
 0x564   :  { %2717 = vmatprep.subr.bf16.mxu1 %v2315_v54  ;;  %2881 = vmatprep.subr.bf16.mxu0 %v2317_v44  ;;  %v2371_v54 = vunpack.c.h.s8.bf16 %v2073_v40  ;;  %v2373_v44 = vunpack.c.h.s8.bf16 %v2075_v51  ;;  %v2103_v40 = vld [vmem:[#allocation4 + $0x2b8] sm:$0xff] }
 0x567   :  { %2718 = vmatpush1.bf16.msra.mxu1 %v2314_v10  ;;  %2882 = vmatpush1.bf16.msra.mxu0 %v2316_v11  ;;  %v4346_v10 = vpack.c.bf16 %v4326_v28, %v4326_v28  ;;  %v2372_v11 = vunpack.c.h.s8.bf16 %v2074_v0  ;;  %v2377_v28 = vunpack.c.l.s8.bf16 %v2079_v19  ;;  %v2109_v19 = vld [vmem:[#allocation4 + $0x2e8] sm:$0xff] }
 0x568   :  { %2719 = vmatprep.subr.bf16.mxu1 %v2322_v14  ;;  %2883 = vmatprep.subr.bf16.mxu0 %v2324_v17  ;;  %v2378_v14 = vunpack.c.l.s8.bf16 %v2080_v55  ;;  %v2380_v17 = vunpack.c.l.s8.bf16 %v2082_v9 }
 0x56b   :  { %2720 = vmatpush1.bf16.msra.mxu1 %v2321_v46  ;;  %2884 = vmatpush1.bf16.msra.mxu0 %v2323_v5  ;;  %v2379_v46 = vunpack.c.l.s8.bf16 %v2081_v29  ;;  %v2385_v5 = vunpack.c.h.s8.bf16 %v2080_v55  ;;  %v2110_v55 = vld [vmem:[#allocation4 + $0x2f0] sm:$0xff] }
 0x56c   :  { %2721 = vmatprep.subr.bf16.mxu1 %v2329_v3  ;;  %2885 = vmatprep.subr.bf16.mxu0 %v2331_v41  ;;  %v2387_v3 = vunpack.c.h.s8.bf16 %v2082_v9  ;;  %v2087_v41 = vld [vmem:[#allocation4 + $0x238] sm:$0xff] }
 0x56f   :  { %2722 = vmatpush1.bf16.msra.mxu1 %v2328_v16  ;;  %2886 = vmatpush1.bf16.msra.mxu0 %v2330_v24  ;;  %v2386_v16 = vunpack.c.h.s8.bf16 %v2081_v29  ;;  %v2392_v24 = vunpack.c.l.s8.bf16 %v2087_v41 }
 0x570   :  { %2723 = vmatprep.subr.bf16.mxu1 %v2336_v18  ;;  %2887 = vmatprep.subr.bf16.mxu0 %v2338_v26  ;;  %v2394_v18 = vunpack.c.l.s8.bf16 %v2089_v31  ;;  %v2086_v26 = vld [vmem:[#allocation4 + $0x230] sm:$0xff] }
 0x571   :  { %v2391_v45 = vunpack.c.l.s8.bf16 %v2086_v26  ;;  %v2398_v21 = vunpack.c.h.s8.bf16 %v2086_v26  ;;  %v2116_v26 = vld [vmem:[#allocation4 + $0x320] sm:$0xff] }
 0x573   :  { %2724 = vmatpush1.bf16.msra.mxu1 %v2335_v60  ;;  %2888 = vmatpush1.bf16.msra.mxu0 %v2337_v20  ;;  %v2393_v60 = vunpack.c.l.s8.bf16 %v2088_v50  ;;  %v2399_v20 = vunpack.c.h.s8.bf16 %v2087_v41  ;;  %v2117_v41 = vld [vmem:[#allocation4 + $0x328] sm:$0xff] }
 0x574   :  { %2725 = vmatprep.subr.bf16.mxu1 %v2343_v22  ;;  %2889 = vmatprep.subr.bf16.mxu0 %v2345_v62  ;;  %v2401_v22 = vunpack.c.h.s8.bf16 %v2089_v31  ;;  %v2094_v62 = vld [vmem:[#allocation4 + $0x270] sm:$0xff] }
 0x577   :  { %2726 = vmatpush1.bf16.msra.mxu1 %v2342_v23  ;;  %2890 = vmatpush1.bf16.msra.mxu0 %v2344_v36  ;;  %v2400_v23 = vunpack.c.h.s8.bf16 %v2088_v50  ;;  %v2406_v36 = vunpack.c.l.s8.bf16 %v2094_v62 }
 0x578   :  { %2727 = vmatprep.subr.bf16.mxu1 %v2350_v37  ;;  %2891 = vmatprep.subr.bf16.mxu0 %v2352_v7  ;;  %v2408_v37 = vunpack.c.l.s8.bf16 %v2096_v35  ;;  %v2093_v7 = vld [vmem:[#allocation4 + $0x268] sm:$0xff] }
 0x579   :  { %v2405_v43 = vunpack.c.l.s8.bf16 %v2093_v7  ;;  %v2412_v51 = vunpack.c.h.s8.bf16 %v2093_v7  ;;  %v2123_v7 = vld [vmem:[#allocation4 + $0x358] sm:$0xff] }
 0x57b   :  { %2728 = vmatpush1.bf16.msra.mxu1 %v2349_v33  ;;  %2892 = vmatpush1.bf16.msra.mxu0 %v2351_v39  ;;  %v2407_v33 = vunpack.c.l.s8.bf16 %v2095_v38  ;;  %v2413_v39 = vunpack.c.h.s8.bf16 %v2094_v62  ;;  %v2124_v62 = vld [vmem:[#allocation4 + $0x360] sm:$0xff] }
 0x57c   :  { %2729 = vmatprep.subr.bf16.mxu1 %v2357_v47  ;;  %2893 = vmatprep.subr.bf16.mxu0 %v2359_v30  ;;  %v2415_v47 = vunpack.c.h.s8.bf16 %v2096_v35  ;;  %v2101_v30 = vld [vmem:[#allocation4 + $0x2a8] sm:$0xff] }
 0x57f   :  { %2730 = vmatpush1.bf16.msra.mxu1 %v2356_v53  ;;  %2894 = vmatpush1.bf16.msra.mxu0 %v2358_v42  ;;  %v2414_v53 = vunpack.c.h.s8.bf16 %v2095_v38  ;;  %v2420_v42 = vunpack.c.l.s8.bf16 %v2101_v30 }
 0x580   :  { %2740 = vmatprep.subr.bf16.mxu1 %v2364_v59  ;;  %2904 = vmatprep.subr.bf16.mxu0 %v2366_v61  ;;  %v2422_v59 = vunpack.c.l.s8.bf16 %v2103_v40  ;;  %v2100_v61 = vld [vmem:[#allocation4 + $0x2a0] sm:$0xff] }
 0x581   :  { %v2419_v0 = vunpack.c.l.s8.bf16 %v2100_v61  ;;  %v2426_v9 = vunpack.c.h.s8.bf16 %v2100_v61  ;;  %v2130_v61 = vld [vmem:[#allocation4 + $0x390] sm:$0xff] }
 0x582   :  { %2732 = vmatmul.mubr.bf16.vlgmr.msra.gmra.mrb[8].mxu1 %v4342_v1  ;;  %2896 = vmatmul.mubr.bf16.vlgmr.msra.gmra.mrb[20].mxu0 %v4342_v1 }
 0x583   :  { %2741 = vmatpush1.bf16.msra.mxu1 %v2363_v12  ;;  %2905 = vmatpush1.bf16.msra.mxu0 %v2365_v2  ;;  %v2421_v12 = vunpack.c.l.s8.bf16 %v2102_v63  ;;  %v2427_v2 = vunpack.c.h.s8.bf16 %v2101_v30  ;;  %v2131_v30 = vld [vmem:[#allocation4 + $0x398] sm:$0xff] }
 0x584   :  { %2742 = vmatprep.subr.bf16.mxu1 %v2371_v54  ;;  %2906 = vmatprep.subr.bf16.mxu0 %v2373_v44  ;;  %v2429_v54 = vunpack.c.h.s8.bf16 %v2103_v40  ;;  %v2108_v44 = vld [vmem:[#allocation4 + $0x2e0] sm:$0xff] }
 0x585   :  { %2772 = vmatprep.mubr.bf16.mxu1 %v4346_v10  ;;  %2936 = vmatprep.mubr.bf16.mxu0 %v4346_v10 }
 0x587   :  { %2743 = vmatpush1.bf16.msra.mxu1 %v2370_v6  ;;  %2907 = vmatpush1.bf16.msra.mxu0 %v2372_v11  ;;  %v2428_v6 = vunpack.c.h.s8.bf16 %v2102_v63  ;;  %v2434_v11 = vunpack.c.l.s8.bf16 %v2108_v44  ;;  %v4354_v63 = vpack.c.bf16 %v4324_v25, %v4324_v25 }
 0x588   :  { %2744 = vmatprep.subr.bf16.mxu1 %v2378_v14  ;;  %2908 = vmatprep.subr.bf16.mxu0 %v2380_v17  ;;  %v2436_v14 = vunpack.c.l.s8.bf16 %v2110_v55  ;;  %v2107_v17 = vld [vmem:[#allocation4 + $0x2d8] sm:$0xff] }
 0x589   :  { %v2433_v29 = vunpack.c.l.s8.bf16 %v2107_v17  ;;  %v2440_v31 = vunpack.c.h.s8.bf16 %v2107_v17  ;;  %v2135_v17 = vld [vmem:[#allocation4 + $0x3b8] sm:$0xff] }
 0x58b   :  { %2745 = vmatpush1.bf16.msra.mxu1 %v2377_v28  ;;  %2909 = vmatpush1.bf16.msra.mxu0 %v2379_v46  ;;  %v2435_v28 = vunpack.c.l.s8.bf16 %v2109_v19  ;;  %v2441_v46 = vunpack.c.h.s8.bf16 %v2108_v44  ;;  %v2136_v44 = vld [vmem:[#allocation4 + $0x3c0] sm:$0xff] }
 0x58c   :  { %2746 = vmatprep.subr.bf16.mxu1 %v2385_v5  ;;  %2910 = vmatprep.subr.bf16.mxu0 %v2387_v3  ;;  %v2443_v5 = vunpack.c.h.s8.bf16 %v2110_v55  ;;  %v2115_v3 = vld [vmem:[#allocation4 + $0x318] sm:$0xff]  ;;  %v2138_v55 = vld [vmem:[#allocation4 + $0x3d0] sm:$0xff] }
 0x58f   :  { %2747 = vmatpush1.bf16.msra.mxu1 %v2384_v34  ;;  %2911 = vmatpush1.bf16.msra.mxu0 %v2386_v16  ;;  %v2442_v34 = vunpack.c.h.s8.bf16 %v2109_v19  ;;  %v2448_v16 = vunpack.c.l.s8.bf16 %v2115_v3  ;;  %v2137_v19 = vld [vmem:[#allocation4 + $0x3c8] sm:$0xff] }
 0x590   :  { %2748 = vmatprep.subr.bf16.mxu1 %v2392_v24  ;;  %2912 = vmatprep.subr.bf16.mxu0 %v2394_v18  ;;  %v2450_v24 = vunpack.c.l.s8.bf16 %v2117_v41  ;;  %v2114_v18 = vld [vmem:[#allocation4 + $0x310] sm:$0xff] }
 0x591   :  { %v2447_v50 = vunpack.c.l.s8.bf16 %v2114_v18  ;;  %v2454_v35 = vunpack.c.h.s8.bf16 %v2114_v18  ;;  %v2144_v18 = vld [vmem:[#allocation4 + $0x400] sm:$0xff] }
 0x593   :  { %2749 = vmatpush1.bf16.msra.mxu1 %v2391_v45  ;;  %2913 = vmatpush1.bf16.msra.mxu0 %v2393_v60  ;;  %v2449_v45 = vunpack.c.l.s8.bf16 %v2116_v26  ;;  %v2455_v60 = vunpack.c.h.s8.bf16 %v2115_v3  ;;  %v2145_v3 = vld [vmem:[#allocation4 + $0x408] sm:$0xff] }
 0x594   :  { %2750 = vmatprep.subr.bf16.mxu1 %v2399_v20  ;;  %2914 = vmatprep.subr.bf16.mxu0 %v2401_v22  ;;  %v2457_v20 = vunpack.c.h.s8.bf16 %v2117_v41  ;;  %v2122_v22 = vld [vmem:[#allocation4 + $0x350] sm:$0xff]  ;;  %v2496_v41 = vunpack.c.h.s8.bf16 %v2135_v17 }
 0x597   :  { %2751 = vmatpush1.bf16.msra.mxu1 %v2398_v21  ;;  %2915 = vmatpush1.bf16.msra.mxu0 %v2400_v23  ;;  %v2456_v21 = vunpack.c.h.s8.bf16 %v2116_v26  ;;  %v2462_v23 = vunpack.c.l.s8.bf16 %v2122_v22 }
 0x598   :  { %2752 = vmatprep.subr.bf16.mxu1 %v2406_v36  ;;  %2916 = vmatprep.subr.bf16.mxu0 %v2408_v37  ;;  %v2464_v36 = vunpack.c.l.s8.bf16 %v2124_v62  ;;  %v2121_v37 = vld [vmem:[#allocation4 + $0x348] sm:$0xff] }
 0x599   :  { %v2461_v38 = vunpack.c.l.s8.bf16 %v2121_v37  ;;  %v2468_v40 = vunpack.c.h.s8.bf16 %v2121_v37  ;;  %v2151_v37 = vld [vmem:[#allocation4 + $0x438] sm:$0xff] }
 0x59b   :  { %2753 = vmatpush1.bf16.msra.mxu1 %v2405_v43  ;;  %2917 = vmatpush1.bf16.msra.mxu0 %v2407_v33  ;;  %v2463_v43 = vunpack.c.l.s8.bf16 %v2123_v7  ;;  %v2469_v33 = vunpack.c.h.s8.bf16 %v2122_v22  ;;  %v2152_v22 = vld [vmem:[#allocation4 + $0x440] sm:$0xff] }
 0x59c   :  { %2754 = vmatprep.subr.bf16.mxu1 %v2413_v39  ;;  %2918 = vmatprep.subr.bf16.mxu0 %v2415_v47  ;;  %v2471_v39 = vunpack.c.h.s8.bf16 %v2124_v62  ;;  %v2129_v47 = vld [vmem:[#allocation4 + $0x388] sm:$0xff] }
 0x59f   :  { %2755 = vmatpush1.bf16.msra.mxu1 %v2412_v51  ;;  %2919 = vmatpush1.bf16.msra.mxu0 %v2414_v53  ;;  %v2470_v51 = vunpack.c.h.s8.bf16 %v2123_v7  ;;  %v2476_v53 = vunpack.c.l.s8.bf16 %v2129_v47 }
 0x5a0   :  { %2756 = vmatprep.subr.bf16.mxu1 %v2420_v42  ;;  %2920 = vmatprep.subr.bf16.mxu0 %v2422_v59  ;;  %v2478_v42 = vunpack.c.l.s8.bf16 %v2131_v30  ;;  %v2128_v59 = vld [vmem:[#allocation4 + $0x380] sm:$0xff] }
 0x5a1   :  { %v2482_v25 = vunpack.c.h.s8.bf16 %v2128_v59 }
 0x5a3   :  { %2757 = vmatpush1.bf16.msra.mxu1 %v2419_v0  ;;  %2921 = vmatpush1.bf16.msra.mxu0 %v2421_v12  ;;  %v2475_v0 = vunpack.c.l.s8.bf16 %v2128_v59  ;;  %v2477_v12 = vunpack.c.l.s8.bf16 %v2130_v61  ;;  %v2158_v59 = vld [vmem:[#allocation4 + $0x470] sm:$0xff] }
 0x5a4   :  { %2758 = vmatprep.subr.bf16.mxu1 %v2427_v2  ;;  %2922 = vmatprep.subr.bf16.mxu0 %v2429_v54  ;;  %v2483_v2 = vunpack.c.h.s8.bf16 %v2129_v47  ;;  %v2485_v54 = vunpack.c.h.s8.bf16 %v2131_v30  ;;  %v2159_v47 = vld [vmem:[#allocation4 + $0x478] sm:$0xff] }
 0x5a7   :  { %2759 = vmatpush1.bf16.msra.mxu1 %v2426_v9  ;;  %2923 = vmatpush1.bf16.msra.mxu0 %v2428_v6  ;;  %v4358_v9 = vpack.c.bf16 %v4330_v48, %v4330_v48  ;;  %v2484_v6 = vunpack.c.h.s8.bf16 %v2130_v61  ;;  %v2489_v48 = vunpack.c.l.s8.bf16 %v2135_v17  ;;  %v2165_v17 = vld [vmem:[#allocation4 + $0x4a8] sm:$0xff] }
 0x5a8   :  { %2760 = vmatprep.subr.bf16.mxu1 %v2434_v11  ;;  %2924 = vmatprep.subr.bf16.mxu0 %v2436_v14  ;;  %v2490_v11 = vunpack.c.l.s8.bf16 %v2136_v44  ;;  %v2492_v14 = vunpack.c.l.s8.bf16 %v2138_v55 }
 0x5ab   :  { %2761 = vmatpush1.bf16.msra.mxu1 %v2433_v29  ;;  %2925 = vmatpush1.bf16.msra.mxu0 %v2435_v28  ;;  %v2491_v29 = vunpack.c.l.s8.bf16 %v2137_v19  ;;  %v2497_v28 = vunpack.c.h.s8.bf16 %v2136_v44  ;;  %v2166_v44 = vld [vmem:[#allocation4 + $0x4b0] sm:$0xff] }
 0x5ac   :  { %2762 = vmatprep.subr.bf16.mxu1 %v2441_v46  ;;  %2926 = vmatprep.subr.bf16.mxu0 %v2443_v5  ;;  %v2499_v46 = vunpack.c.h.s8.bf16 %v2138_v55  ;;  %v2143_v5 = vld [vmem:[#allocation4 + $0x3f8] sm:$0xff] }
 0x5af   :  { %2763 = vmatpush1.bf16.msra.mxu1 %v2440_v31  ;;  %2927 = vmatpush1.bf16.msra.mxu0 %v2442_v34  ;;  %v2498_v31 = vunpack.c.h.s8.bf16 %v2137_v19  ;;  %v2504_v34 = vunpack.c.l.s8.bf16 %v2143_v5 }
 0x5b0   :  { %2764 = vmatprep.subr.bf16.mxu1 %v2448_v16  ;;  %2928 = vmatprep.subr.bf16.mxu0 %v2450_v24  ;;  %v2506_v16 = vunpack.c.l.s8.bf16 %v2145_v3  ;;  %v2142_v24 = vld [vmem:[#allocation4 + $0x3f0] sm:$0xff] }
 0x5b1   :  { %v2503_v26 = vunpack.c.l.s8.bf16 %v2142_v24  ;;  %v2510_v62 = vunpack.c.h.s8.bf16 %v2142_v24  ;;  %v2172_v24 = vld [vmem:[#allocation4 + $0x4e0] sm:$0xff] }
 0x5b3   :  { %2765 = vmatpush1.bf16.msra.mxu1 %v2447_v50  ;;  %2929 = vmatpush1.bf16.msra.mxu0 %v2449_v45  ;;  %v2505_v50 = vunpack.c.l.s8.bf16 %v2144_v18  ;;  %v2511_v45 = vunpack.c.h.s8.bf16 %v2143_v5  ;;  %v2173_v5 = vld [vmem:[#allocation4 + $0x4e8] sm:$0xff] }
 0x5b4   :  { %2766 = vmatprep.subr.bf16.mxu1 %v2455_v60  ;;  %2930 = vmatprep.subr.bf16.mxu0 %v2457_v20  ;;  %v2513_v60 = vunpack.c.h.s8.bf16 %v2145_v3  ;;  %v2150_v20 = vld [vmem:[#allocation4 + $0x430] sm:$0xff] }
 0x5b7   :  { %2767 = vmatpush1.bf16.msra.mxu1 %v2454_v35  ;;  %2931 = vmatpush1.bf16.msra.mxu0 %v2456_v21  ;;  %v2512_v35 = vunpack.c.h.s8.bf16 %v2144_v18  ;;  %v2518_v21 = vunpack.c.l.s8.bf16 %v2150_v20 }
 0x5b8   :  { %2768 = vmatprep.subr.bf16.mxu1 %v2462_v23  ;;  %2932 = vmatprep.subr.bf16.mxu0 %v2464_v36  ;;  %v2520_v23 = vunpack.c.l.s8.bf16 %v2152_v22  ;;  %v2149_v36 = vld [vmem:[#allocation4 + $0x428] sm:$0xff] }
 0x5b9   :  { %v2517_v7 = vunpack.c.l.s8.bf16 %v2149_v36  ;;  %v2524_v30 = vunpack.c.h.s8.bf16 %v2149_v36  ;;  %v2179_v36 = vld [vmem:[#allocation4 + $0x518] sm:$0xff] }
 0x5bb   :  { %2769 = vmatpush1.bf16.msra.mxu1 %v2461_v38  ;;  %2933 = vmatpush1.bf16.msra.mxu0 %v2463_v43  ;;  %v2519_v38 = vunpack.c.l.s8.bf16 %v2151_v37  ;;  %v2525_v43 = vunpack.c.h.s8.bf16 %v2150_v20  ;;  %v2180_v20 = vld [vmem:[#allocation4 + $0x520] sm:$0xff] }
 0x5bc   :  { %2770 = vmatprep.subr.bf16.mxu1 %v2469_v33  ;;  %2934 = vmatprep.subr.bf16.mxu0 %v2471_v39  ;;  %v2527_v33 = vunpack.c.h.s8.bf16 %v2152_v22  ;;  %v2157_v39 = vld [vmem:[#allocation4 + $0x468] sm:$0xff] }
 0x5bf   :  { %2771 = vmatpush1.bf16.msra.mxu1 %v2468_v40  ;;  %2935 = vmatpush1.bf16.msra.mxu0 %v2470_v51  ;;  %v2526_v40 = vunpack.c.h.s8.bf16 %v2151_v37  ;;  %v2532_v51 = vunpack.c.l.s8.bf16 %v2157_v39 }
 0x5c0   :  { %2781 = vmatprep.subr.bf16.mxu1 %v2476_v53  ;;  %2945 = vmatprep.subr.bf16.mxu0 %v2478_v42  ;;  %v2534_v53 = vunpack.c.l.s8.bf16 %v2159_v47  ;;  %v2156_v42 = vld [vmem:[#allocation4 + $0x460] sm:$0xff] }
 0x5c1   :  { %v2531_v61 = vunpack.c.l.s8.bf16 %v2156_v42  ;;  %v2538_v55 = vunpack.c.h.s8.bf16 %v2156_v42  ;;  %v2186_v42 = vld [vmem:[#allocation4 + $0x550] sm:$0xff] }
 0x5c2   :  { %2773 = vmatmul.mubr.bf16.vlgmr.msra.gmra.mrb[8].mxu1 %v4354_v63  ;;  %2937 = vmatmul.mubr.bf16.vlgmr.msra.gmra.mrb[20].mxu0 %v4354_v63 }
 0x5c3   :  { %2782 = vmatpush1.bf16.msra.mxu1 %v2475_v0  ;;  %2946 = vmatpush1.bf16.msra.mxu0 %v2477_v12  ;;  %v2533_v0 = vunpack.c.l.s8.bf16 %v2158_v59  ;;  %v2539_v12 = vunpack.c.h.s8.bf16 %v2157_v39  ;;  %v2187_v39 = vld [vmem:[#allocation4 + $0x558] sm:$0xff] }
 0x5c4   :  { %2783 = vmatprep.subr.bf16.mxu1 %v2483_v2  ;;  %2947 = vmatprep.subr.bf16.mxu0 %v2485_v54  ;;  %v2541_v2 = vunpack.c.h.s8.bf16 %v2159_v47  ;;  %v2164_v54 = vld [vmem:[#allocation4 + $0x4a0] sm:$0xff] }
 0x5c5   :  { %2813 = vmatprep.mubr.bf16.mxu1 %v4358_v9  ;;  %2977 = vmatprep.mubr.bf16.mxu0 %v4358_v9 }
 0x5c7   :  { %2784 = vmatpush1.bf16.msra.mxu1 %v2482_v25  ;;  %2948 = vmatpush1.bf16.msra.mxu0 %v2484_v6  ;;  %v2540_v25 = vunpack.c.h.s8.bf16 %v2158_v59  ;;  %v2546_v6 = vunpack.c.l.s8.bf16 %v2164_v54  ;;  %v4366_v59 = vpack.c.bf16 %v4328_v32, %v4328_v32 }
 0x5c8   :  { %2785 = vmatprep.subr.bf16.mxu1 %v2490_v11  ;;  %2949 = vmatprep.subr.bf16.mxu0 %v2492_v14  ;;  %v2548_v11 = vunpack.c.l.s8.bf16 %v2166_v44  ;;  %v2163_v14 = vld [vmem:[#allocation4 + $0x498] sm:$0xff] }
 0x5c9   :  { %v2545_v19 = vunpack.c.l.s8.bf16 %v2163_v14  ;;  %v2552_v3 = vunpack.c.h.s8.bf16 %v2163_v14  ;;  %v2191_v14 = vld [vmem:[#allocation4 + $0x578] sm:$0xff] }
 0x5cb   :  { %2786 = vmatpush1.bf16.msra.mxu1 %v2489_v48  ;;  %2950 = vmatpush1.bf16.msra.mxu0 %v2491_v29  ;;  %v2547_v48 = vunpack.c.l.s8.bf16 %v2165_v17  ;;  %v2553_v29 = vunpack.c.h.s8.bf16 %v2164_v54  ;;  %v2192_v54 = vld [vmem:[#allocation4 + $0x580] sm:$0xff] }
 0x5cc   :  { %2787 = vmatprep.subr.bf16.mxu1 %v2497_v28  ;;  %2951 = vmatprep.subr.bf16.mxu0 %v2499_v46  ;;  %v2555_v28 = vunpack.c.h.s8.bf16 %v2166_v44  ;;  %v2171_v46 = vld [vmem:[#allocation4 + $0x4d8] sm:$0xff]  ;;  %v2194_v44 = vld [vmem:[#allocation4 + $0x590] sm:$0xff] }
 0x5cf   :  { %2788 = vmatpush1.bf16.msra.mxu1 %v2496_v41  ;;  %2952 = vmatpush1.bf16.msra.mxu0 %v2498_v31  ;;  %v2554_v41 = vunpack.c.h.s8.bf16 %v2165_v17  ;;  %v2560_v31 = vunpack.c.l.s8.bf16 %v2171_v46  ;;  %v2193_v17 = vld [vmem:[#allocation4 + $0x588] sm:$0xff] }
 0x5d0   :  { %2789 = vmatprep.subr.bf16.mxu1 %v2504_v34  ;;  %2953 = vmatprep.subr.bf16.mxu0 %v2506_v16  ;;  %v2562_v34 = vunpack.c.l.s8.bf16 %v2173_v5  ;;  %v2170_v16 = vld [vmem:[#allocation4 + $0x4d0] sm:$0xff] }
 0x5d1   :  { %v2559_v18 = vunpack.c.l.s8.bf16 %v2170_v16  ;;  %v2566_v22 = vunpack.c.h.s8.bf16 %v2170_v16  ;;  %v2200_v16 = vld [vmem:[#allocation4 + $0x5c0] sm:$0xff] }
 0x5d3   :  { %2790 = vmatpush1.bf16.msra.mxu1 %v2503_v26  ;;  %2954 = vmatpush1.bf16.msra.mxu0 %v2505_v50  ;;  %v2561_v26 = vunpack.c.l.s8.bf16 %v2172_v24  ;;  %v2567_v50 = vunpack.c.h.s8.bf16 %v2171_v46  ;;  %v2201_v46 = vld [vmem:[#allocation4 + $0x5c8] sm:$0xff] }
 0x5d4   :  { %2791 = vmatprep.subr.bf16.mxu1 %v2511_v45  ;;  %2955 = vmatprep.subr.bf16.mxu0 %v2513_v60  ;;  %v2569_v45 = vunpack.c.h.s8.bf16 %v2173_v5  ;;  %v2178_v60 = vld [vmem:[#allocation4 + $0x510] sm:$0xff]  ;;  %v2608_v5 = vunpack.c.h.s8.bf16 %v2191_v14 }
 0x5d7   :  { %2792 = vmatpush1.bf16.msra.mxu1 %v2510_v62  ;;  %2956 = vmatpush1.bf16.msra.mxu0 %v2512_v35  ;;  %v2568_v62 = vunpack.c.h.s8.bf16 %v2172_v24  ;;  %v2574_v35 = vunpack.c.l.s8.bf16 %v2178_v60 }
 0x5d8   :  { %2793 = vmatprep.subr.bf16.mxu1 %v2518_v21  ;;  %2957 = vmatprep.subr.bf16.mxu0 %v2520_v23  ;;  %v2576_v21 = vunpack.c.l.s8.bf16 %v2180_v20  ;;  %v2177_v23 = vld [vmem:[#allocation4 + $0x508] sm:$0xff] }
 0x5d9   :  { %v2573_v37 = vunpack.c.l.s8.bf16 %v2177_v23  ;;  %v2580_v47 = vunpack.c.h.s8.bf16 %v2177_v23  ;;  %v2207_v23 = vld [vmem:[#allocation4 + $0x5f8] sm:$0xff] }
 0x5db   :  { %2794 = vmatpush1.bf16.msra.mxu1 %v2517_v7  ;;  %2958 = vmatpush1.bf16.msra.mxu0 %v2519_v38  ;;  %v2575_v7 = vunpack.c.l.s8.bf16 %v2179_v36  ;;  %v2581_v38 = vunpack.c.h.s8.bf16 %v2178_v60  ;;  %v2208_v60 = vld [vmem:[#allocation4 + $0x600] sm:$0xff] }
 0x5dc   :  { %2795 = vmatprep.subr.bf16.mxu1 %v2525_v43  ;;  %2959 = vmatprep.subr.bf16.mxu0 %v2527_v33  ;;  %v2583_v43 = vunpack.c.h.s8.bf16 %v2180_v20  ;;  %v2185_v33 = vld [vmem:[#allocation4 + $0x548] sm:$0xff] }
 0x5df   :  { %2796 = vmatpush1.bf16.msra.mxu1 %v2524_v30  ;;  %2960 = vmatpush1.bf16.msra.mxu0 %v2526_v40  ;;  %v2582_v30 = vunpack.c.h.s8.bf16 %v2179_v36  ;;  %v2588_v40 = vunpack.c.l.s8.bf16 %v2185_v33 }
 0x5e0   :  { %2797 = vmatprep.subr.bf16.mxu1 %v2532_v51  ;;  %2961 = vmatprep.subr.bf16.mxu0 %v2534_v53  ;;  %v2590_v51 = vunpack.c.l.s8.bf16 %v2187_v39  ;;  %v2184_v53 = vld [vmem:[#allocation4 + $0x540] sm:$0xff] }
 0x5e1   :  { %v2594_v32 = vunpack.c.h.s8.bf16 %v2184_v53 }
 0x5e3   :  { %2798 = vmatpush1.bf16.msra.mxu1 %v2531_v61  ;;  %2962 = vmatpush1.bf16.msra.mxu0 %v2533_v0  ;;  %v2587_v61 = vunpack.c.l.s8.bf16 %v2184_v53  ;;  %v2589_v0 = vunpack.c.l.s8.bf16 %v2186_v42  ;;  %v2214_v53 = vld [vmem:[#allocation4 + $0x630] sm:$0xff] }
 0x5e4   :  { %2799 = vmatprep.subr.bf16.mxu1 %v2539_v12  ;;  %2963 = vmatprep.subr.bf16.mxu0 %v2541_v2  ;;  %v2595_v12 = vunpack.c.h.s8.bf16 %v2185_v33  ;;  %v2597_v2 = vunpack.c.h.s8.bf16 %v2187_v39  ;;  %v2215_v33 = vld [vmem:[#allocation4 + $0x638] sm:$0xff] }
 0x5e7   :  { %2800 = vmatpush1.bf16.msra.mxu1 %v2538_v55  ;;  %2964 = vmatpush1.bf16.msra.mxu0 %v2540_v25  ;;  %v4370_v55 = vpack.c.bf16 %v4334_v52, %v4334_v52  ;;  %v2596_v25 = vunpack.c.h.s8.bf16 %v2186_v42  ;;  %v2601_v52 = vunpack.c.l.s8.bf16 %v2191_v14  ;;  %v2221_v14 = vld [vmem:[#allocation4 + $0x668] sm:$0xff] }
 0x5e8   :  { %2801 = vmatprep.subr.bf16.mxu1 %v2546_v6  ;;  %2965 = vmatprep.subr.bf16.mxu0 %v2548_v11  ;;  %v2602_v6 = vunpack.c.l.s8.bf16 %v2192_v54  ;;  %v2604_v11 = vunpack.c.l.s8.bf16 %v2194_v44 }
 0x5eb   :  { %2802 = vmatpush1.bf16.msra.mxu1 %v2545_v19  ;;  %2966 = vmatpush1.bf16.msra.mxu0 %v2547_v48  ;;  %v2603_v19 = vunpack.c.l.s8.bf16 %v2193_v17  ;;  %v2609_v48 = vunpack.c.h.s8.bf16 %v2192_v54  ;;  %v2222_v54 = vld [vmem:[#allocation4 + $0x670] sm:$0xff] }
 0x5ec   :  { %2803 = vmatprep.subr.bf16.mxu1 %v2553_v29  ;;  %2967 = vmatprep.subr.bf16.mxu0 %v2555_v28  ;;  %v2611_v29 = vunpack.c.h.s8.bf16 %v2194_v44  ;;  %v2199_v28 = vld [vmem:[#allocation4 + $0x5b8] sm:$0xff] }
 0x5ef   :  { %2804 = vmatpush1.bf16.msra.mxu1 %v2552_v3  ;;  %2968 = vmatpush1.bf16.msra.mxu0 %v2554_v41  ;;  %v2610_v3 = vunpack.c.h.s8.bf16 %v2193_v17  ;;  %v2616_v41 = vunpack.c.l.s8.bf16 %v2199_v28 }
 0x5f0   :  { %2805 = vmatprep.subr.bf16.mxu1 %v2560_v31  ;;  %2969 = vmatprep.subr.bf16.mxu0 %v2562_v34  ;;  %v2618_v31 = vunpack.c.l.s8.bf16 %v2201_v46  ;;  %v2198_v34 = vld [vmem:[#allocation4 + $0x5b0] sm:$0xff] }
 0x5f1   :  { %v2615_v24 = vunpack.c.l.s8.bf16 %v2198_v34  ;;  %v2622_v20 = vunpack.c.h.s8.bf16 %v2198_v34  ;;  %v2228_v34 = vld [vmem:[#allocation4 + $0x6a0] sm:$0xff] }
 0x5f3   :  { %2806 = vmatpush1.bf16.msra.mxu1 %v2559_v18  ;;  %2970 = vmatpush1.bf16.msra.mxu0 %v2561_v26  ;;  %v2617_v18 = vunpack.c.l.s8.bf16 %v2200_v16  ;;  %v2623_v26 = vunpack.c.h.s8.bf16 %v2199_v28  ;;  %v2229_v28 = vld [vmem:[#allocation4 + $0x6a8] sm:$0xff] }
 0x5f4   :  { %2807 = vmatprep.subr.bf16.mxu1 %v2567_v50  ;;  %2971 = vmatprep.subr.bf16.mxu0 %v2569_v45  ;;  %v2625_v50 = vunpack.c.h.s8.bf16 %v2201_v46  ;;  %v2206_v45 = vld [vmem:[#allocation4 + $0x5f0] sm:$0xff] }
 0x5f7   :  { %2808 = vmatpush1.bf16.msra.mxu1 %v2566_v22  ;;  %2972 = vmatpush1.bf16.msra.mxu0 %v2568_v62  ;;  %v2624_v22 = vunpack.c.h.s8.bf16 %v2200_v16  ;;  %v2630_v62 = vunpack.c.l.s8.bf16 %v2206_v45 }
 0x5f8   :  { %2809 = vmatprep.subr.bf16.mxu1 %v2574_v35  ;;  %2973 = vmatprep.subr.bf16.mxu0 %v2576_v21  ;;  %v2632_v35 = vunpack.c.l.s8.bf16 %v2208_v60  ;;  %v2205_v21 = vld [vmem:[#allocation4 + $0x5e8] sm:$0xff] }
 0x5f9   :  { %v2629_v36 = vunpack.c.l.s8.bf16 %v2205_v21  ;;  %v2636_v39 = vunpack.c.h.s8.bf16 %v2205_v21  ;;  %v2235_v21 = vld [vmem:[#allocation4 + $0x6d8] sm:$0xff] }
 0x5fb   :  { %2810 = vmatpush1.bf16.msra.mxu1 %v2573_v37  ;;  %2974 = vmatpush1.bf16.msra.mxu0 %v2575_v7  ;;  %v2631_v37 = vunpack.c.l.s8.bf16 %v2207_v23  ;;  %v2637_v7 = vunpack.c.h.s8.bf16 %v2206_v45  ;;  %v2236_v45 = vld [vmem:[#allocation4 + $0x6e0] sm:$0xff] }
 0x5fc   :  { %2811 = vmatprep.subr.bf16.mxu1 %v2581_v38  ;;  %2975 = vmatprep.subr.bf16.mxu0 %v2583_v43  ;;  %v2639_v38 = vunpack.c.h.s8.bf16 %v2208_v60  ;;  %v2213_v43 = vld [vmem:[#allocation4 + $0x628] sm:$0xff] }
 0x5ff   :  { %2812 = vmatpush1.bf16.msra.mxu1 %v2580_v47  ;;  %2976 = vmatpush1.bf16.msra.mxu0 %v2582_v30  ;;  %v2638_v47 = vunpack.c.h.s8.bf16 %v2207_v23  ;;  %v2644_v30 = vunpack.c.l.s8.bf16 %v2213_v43 }
 0x600   :  { %2822 = vmatprep.subr.bf16.mxu1 %v2588_v40  ;;  %2986 = vmatprep.subr.bf16.mxu0 %v2590_v51  ;;  %v2646_v40 = vunpack.c.l.s8.bf16 %v2215_v33  ;;  %v2212_v51 = vld [vmem:[#allocation4 + $0x620] sm:$0xff] }
 0x601   :  { %v2643_v42 = vunpack.c.l.s8.bf16 %v2212_v51  ;;  %v2650_v44 = vunpack.c.h.s8.bf16 %v2212_v51  ;;  %v2022_v51 = vld [vmem:[#allocation4 + $0x30] sm:$0xff] }
 0x602   :  { %2814 = vmatmul.mubr.bf16.vlgmr.msra.gmra.mrb[8].mxu1 %v4366_v59  ;;  %2978 = vmatmul.mubr.bf16.vlgmr.msra.gmra.mrb[20].mxu0 %v4366_v59 }
 0x603   :  { %2823 = vmatpush1.bf16.msra.mxu1 %v2587_v61  ;;  %2987 = vmatpush1.bf16.msra.mxu0 %v2589_v0  ;;  %v2645_v61 = vunpack.c.l.s8.bf16 %v2214_v53  ;;  %v2651_v0 = vunpack.c.h.s8.bf16 %v2213_v43  ;;  %v2050_v43 = vld [vmem:[#allocation4 + $0x110] sm:$0xff] }
 0x604   :  { %2824 = vmatprep.subr.bf16.mxu1 %v2595_v12  ;;  %2988 = vmatprep.subr.bf16.mxu0 %v2597_v2  ;;  %v2653_v12 = vunpack.c.h.s8.bf16 %v2215_v33  ;;  %v2220_v2 = vld [vmem:[#allocation4 + $0x660] sm:$0xff] }
 0x605   :  { %2854 = vmatprep.mubr.bf16.mxu1 %v4370_v55  ;;  %3018 = vmatprep.mubr.bf16.mxu0 %v4370_v55 }
 0x607   :  { %2825 = vmatpush1.bf16.msra.mxu1 %v2594_v32  ;;  %2989 = vmatpush1.bf16.msra.mxu0 %v2596_v25  ;;  %v2652_v32 = vunpack.c.h.s8.bf16 %v2214_v53  ;;  %v2658_v25 = vunpack.c.l.s8.bf16 %v2220_v2  ;;  %v4378_v53 = vpack.c.bf16 %v4332_v49, %v4332_v49 }
 0x608   :  { %2826 = vmatprep.subr.bf16.mxu1 %v2602_v6  ;;  %2990 = vmatprep.subr.bf16.mxu0 %v2604_v11  ;;  %v2660_v6 = vunpack.c.l.s8.bf16 %v2222_v54  ;;  %v2219_v11 = vld [vmem:[#allocation4 + $0x658] sm:$0xff] }
 0x609   :  { %v2657_v17 = vunpack.c.l.s8.bf16 %v2219_v11  ;;  %v2664_v46 = vunpack.c.h.s8.bf16 %v2219_v11  ;;  %v2029_v11 = vld [vmem:[#allocation4 + $0x68] sm:$0xff] }
 0x60b   :  { %2827 = vmatpush1.bf16.msra.mxu1 %v2601_v52  ;;  %2991 = vmatpush1.bf16.msra.mxu0 %v2603_v19  ;;  %v2659_v52 = vunpack.c.l.s8.bf16 %v2221_v14  ;;  %v2665_v19 = vunpack.c.h.s8.bf16 %v2220_v2  ;;  %v2028_v2 = vld [vmem:[#allocation4 + $0x60] sm:$0xff] }
 0x60c   :  { %2828 = vmatprep.subr.bf16.mxu1 %v2609_v48  ;;  %2992 = vmatprep.subr.bf16.mxu0 %v2611_v29  ;;  %v2667_v48 = vunpack.c.h.s8.bf16 %v2222_v54  ;;  %v2227_v29 = vld [vmem:[#allocation4 + $0x698] sm:$0xff]  ;;  %v2057_v54 = vld [vmem:[#allocation4 + $0x148] sm:$0xff]  ;;  %v2270_v49 = vunpack.c.l.s8.bf16 %v2028_v2 }
 0x60f   :  { %2829 = vmatpush1.bf16.msra.mxu1 %v2608_v5  ;;  %2993 = vmatpush1.bf16.msra.mxu0 %v2610_v3  ;;  %v2666_v5 = vunpack.c.h.s8.bf16 %v2221_v14  ;;  %v2672_v3 = vunpack.c.l.s8.bf16 %v2227_v29 }
 0x610   :  { %2830 = vmatprep.subr.bf16.mxu1 %v2616_v41  ;;  %2994 = vmatprep.subr.bf16.mxu0 %v2618_v31  ;;  %v2674_v41 = vunpack.c.l.s8.bf16 %v2229_v28  ;;  %v2226_v31 = vld [vmem:[#allocation4 + $0x690] sm:$0xff] }
 0x611   :  { %v2671_v16 = vunpack.c.l.s8.bf16 %v2226_v31  ;;  %v2678_v60 = vunpack.c.h.s8.bf16 %v2226_v31 }
 0x613   :  { %2831 = vmatpush1.bf16.msra.mxu1 %v2615_v24  ;;  %2995 = vmatpush1.bf16.msra.mxu0 %v2617_v18  ;;  %v2673_v24 = vunpack.c.l.s8.bf16 %v2228_v34  ;;  %v2679_v18 = vunpack.c.h.s8.bf16 %v2227_v29  ;;  %v2064_v29 = vld [vmem:[#allocation4 + $0x180] sm:$0xff] }
 0x614   :  { %2832 = vmatprep.subr.bf16.mxu1 %v2623_v26  ;;  %2996 = vmatprep.subr.bf16.mxu0 %v2625_v50  ;;  %v2681_v26 = vunpack.c.h.s8.bf16 %v2229_v28  ;;  %v2234_v50 = vld [vmem:[#allocation4 + $0x6d0] sm:$0xff] }
 0x617   :  { %2833 = vmatpush1.bf16.msra.mxu1 %v2622_v20  ;;  %2997 = vmatpush1.bf16.msra.mxu0 %v2624_v22  ;;  %v2680_v20 = vunpack.c.h.s8.bf16 %v2228_v34  ;;  %v2686_v22 = vunpack.c.l.s8.bf16 %v2234_v50 }
 0x618   :  { %2834 = vmatprep.subr.bf16.mxu1 %v2630_v62  ;;  %2998 = vmatprep.subr.bf16.mxu0 %v2632_v35  ;;  %v2688_v62 = vunpack.c.l.s8.bf16 %v2236_v45  ;;  %v2233_v35 = vld [vmem:[#allocation4 + $0x6c8] sm:$0xff] }
 0x619   :  { %v2685_v23 = vunpack.c.l.s8.bf16 %v2233_v35  ;;  %v2692_v33 = vunpack.c.h.s8.bf16 %v2233_v35 }
 0x61b   :  { %2835 = vmatpush1.bf16.msra.mxu1 %v2629_v36  ;;  %2999 = vmatpush1.bf16.msra.mxu0 %v2631_v37  ;;  %v2687_v36 = vunpack.c.l.s8.bf16 %v2235_v21  ;;  %v2693_v37 = vunpack.c.h.s8.bf16 %v2234_v50 }
 0x61c   :  { %2836 = vmatprep.subr.bf16.mxu1 %v2637_v7  ;;  %3000 = vmatprep.subr.bf16.mxu0 %v2639_v38  ;;  %v2695_v7 = vunpack.c.h.s8.bf16 %v2236_v45  ;;  %v2021_v38 = vld [vmem:[#allocation4 + $0x28] sm:$0xff] }
 0x61f   :  { %2837 = vmatpush1.bf16.msra.mxu1 %v2636_v39  ;;  %3001 = vmatpush1.bf16.msra.mxu0 %v2638_v47  ;;  %v2694_v39 = vunpack.c.h.s8.bf16 %v2235_v21  ;;  %v2256_v47 = vunpack.c.l.s8.bf16 %v2021_v38 }
 0x620   :  { %2838 = vmatprep.subr.bf16.mxu1 %v2644_v30  ;;  %3002 = vmatprep.subr.bf16.mxu0 %v2646_v40  ;;  %v2020_v30 = vld [vmem:[#allocation4 + $0x20] sm:$0xff]  ;;  %v2313_v40 = vunpack.c.l.s8.bf16 %v2050_v43 }
 0x623   :  { %2839 = vmatpush1.bf16.msra.mxu1 %v2643_v42  ;;  %3003 = vmatpush1.bf16.msra.mxu0 %v2645_v61  ;;  %v2255_v42 = vunpack.c.l.s8.bf16 %v2020_v30  ;;  %v2257_v61 = vunpack.c.l.s8.bf16 %v2022_v51 }
 0x624   :  { %2840 = vmatprep.subr.bf16.mxu1 %v2651_v0  ;;  %3004 = vmatprep.subr.bf16.mxu0 %v2653_v12  ;;  %v2263_v0 = vunpack.c.h.s8.bf16 %v2021_v38  ;;  %v2320_v12 = vunpack.c.h.s8.bf16 %v2050_v43 }
 0x627   :  { %2841 = vmatpush1.bf16.msra.mxu1 %v2650_v44  ;;  %3005 = vmatpush1.bf16.msra.mxu0 %v2652_v32  ;;  %v2262_v44 = vunpack.c.h.s8.bf16 %v2020_v30  ;;  %v2264_v32 = vunpack.c.h.s8.bf16 %v2022_v51  ;;  %v2078_v30 = vld [vmem:[#allocation4 + $0x1f0] sm:$0xff] }
 0x628   :  { %2842 = vmatprep.subr.bf16.mxu1 %v2658_v25  ;;  %3006 = vmatprep.subr.bf16.mxu0 %v2660_v6  ;;  %v2027_v25 = vld [vmem:[#allocation4 + $0x58] sm:$0xff]  ;;  %v2327_v6 = vunpack.c.l.s8.bf16 %v2057_v54  ;;  %v2369_v51 = vunpack.c.l.s8.bf16 %v2078_v30 }
 0x629   :  { %v2269_v14 = vunpack.c.l.s8.bf16 %v2027_v25  ;;  %v2276_v28 = vunpack.c.h.s8.bf16 %v2027_v25  ;;  %v2085_v25 = vld [vmem:[#allocation4 + $0x228] sm:$0xff] }
 0x62b   :  { %2843 = vmatpush1.bf16.msra.mxu1 %v2657_v17  ;;  %3007 = vmatpush1.bf16.msra.mxu0 %v2659_v52  ;;  %v2271_v17 = vunpack.c.l.s8.bf16 %v2029_v11  ;;  %v2277_v52 = vunpack.c.h.s8.bf16 %v2028_v2 }
 0x62c   :  { %2844 = vmatprep.subr.bf16.mxu1 %v2665_v19  ;;  %3008 = vmatprep.subr.bf16.mxu0 %v2667_v48  ;;  %v2334_v19 = vunpack.c.h.s8.bf16 %v2057_v54  ;;  %v2035_v48 = vld [vmem:[#allocation4 + $0x98] sm:$0xff]  ;;  %v2376_v54 = vunpack.c.h.s8.bf16 %v2078_v30 }
 0x62f   :  { %2845 = vmatpush1.bf16.msra.mxu1 %v2664_v46  ;;  %3009 = vmatpush1.bf16.msra.mxu0 %v2666_v5  ;;  %v2278_v46 = vunpack.c.h.s8.bf16 %v2029_v11  ;;  %v2284_v5 = vunpack.c.l.s8.bf16 %v2035_v48  ;;  %v2383_v11 = vunpack.c.l.s8.bf16 %v2085_v25 }
 0x630   :  { %2846 = vmatprep.subr.bf16.mxu1 %v2672_v3  ;;  %3010 = vmatprep.subr.bf16.mxu0 %v2674_v41  ;;  %v2034_v3 = vld [vmem:[#allocation4 + $0x90] sm:$0xff]  ;;  %v2341_v41 = vunpack.c.l.s8.bf16 %v2064_v29 }
 0x631   :  { %v2283_v31 = vunpack.c.l.s8.bf16 %v2034_v3  ;;  %v2290_v50 = vunpack.c.h.s8.bf16 %v2034_v3  ;;  %v2092_v3 = vld [vmem:[#allocation4 + $0x260] sm:$0xff] }
 0x633   :  { %2847 = vmatpush1.bf16.msra.mxu1 %v2671_v16  ;;  %3011 = vmatpush1.bf16.msra.mxu0 %v2673_v24  ;;  %v2291_v16 = vunpack.c.h.s8.bf16 %v2035_v48  ;;  %v2348_v24 = vunpack.c.h.s8.bf16 %v2064_v29  ;;  %v2390_v29 = vunpack.c.h.s8.bf16 %v2085_v25 }
 0x634   :  { %2848 = vmatprep.subr.bf16.mxu1 %v2679_v18  ;;  %3012 = vmatprep.subr.bf16.mxu0 %v2681_v26  ;;  %v2042_v18 = vld [vmem:[#allocation4 + $0xd0] sm:$0xff]  ;;  %v2071_v26 = vld [vmem:[#allocation4 + $0x1b8] sm:$0xff] }
 0x637   :  { %2849 = vmatpush1.bf16.msra.mxu1 %v2678_v60  ;;  %3013 = vmatpush1.bf16.msra.mxu0 %v2680_v20  ;;  %v2298_v60 = vunpack.c.l.s8.bf16 %v2042_v18  ;;  %v2041_v20 = vld [vmem:[#allocation4 + $0xc8] sm:$0xff] }
 0x638   :  { %2850 = vmatprep.subr.bf16.mxu1 %v2686_v22  ;;  %3014 = vmatprep.subr.bf16.mxu0 %v2688_v62  ;;  %v2355_v22 = vunpack.c.l.s8.bf16 %v2071_v26  ;;  %v2043_v62 = vld [vmem:[#allocation4 + $0xd8] sm:$0xff]  ;;  %v2297_v35 = vunpack.c.l.s8.bf16 %v2041_v20  ;;  %v2304_v38 = vunpack.c.h.s8.bf16 %v2041_v20 }
 0x639   :  { %v2299_v21 = vunpack.c.l.s8.bf16 %v2043_v62  ;;  %v2306_v43 = vunpack.c.h.s8.bf16 %v2043_v62  ;;  %v2099_v20 = vld [vmem:[#allocation4 + $0x298] sm:$0xff] }
 0x63a   :  { %v2411_v62 = vunpack.c.l.s8.bf16 %v2099_v20 }
 0x63b   :  { %2851 = vmatpush1.bf16.msra.mxu1 %v2685_v23  ;;  %3015 = vmatpush1.bf16.msra.mxu0 %v2687_v36  ;;  %v2305_v23 = vunpack.c.h.s8.bf16 %v2042_v18  ;;  %v2362_v36 = vunpack.c.h.s8.bf16 %v2071_v26  ;;  %v2404_v26 = vunpack.c.h.s8.bf16 %v2092_v3 }
 0x63c   :  { %2852 = vmatprep.subr.bf16.mxu1 %v2693_v37  ;;  %3016 = vmatprep.subr.bf16.mxu0 %v2695_v7  ;;  %v2049_v37 = vld [vmem:[#allocation4 + $0x108] sm:$0xff]  ;;  %v2106_v7 = vld [vmem:[#allocation4 + $0x2d0] sm:$0xff] }
 0x63f   :  { %2853 = vmatpush1.bf16.msra.mxu1 %v2692_v33  ;;  %3017 = vmatpush1.bf16.msra.mxu0 %v2694_v39  ;;  %v2312_v33 = vunpack.c.l.s8.bf16 %v2049_v37  ;;  %v2048_v39 = vld [vmem:[#allocation4 + $0x100] sm:$0xff] }
 0x640   :  { %3027 = vmatprep.subr.bf16.mxu1 %v2256_v47  ;;  %3484 = vmatprep.subr.bf16.mxu0 %v2313_v40  ;;  %v2425_v47 = vunpack.c.l.s8.bf16 %v2106_v7  ;;  %v2311_v40 = vunpack.c.l.s8.bf16 %v2048_v39  ;;  %v2318_v2 = vunpack.c.h.s8.bf16 %v2048_v39  ;;  %v2134_v39 = vld [vmem:[#allocation4 + $0x3b0] sm:$0xff] }
 0x641   :  { %v2481_v30 = vunpack.c.l.s8.bf16 %v2134_v39 }
 0x642   :  { %2855 = vmatmul.mubr.bf16.vlgmr.msra.gmra.mrb[8].mxu1 %v4378_v53  ;;  %3019 = vmatmul.mubr.bf16.vlgmr.msra.gmra.mrb[20].mxu0 %v4378_v53 }
 0x643   :  { %3028 = vmatpush1.bf16.msra.mxu1 %v2255_v42  ;;  %3485 = vmatpush3.bf16.msra.mxu0 %v2257_v61  ;;  %v2319_v42 = vunpack.c.h.s8.bf16 %v2049_v37  ;;  %v2432_v61 = vunpack.c.h.s8.bf16 %v2106_v7  ;;  %v2418_v7 = vunpack.c.h.s8.bf16 %v2099_v20 }
 0x644   :  { %3029 = vmatprep.subr.bf16.mxu1 %v2263_v0  ;;  %3486 = vmatprep.subr.bf16.mxu0 %v2320_v12  ;;  %v2056_v0 = vld [vmem:[#allocation4 + $0x140] sm:$0xff]  ;;  %v2113_v12 = vld [vmem:[#allocation4 + $0x308] sm:$0xff] }
 0x645   :  { %3059 = vmatprep.mubr.bf16.mxu1 %v4336_v27  ;;  %3223 = vmatprep.mubr.bf16.mxu0 %v4336_v27  ;;  %v2036_v27 = vld [vmem:[#allocation4 + $0xa0] sm:$0xff] }
 0x646   :  { %v2285_v34 = vunpack.c.l.s8.bf16 %v2036_v27  ;;  %v2292_v45 = vunpack.c.h.s8.bf16 %v2036_v27  ;;  %v2397_v27 = vunpack.c.l.s8.bf16 %v2092_v3 }
 0x647   :  { %3030 = vmatpush1.bf16.msra.mxu1 %v2262_v44  ;;  %3487 = vmatpush3.bf16.msra.mxu0 %v2264_v32  ;;  %v2326_v44 = vunpack.c.l.s8.bf16 %v2056_v0  ;;  %v2055_v32 = vld [vmem:[#allocation4 + $0x138] sm:$0xff] }
 0x648   :  { %3031 = vmatprep.subr.bf16.mxu1 %v2270_v49  ;;  %3488 = vmatprep.subr.bf16.mxu0 %v2327_v6  ;;  %v2439_v49 = vunpack.c.l.s8.bf16 %v2113_v12  ;;  %v2325_v6 = vunpack.c.l.s8.bf16 %v2055_v32  ;;  %v2332_v48 = vunpack.c.h.s8.bf16 %v2055_v32  ;;  %v2141_v32 = vld [vmem:[#allocation4 + $0x3e8] sm:$0xff] }
 0x64b   :  { %3032 = vmatpush1.bf16.msra.mxu1 %v2269_v14  ;;  %3489 = vmatpush3.bf16.msra.mxu0 %v2271_v17  ;;  %v2333_v14 = vunpack.c.h.s8.bf16 %v2056_v0  ;;  %v2446_v17 = vunpack.c.h.s8.bf16 %v2113_v12  ;;  %v2488_v12 = vunpack.c.h.s8.bf16 %v2134_v39 }
 0x64c   :  { %3033 = vmatprep.subr.bf16.mxu1 %v2277_v52  ;;  %3490 = vmatprep.subr.bf16.mxu0 %v2334_v19  ;;  %v2063_v52 = vld [vmem:[#allocation4 + $0x178] sm:$0xff]  ;;  %v2120_v19 = vld [vmem:[#allocation4 + $0x340] sm:$0xff] }
 0x64f   :  { %3034 = vmatpush1.bf16.msra.mxu1 %v2276_v28  ;;  %3491 = vmatpush3.bf16.msra.mxu0 %v2278_v46  ;;  %v2340_v28 = vunpack.c.l.s8.bf16 %v2063_v52  ;;  %v2062_v46 = vld [vmem:[#allocation4 + $0x170] sm:$0xff] }
 0x650   :  { %3035 = vmatprep.subr.bf16.mxu1 %v2284_v5  ;;  %3492 = vmatprep.subr.bf16.mxu0 %v2341_v41  ;;  %v2453_v5 = vunpack.c.l.s8.bf16 %v2120_v19  ;;  %v2339_v41 = vunpack.c.l.s8.bf16 %v2062_v46  ;;  %v2346_v18 = vunpack.c.h.s8.bf16 %v2062_v46 }
 0x653   :  { %3036 = vmatpush1.bf16.msra.mxu1 %v2283_v31  ;;  %3493 = vmatpush3.bf16.msra.mxu0 %v2285_v34  ;;  %v2347_v31 = vunpack.c.h.s8.bf16 %v2063_v52  ;;  %v2460_v34 = vunpack.c.h.s8.bf16 %v2120_v19  ;;  %v2502_v52 = vunpack.c.h.s8.bf16 %v2141_v32 }
 0x654   :  { %3037 = vmatprep.subr.bf16.mxu1 %v2291_v16  ;;  %3494 = vmatprep.subr.bf16.mxu0 %v2348_v24  ;;  %v2070_v16 = vld [vmem:[#allocation4 + $0x1b0] sm:$0xff]  ;;  %v2127_v24 = vld [vmem:[#allocation4 + $0x378] sm:$0xff] }
 0x657   :  { %3038 = vmatpush1.bf16.msra.mxu1 %v2290_v50  ;;  %3495 = vmatpush3.bf16.msra.mxu0 %v2292_v45  ;;  %v2354_v50 = vunpack.c.l.s8.bf16 %v2070_v16  ;;  %v2069_v45 = vld [vmem:[#allocation4 + $0x1a8] sm:$0xff] }
 0x658   :  { %3039 = vmatprep.subr.bf16.mxu1 %v2298_v60  ;;  %3496 = vmatprep.subr.bf16.mxu0 %v2355_v22  ;;  %v2467_v60 = vunpack.c.l.s8.bf16 %v2127_v24  ;;  %v2353_v22 = vunpack.c.l.s8.bf16 %v2069_v45  ;;  %v2360_v37 = vunpack.c.h.s8.bf16 %v2069_v45 }
 0x65b   :  { %3040 = vmatpush1.bf16.msra.mxu1 %v2297_v35  ;;  %3497 = vmatpush3.bf16.msra.mxu0 %v2299_v21  ;;  %v2361_v35 = vunpack.c.h.s8.bf16 %v2070_v16  ;;  %v2474_v21 = vunpack.c.h.s8.bf16 %v2127_v24  ;;  %v2097_v24 = vld [vmem:[#allocation4 + $0x288] sm:$0xff] }
 0x65c   :  { %3041 = vmatprep.subr.bf16.mxu1 %v2305_v23  ;;  %3498 = vmatprep.subr.bf16.mxu0 %v2362_v36  ;;  %v2077_v23 = vld [vmem:[#allocation4 + $0x1e8] sm:$0xff]  ;;  %v2162_v36 = vld [vmem:[#allocation4 + $0x490] sm:$0xff] }
 0x65f   :  { %3042 = vmatpush1.bf16.msra.mxu1 %v2304_v38  ;;  %3499 = vmatpush3.bf16.msra.mxu0 %v2306_v43  ;;  %v2368_v38 = vunpack.c.l.s8.bf16 %v2077_v23  ;;  %v2076_v43 = vld [vmem:[#allocation4 + $0x1e0] sm:$0xff] }
 0x660   :  { %3043 = vmatprep.subr.bf16.mxu1 %v2312_v33  ;;  %3506 = vmatprep.subr.bf16.mxu0 %v2425_v47  ;;  %v2537_v33 = vunpack.c.l.s8.bf16 %v2162_v36  ;;  %v2367_v47 = vunpack.c.l.s8.bf16 %v2076_v43  ;;  %v2374_v0 = vunpack.c.h.s8.bf16 %v2076_v43 }
 0x662   :  { %3224 = vmatmul.mubr.bf16.vlgmr.msra.gmra.mrb[24].mxu0 %v4342_v1 }
 0x663   :  { %3044 = vmatpush1.bf16.msra.mxu1 %v2311_v40  ;;  %3507 = vmatpush3.bf16.msra.mxu0 %v2369_v51  ;;  %v2375_v40 = vunpack.c.h.s8.bf16 %v2077_v23  ;;  %v2544_v51 = vunpack.c.h.s8.bf16 %v2162_v36  ;;  %v2104_v36 = vld [vmem:[#allocation4 + $0x2c0] sm:$0xff] }
 0x664   :  { %3045 = vmatprep.subr.bf16.mxu1 %v2319_v42  ;;  %3508 = vmatprep.subr.bf16.mxu0 %v2432_v61  ;;  %v2084_v42 = vld [vmem:[#allocation4 + $0x220] sm:$0xff]  ;;  %v2169_v61 = vld [vmem:[#allocation4 + $0x4c8] sm:$0xff] }
 0x665   :  { %3263 = vmatprep.mubr.bf16.mxu0 %v4346_v10  ;;  %v2389_v25 = vunpack.c.h.s8.bf16 %v2084_v42 }
 0x667   :  { %3046 = vmatpush1.bf16.msra.mxu1 %v2318_v2  ;;  %3509 = vmatpush3.bf16.msra.mxu0 %v2376_v54  ;;  %v2382_v2 = vunpack.c.l.s8.bf16 %v2084_v42  ;;  %v2083_v54 = vld [vmem:[#allocation4 + $0x218] sm:$0xff] }
 0x668   :  { %3047 = vmatprep.subr.bf16.mxu1 %v2326_v44  ;;  %3510 = vmatprep.subr.bf16.mxu0 %v2439_v49  ;;  %v2551_v44 = vunpack.c.l.s8.bf16 %v2169_v61  ;;  %v2381_v49 = vunpack.c.l.s8.bf16 %v2083_v54 }
 0x66b   :  { %3048 = vmatpush1.bf16.msra.mxu1 %v2325_v6  ;;  %3511 = vmatpush3.bf16.msra.mxu0 %v2383_v11  ;;  %v2558_v6 = vunpack.c.h.s8.bf16 %v2169_v61  ;;  %v2091_v11 = vld [vmem:[#allocation4 + $0x258] sm:$0xff] }
 0x66c   :  { %3049 = vmatprep.subr.bf16.mxu1 %v2333_v14  ;;  %3512 = vmatprep.subr.bf16.mxu0 %v2446_v17  ;;  %v2176_v14 = vld [vmem:[#allocation4 + $0x500] sm:$0xff]  ;;  %v2388_v17 = vunpack.c.h.s8.bf16 %v2083_v54  ;;  %v2396_v19 = vunpack.c.l.s8.bf16 %v2091_v11  ;;  %v2111_v61 = vld [vmem:[#allocation4 + $0x2f8] sm:$0xff] }
 0x66d   :  { %v2572_v3 = vunpack.c.h.s8.bf16 %v2176_v14 }
 0x66f   :  { %3050 = vmatpush1.bf16.msra.mxu1 %v2332_v48  ;;  %3513 = vmatpush3.bf16.msra.mxu0 %v2390_v29  ;;  %v2090_v48 = vld [vmem:[#allocation4 + $0x250] sm:$0xff]  ;;  %v2148_v29 = vld [vmem:[#allocation4 + $0x420] sm:$0xff] }
 0x670   :  { %3051 = vmatprep.subr.bf16.mxu1 %v2340_v28  ;;  %3514 = vmatprep.subr.bf16.mxu0 %v2453_v5  ;;  %v2395_v28 = vunpack.c.l.s8.bf16 %v2090_v48  ;;  %v2509_v46 = vunpack.c.l.s8.bf16 %v2148_v29  ;;  %v2403_v5 = vunpack.c.h.s8.bf16 %v2091_v11 }
 0x673   :  { %3052 = vmatpush1.bf16.msra.mxu1 %v2339_v41  ;;  %3515 = vmatpush3.bf16.msra.mxu0 %v2397_v27  ;;  %v2098_v41 = vld [vmem:[#allocation4 + $0x290] sm:$0xff]  ;;  %v2183_v27 = vld [vmem:[#allocation4 + $0x538] sm:$0xff] }
 0x674   :  { %3053 = vmatprep.subr.bf16.mxu1 %v2347_v31  ;;  %3516 = vmatprep.subr.bf16.mxu0 %v2460_v34  ;;  %v2402_v31 = vunpack.c.h.s8.bf16 %v2090_v48  ;;  %v2516_v34 = vunpack.c.h.s8.bf16 %v2148_v29  ;;  %v2410_v16 = vunpack.c.l.s8.bf16 %v2098_v41  ;;  %v2586_v20 = vunpack.c.h.s8.bf16 %v2183_v27 }
 0x677   :  { %3054 = vmatpush1.bf16.msra.mxu1 %v2346_v18  ;;  %3517 = vmatpush3.bf16.msra.mxu0 %v2404_v26  ;;  %v2579_v18 = vunpack.c.l.s8.bf16 %v2183_v27  ;;  %v2155_v26 = vld [vmem:[#allocation4 + $0x458] sm:$0xff]  ;;  %v2125_v27 = vld [vmem:[#allocation4 + $0x368] sm:$0xff] }
 0x678   :  { %3055 = vmatprep.subr.bf16.mxu1 %v2354_v50  ;;  %3518 = vmatprep.subr.bf16.mxu0 %v2467_v60  ;;  %v2409_v50 = vunpack.c.l.s8.bf16 %v2097_v24  ;;  %v2523_v45 = vunpack.c.l.s8.bf16 %v2155_v26  ;;  %v2417_v60 = vunpack.c.h.s8.bf16 %v2098_v41 }
 0x67b   :  { %3056 = vmatpush1.bf16.msra.mxu1 %v2353_v22  ;;  %3519 = vmatpush3.bf16.msra.mxu0 %v2411_v62  ;;  %v2105_v22 = vld [vmem:[#allocation4 + $0x2c8] sm:$0xff]  ;;  %v2218_v62 = vld [vmem:[#allocation4 + $0x650] sm:$0xff] }
 0x67c   :  { %3057 = vmatprep.subr.bf16.mxu1 %v2361_v35  ;;  %3520 = vmatprep.subr.bf16.mxu0 %v2474_v21  ;;  %v2416_v35 = vunpack.c.h.s8.bf16 %v2097_v24  ;;  %v2530_v21 = vunpack.c.h.s8.bf16 %v2155_v26  ;;  %v2424_v23 = vunpack.c.l.s8.bf16 %v2105_v22  ;;  %v2656_v39 = vunpack.c.h.s8.bf16 %v2218_v62 }
 0x67f   :  { %3058 = vmatpush1.bf16.msra.mxu1 %v2360_v37  ;;  %3521 = vmatpush3.bf16.msra.mxu0 %v2418_v7  ;;  %v2649_v37 = vunpack.c.l.s8.bf16 %v2218_v62  ;;  %v2190_v7 = vld [vmem:[#allocation4 + $0x570] sm:$0xff] }
 0x680   :  { %3068 = vmatprep.subr.bf16.mxu1 %v2368_v38  ;;  %3528 = vmatprep.subr.bf16.mxu0 %v2537_v33  ;;  %v2423_v38 = vunpack.c.l.s8.bf16 %v2104_v36  ;;  %v2593_v43 = vunpack.c.l.s8.bf16 %v2190_v7  ;;  %v2431_v33 = vunpack.c.h.s8.bf16 %v2105_v22  ;;  %v2132_v22 = vld [vmem:[#allocation4 + $0x3a0] sm:$0xff] }
 0x681   :  { %v2479_v62 = vunpack.c.l.s8.bf16 %v2132_v22 }
 0x682   :  { %3060 = vmatmul.mubr.bf16.vlgmr.msra.gmra.mrb[12].mxu1 %v4342_v1  ;;  %3264 = vmatmul.mubr.bf16.vlgmr.msra.gmra.mrb[28].mxu0 %v4354_v63  ;;  %v2495_v1 = vunpack.c.l.s8.bf16 %v2141_v32 }
 0x683   :  { %3069 = vmatpush1.bf16.msra.mxu1 %v2367_v47  ;;  %3529 = vmatpush3.bf16.msra.mxu0 %v2481_v30  ;;  %v2112_v47 = vld [vmem:[#allocation4 + $0x300] sm:$0xff]  ;;  %v2225_v30 = vld [vmem:[#allocation4 + $0x688] sm:$0xff] }
 0x684   :  { %3070 = vmatprep.subr.bf16.mxu1 %v2375_v40  ;;  %3530 = vmatprep.subr.bf16.mxu0 %v2544_v51  ;;  %v2430_v40 = vunpack.c.h.s8.bf16 %v2104_v36  ;;  %v2600_v51 = vunpack.c.h.s8.bf16 %v2190_v7  ;;  %v2438_v42 = vunpack.c.l.s8.bf16 %v2112_v47  ;;  %v2670_v32 = vunpack.c.h.s8.bf16 %v2225_v30 }
 0x685   :  { %3100 = vmatprep.mubr.bf16.mxu1 %v4346_v10  ;;  %3303 = vmatprep.mubr.bf16.mxu0 %v4358_v9  ;;  %v2565_v10 = vunpack.c.l.s8.bf16 %v2176_v14  ;;  %v2118_v14 = vld [vmem:[#allocation4 + $0x330] sm:$0xff] }
 0x687   :  { %3071 = vmatpush1.bf16.msra.mxu1 %v2374_v0  ;;  %3531 = vmatpush3.bf16.msra.mxu0 %v2488_v12  ;;  %v2663_v0 = vunpack.c.l.s8.bf16 %v2225_v30  ;;  %v2197_v12 = vld [vmem:[#allocation4 + $0x5a8] sm:$0xff] }
 0x688   :  { %3072 = vmatprep.subr.bf16.mxu1 %v2382_v2  ;;  %3532 = vmatprep.subr.bf16.mxu0 %v2551_v44  ;;  %v2437_v2 = vunpack.c.l.s8.bf16 %v2111_v61  ;;  %v2607_v54 = vunpack.c.l.s8.bf16 %v2197_v12  ;;  %v2445_v44 = vunpack.c.h.s8.bf16 %v2112_v47  ;;  %v2146_v47 = vld [vmem:[#allocation4 + $0x410] sm:$0xff] }
 0x68b   :  { %3073 = vmatpush1.bf16.msra.mxu1 %v2381_v49  ;;  %3533 = vmatpush3.bf16.msra.mxu0 %v2495_v1  ;;  %v2119_v49 = vld [vmem:[#allocation4 + $0x338] sm:$0xff]  ;;  %v2232_v1 = vld [vmem:[#allocation4 + $0x6c0] sm:$0xff] }
 0x68c   :  { %3074 = vmatprep.subr.bf16.mxu1 %v2389_v25  ;;  %3534 = vmatprep.subr.bf16.mxu0 %v2558_v6  ;;  %v2444_v25 = vunpack.c.h.s8.bf16 %v2111_v61  ;;  %v2614_v6 = vunpack.c.h.s8.bf16 %v2197_v12  ;;  %v2452_v11 = vunpack.c.l.s8.bf16 %v2119_v49  ;;  %v2684_v29 = vunpack.c.h.s8.bf16 %v2232_v1  ;;  %v2161_v12 = vld [vmem:[#allocation4 + $0x488] sm:$0xff] }
 0x68f   :  { %3075 = vmatpush1.bf16.msra.mxu1 %v2388_v17  ;;  %3535 = vmatpush3.bf16.msra.mxu0 %v2502_v52  ;;  %v2677_v17 = vunpack.c.l.s8.bf16 %v2232_v1  ;;  %v2204_v52 = vld [vmem:[#allocation4 + $0x5e0] sm:$0xff] }
 0x690   :  { %3076 = vmatprep.subr.bf16.mxu1 %v2396_v19  ;;  %3536 = vmatprep.subr.bf16.mxu0 %v2565_v10  ;;  %v2451_v19 = vunpack.c.l.s8.bf16 %v2118_v14  ;;  %v2621_v48 = vunpack.c.l.s8.bf16 %v2204_v52  ;;  %v2459_v10 = vunpack.c.h.s8.bf16 %v2119_v49  ;;  %v2543_v49 = vunpack.c.h.s8.bf16 %v2161_v12  ;;  %v2168_v1 = vld [vmem:[#allocation4 + $0x4c0] sm:$0xff] }
 0x693   :  { %3077 = vmatpush1.bf16.msra.mxu1 %v2395_v28  ;;  %3537 = vmatpush3.bf16.msra.mxu0 %v2509_v46  ;;  %v2126_v28 = vld [vmem:[#allocation4 + $0x370] sm:$0xff]  ;;  %v2239_v46 = vld [vmem:[#allocation4 + $0x6f8] sm:$0xff] }
 0x694   :  { %3078 = vmatprep.subr.bf16.mxu1 %v2403_v5  ;;  %3538 = vmatprep.subr.bf16.mxu0 %v2572_v3  ;;  %v2458_v5 = vunpack.c.h.s8.bf16 %v2118_v14  ;;  %v2628_v3 = vunpack.c.h.s8.bf16 %v2204_v52  ;;  %v2466_v41 = vunpack.c.l.s8.bf16 %v2126_v28  ;;  %v2698_v26 = vunpack.c.h.s8.bf16 %v2239_v46  ;;  %v2175_v52 = vld [vmem:[#allocation4 + $0x4f8] sm:$0xff] }
 0x697   :  { %3079 = vmatpush1.bf16.msra.mxu1 %v2402_v31  ;;  %3539 = vmatpush3.bf16.msra.mxu0 %v2516_v34  ;;  %v2691_v31 = vunpack.c.l.s8.bf16 %v2239_v46  ;;  %v2211_v34 = vld [vmem:[#allocation4 + $0x618] sm:$0xff]  ;;  %v2182_v46 = vld [vmem:[#allocation4 + $0x530] sm:$0xff] }
 0x698   :  { %3080 = vmatprep.subr.bf16.mxu1 %v2410_v16  ;;  %3540 = vmatprep.subr.bf16.mxu0 %v2579_v18  ;;  %v2465_v16 = vunpack.c.l.s8.bf16 %v2125_v27  ;;  %v2635_v24 = vunpack.c.l.s8.bf16 %v2211_v34  ;;  %v2473_v18 = vunpack.c.h.s8.bf16 %v2126_v28  ;;  %v2571_v28 = vunpack.c.h.s8.bf16 %v2175_v52 }
 0x69b   :  { %3081 = vmatpush1.bf16.msra.mxu1 %v2409_v50  ;;  %3541 = vmatpush3.bf16.msra.mxu0 %v2523_v45  ;;  %v2133_v50 = vld [vmem:[#allocation4 + $0x3a8] sm:$0xff]  ;;  %v2472_v45 = vunpack.c.h.s8.bf16 %v2125_v27 }
 0x69c   :  { %3082 = vmatprep.subr.bf16.mxu1 %v2417_v60  ;;  %3542 = vmatprep.subr.bf16.mxu0 %v2586_v20  ;;  %v2642_v60 = vunpack.c.h.s8.bf16 %v2211_v34  ;;  %v2480_v20 = vunpack.c.l.s8.bf16 %v2133_v50  ;;  %v2189_v34 = vld [vmem:[#allocation4 + $0x568] sm:$0xff] }
 0x69f   :  { %3083 = vmatpush1.bf16.msra.mxu1 %v2416_v35  ;;  %3543 = vmatpush3.bf16.msra.mxu0 %v2530_v21  ;;  %v2487_v35 = vunpack.c.h.s8.bf16 %v2133_v50  ;;  %v2140_v21 = vld [vmem:[#allocation4 + $0x3e0] sm:$0xff]  ;;  %v2599_v50 = vunpack.c.h.s8.bf16 %v2189_v34 }
 0x6a0   :  { %3084 = vmatprep.subr.bf16.mxu1 %v2424_v23  ;;  %3550 = vmatprep.subr.bf16.mxu0 %v2649_v37  ;;  %v2486_v23 = vunpack.c.h.s8.bf16 %v2132_v22  ;;  %v2494_v36 = vunpack.c.l.s8.bf16 %v2140_v21  ;;  %v2139_v37 = vld [vmem:[#allocation4 + $0x3d8] sm:$0xff] }
 0x6a1   :  { %v2493_v7 = vunpack.c.l.s8.bf16 %v2139_v37  ;;  %v2195_v22 = vld [vmem:[#allocation4 + $0x598] sm:$0xff] }
 0x6a2   :  { %3304 = vmatmul.mubr.bf16.vlgmr.msra.gmra.mrb[32].mxu0 %v4366_v59 }
 0x6a3   :  { %3085 = vmatpush1.bf16.msra.mxu1 %v2423_v38  ;;  %3551 = vmatpush3.bf16.msra.mxu0 %v2593_v43  ;;  %v2501_v38 = vunpack.c.h.s8.bf16 %v2140_v21  ;;  %v2147_v43 = vld [vmem:[#allocation4 + $0x418] sm:$0xff] }
 0x6a4   :  { %3086 = vmatprep.subr.bf16.mxu1 %v2431_v33  ;;  %3552 = vmatprep.subr.bf16.mxu0 %v2656_v39  ;;  %v2500_v33 = vunpack.c.h.s8.bf16 %v2139_v37  ;;  %v2508_v39 = vunpack.c.l.s8.bf16 %v2147_v43  ;;  %v2515_v30 = vunpack.c.h.s8.bf16 %v2147_v43  ;;  %v2203_v21 = vld [vmem:[#allocation4 + $0x5d8] sm:$0xff]  ;;  %v2202_v37 = vld [vmem:[#allocation4 + $0x5d0] sm:$0xff] }
 0x6a5   :  { %3343 = vmatprep.mubr.bf16.mxu0 %v4370_v55  ;;  %v2210_v43 = vld [vmem:[#allocation4 + $0x610] sm:$0xff] }
 0x6a7   :  { %3087 = vmatpush1.bf16.msra.mxu1 %v2430_v40  ;;  %3553 = vmatpush3.bf16.msra.mxu0 %v2600_v51  ;;  %v2154_v40 = vld [vmem:[#allocation4 + $0x450] sm:$0xff] }
 0x6a8   :  { %3088 = vmatprep.subr.bf16.mxu1 %v2438_v42  ;;  %3554 = vmatprep.subr.bf16.mxu0 %v2663_v0  ;;  %v2522_v51 = vunpack.c.l.s8.bf16 %v2154_v40  ;;  %v2153_v42 = vld [vmem:[#allocation4 + $0x448] sm:$0xff]  ;;  %v2529_v0 = vunpack.c.h.s8.bf16 %v2154_v40 }
 0x6a9   :  { %v2521_v61 = vunpack.c.l.s8.bf16 %v2153_v42 }
 0x6ab   :  { %3089 = vmatpush1.bf16.msra.mxu1 %v2437_v2  ;;  %3555 = vmatpush3.bf16.msra.mxu0 %v2607_v54  ;;  %v2528_v2 = vunpack.c.h.s8.bf16 %v2153_v42  ;;  %v2536_v54 = vunpack.c.l.s8.bf16 %v2161_v12  ;;  %v2209_v42 = vld [vmem:[#allocation4 + $0x608] sm:$0xff] }
 0x6ac   :  { %3090 = vmatprep.subr.bf16.mxu1 %v2445_v44  ;;  %3556 = vmatprep.subr.bf16.mxu0 %v2670_v32  ;;  %v2160_v44 = vld [vmem:[#allocation4 + $0x480] sm:$0xff] }
 0x6ad   :  { %v2535_v32 = vunpack.c.l.s8.bf16 %v2160_v44 }
 0x6af   :  { %3091 = vmatpush1.bf16.msra.mxu1 %v2444_v25  ;;  %3557 = vmatpush3.bf16.msra.mxu0 %v2614_v6  ;;  %v2542_v25 = vunpack.c.h.s8.bf16 %v2160_v44  ;;  %v2550_v6 = vunpack.c.l.s8.bf16 %v2168_v1 }
 0x6b0   :  { %3092 = vmatprep.subr.bf16.mxu1 %v2452_v11  ;;  %3558 = vmatprep.subr.bf16.mxu0 %v2677_v17  ;;  %v2167_v11 = vld [vmem:[#allocation4 + $0x4b8] sm:$0xff]  ;;  %v2557_v17 = vunpack.c.h.s8.bf16 %v2168_v1 }
 0x6b1   :  { %v2549_v14 = vunpack.c.l.s8.bf16 %v2167_v11 }
 0x6b3   :  { %3093 = vmatpush1.bf16.msra.mxu1 %v2451_v19  ;;  %3559 = vmatpush3.bf16.msra.mxu0 %v2621_v48  ;;  %v2556_v19 = vunpack.c.h.s8.bf16 %v2167_v11  ;;  %v2564_v48 = vunpack.c.l.s8.bf16 %v2175_v52 }
 0x6b4   :  { %3094 = vmatprep.subr.bf16.mxu1 %v2459_v10  ;;  %3560 = vmatprep.subr.bf16.mxu0 %v2684_v29  ;;  %v2174_v10 = vld [vmem:[#allocation4 + $0x4f0] sm:$0xff] }
 0x6b5   :  { %v2563_v29 = vunpack.c.l.s8.bf16 %v2174_v10 }
 0x6b7   :  { %3095 = vmatpush1.bf16.msra.mxu1 %v2458_v5  ;;  %3561 = vmatpush3.bf16.msra.mxu0 %v2628_v3  ;;  %v2570_v5 = vunpack.c.h.s8.bf16 %v2174_v10  ;;  %v2578_v3 = vunpack.c.l.s8.bf16 %v2182_v46  ;;  %v2217_v10 = vld [vmem:[#allocation4 + $0x648] sm:$0xff] }
 0x6b8   :  { %3096 = vmatprep.subr.bf16.mxu1 %v2466_v41  ;;  %3562 = vmatprep.subr.bf16.mxu0 %v2691_v31  ;;  %v2181_v41 = vld [vmem:[#allocation4 + $0x528] sm:$0xff]  ;;  %v2585_v31 = vunpack.c.h.s8.bf16 %v2182_v46 }
 0x6b9   :  { %v2577_v27 = vunpack.c.l.s8.bf16 %v2181_v41 }
 0x6bb   :  { %3097 = vmatpush1.bf16.msra.mxu1 %v2465_v16  ;;  %3563 = vmatpush3.bf16.msra.mxu0 %v2635_v24  ;;  %v2584_v16 = vunpack.c.h.s8.bf16 %v2181_v41  ;;  %v2592_v24 = vunpack.c.l.s8.bf16 %v2189_v34 }
 0x6bc   :  { %3098 = vmatprep.subr.bf16.mxu1 %v2473_v18  ;;  %3564 = vmatprep.subr.bf16.mxu0 %v2698_v26  ;;  %v2188_v18 = vld [vmem:[#allocation4 + $0x560] sm:$0xff] }
 0x6bd   :  { %v2591_v26 = vunpack.c.l.s8.bf16 %v2188_v18 }
 0x6bf   :  { %3099 = vmatpush1.bf16.msra.mxu1 %v2472_v45  ;;  %3565 = vmatpush3.bf16.msra.mxu0 %v2642_v60  ;;  %v2196_v45 = vld [vmem:[#allocation4 + $0x5a0] sm:$0xff]  ;;  %v2598_v60 = vunpack.c.h.s8.bf16 %v2188_v18 }
 0x6c0   :  { %3109 = vmatprep.subr.bf16.mxu1 %v2480_v20  ;;  %v2606_v20 = vunpack.c.l.s8.bf16 %v2196_v45 }
 0x6c2   :  { %3101 = vmatmul.mubr.bf16.vlgmr.msra.gmra.mrb[12].mxu1 %v4354_v63  ;;  %3344 = vmatmul.mubr.bf16.vlgmr.msra.gmra.mrb[36].mxu0 %v4378_v53  ;;  %v2507_v63 = vunpack.c.l.s8.bf16 %v2146_v47 }
 0x6c3   :  { %3110 = vmatpush1.bf16.msra.mxu1 %v2479_v62  ;;  %3141 = vmatprep.mubr.bf16.mxu1 %v4358_v9  ;;  %v2514_v9 = vunpack.c.h.s8.bf16 %v2146_v47  ;;  %v2605_v62 = vunpack.c.l.s8.bf16 %v2195_v22 }
 0x6c4   :  { %3111 = vmatprep.subr.bf16.mxu1 %v2487_v35  ;;  %v2613_v35 = vunpack.c.h.s8.bf16 %v2196_v45 }
 0x6c7   :  { %3112 = vmatpush1.bf16.msra.mxu1 %v2486_v23  ;;  %v2612_v23 = vunpack.c.h.s8.bf16 %v2195_v22 }
 0x6c8   :  { %3113 = vmatprep.subr.bf16.mxu1 %v2494_v36  ;;  %v2620_v36 = vunpack.c.l.s8.bf16 %v2203_v21 }
 0x6cb   :  { %3114 = vmatpush1.bf16.msra.mxu1 %v2493_v7  ;;  %v2619_v7 = vunpack.c.l.s8.bf16 %v2202_v37 }
 0x6cc   :  { %3115 = vmatprep.subr.bf16.mxu1 %v2501_v38  ;;  %v4405_v38 = vld [vmem:[%s4465_s8] ss:$2 sm:$0xff] }
 0x6cd   :  { %v3398_v40 = vrot.slane %v4405_v38, %v4013_v13  ;;  %v3402_v12 = vrot.slane %v4405_v38, %v4016_v15 }
 0x6cf   :  { %3116 = vmatpush1.bf16.msra.mxu1 %v2500_v33 }
 0x6d0   :  { %3117 = vmatprep.subr.bf16.mxu1 %v2508_v39 }
 0x6d3   :  { %3118 = vmatpush1.bf16.msra.mxu1 %v2507_v63 }
 0x6d4   :  { %3119 = vmatprep.subr.bf16.mxu1 %v2515_v30  ;;  %v2626_v30 = vunpack.c.h.s8.bf16 %v2202_v37 }
 0x6d7   :  { %3120 = vmatpush1.bf16.msra.mxu1 %v2514_v9  ;;  %v3406_v9 = vrot.slane %v4405_v38, %v4094_v4 }
 0x6d8   :  { %3121 = vmatprep.subr.bf16.mxu1 %v2522_v51  ;;  %v2634_v51 = vunpack.c.l.s8.bf16 %v2210_v43 }
 0x6db   :  { %3122 = vmatpush1.bf16.msra.mxu1 %v2521_v61 }
 0x6dc   :  { %3123 = vmatprep.subr.bf16.mxu1 %v2529_v0 }
 0x6df   :  { %3124 = vmatpush1.bf16.msra.mxu1 %v2528_v2  ;;  %v3410_v2 = vrot.slane %v4405_v38, %v4097_v8 }
 0x6e0   :  { %3125 = vmatprep.subr.bf16.mxu1 %v2536_v54 }
 0x6e3   :  { %3126 = vmatpush1.bf16.msra.mxu1 %v2535_v32 }
 0x6e4   :  { %3127 = vmatprep.subr.bf16.mxu1 %v2543_v49 }
 0x6e7   :  { %3128 = vmatpush1.bf16.msra.mxu1 %v2542_v25 }
 0x6e8   :  { %3129 = vmatprep.subr.bf16.mxu1 %v2550_v6 }
 0x6eb   :  { %3130 = vmatpush1.bf16.msra.mxu1 %v2549_v14 }
 0x6ec   :  { %3131 = vmatprep.subr.bf16.mxu1 %v2557_v17 }
 0x6ef   :  { %3132 = vmatpush1.bf16.msra.mxu1 %v2556_v19  ;;  %v2641_v19 = vunpack.c.h.s8.bf16 %v2210_v43 }
 0x6f0   :  { %3133 = vmatprep.subr.bf16.mxu1 %v2564_v48 }
 0x6f3   :  { %3134 = vmatpush1.bf16.msra.mxu1 %v2563_v29  ;;  %v2648_v29 = vunpack.c.l.s8.bf16 %v2217_v10 }
 0x6f4   :  { %3135 = vmatprep.subr.bf16.mxu1 %v2571_v28  ;;  %v2216_v28 = vld [vmem:[#allocation4 + $0x640] sm:$0xff] }
 0x6f5   :  { %v2647_v46 = vunpack.c.l.s8.bf16 %v2216_v28  ;;  %v2654_v41 = vunpack.c.h.s8.bf16 %v2216_v28 }
 0x6f7   :  { %3136 = vmatpush1.bf16.msra.mxu1 %v2570_v5  ;;  %v2655_v5 = vunpack.c.h.s8.bf16 %v2217_v10 }
 0x6f8   :  { %3137 = vmatprep.subr.bf16.mxu1 %v2578_v3  ;;  %v2224_v3 = vld [vmem:[#allocation4 + $0x680] sm:$0xff] }
 0x6fb   :  { %3138 = vmatpush1.bf16.msra.mxu1 %v2577_v27  ;;  %v2662_v27 = vunpack.c.l.s8.bf16 %v2224_v3 }
 0x6fc   :  { %3139 = vmatprep.subr.bf16.mxu1 %v2585_v31  ;;  %v2223_v31 = vld [vmem:[#allocation4 + $0x678] sm:$0xff] }
 0x6fd   :  { %v2661_v34 = vunpack.c.l.s8.bf16 %v2223_v31  ;;  %v2668_v18 = vunpack.c.h.s8.bf16 %v2223_v31 }
 0x6ff   :  { %3140 = vmatpush1.bf16.msra.mxu1 %v2584_v16  ;;  %v2669_v16 = vunpack.c.h.s8.bf16 %v2224_v3 }
 0x700   :  { %3150 = vmatprep.subr.bf16.mxu1 %v2592_v24  ;;  %v2231_v24 = vld [vmem:[#allocation4 + $0x6b8] sm:$0xff] }
 0x702   :  { %3142 = vmatmul.mubr.bf16.vlgmr.msra.gmra.mrb[12].mxu1 %v4366_v59  ;;  %v4400_v59 = vld [vmem:[%s4465_s8 + $0x1] ss:$2 sm:$0xff] }
 0x703   :  { %3151 = vmatpush1.bf16.msra.mxu1 %v2591_v26  ;;  %3182 = vmatprep.mubr.bf16.mxu1 %v4370_v55  ;;  %v2627_v55 = vunpack.c.h.s8.bf16 %v2203_v21  ;;  %v3355_v33 = vrot.slane %v4400_v59, %v4013_v13  ;;  %v3363_v39 = vrot.slane %v4400_v59, %v4094_v4  ;;  %v3359_v47 = vrot.slane %v4400_v59, %v4016_v15 }
 0x704   :  { %3152 = vmatprep.subr.bf16.mxu1 %v2599_v50  ;;  %v3367_v63 = vrot.slane %v4400_v59, %v4097_v8  ;;  %v2633_v4 = vunpack.c.l.s8.bf16 %v2209_v42  ;;  %v2640_v8 = vunpack.c.h.s8.bf16 %v2209_v42  ;;  %v2676_v26 = vunpack.c.l.s8.bf16 %v2231_v24  ;;  %v2230_v50 = vld [vmem:[#allocation4 + $0x6b0] sm:$0xff] }
 0x705   :  { %v2675_v45 = vunpack.c.l.s8.bf16 %v2230_v50  ;;  %v2682_v22 = vunpack.c.h.s8.bf16 %v2230_v50 }
 0x707   :  { %3153 = vmatpush1.bf16.msra.mxu1 %v2598_v60  ;;  %v2683_v60 = vunpack.c.h.s8.bf16 %v2231_v24 }
 0x708   :  { %3154 = vmatprep.subr.bf16.mxu1 %v2606_v20  ;;  %v2238_v20 = vld [vmem:[#allocation4 + $0x6f0] sm:$0xff] }
 0x70b   :  { %3155 = vmatpush1.bf16.msra.mxu1 %v2605_v62  ;;  %v2690_v62 = vunpack.c.l.s8.bf16 %v2238_v20 }
 0x70c   :  { %3156 = vmatprep.subr.bf16.mxu1 %v2613_v35  ;;  %v2237_v35 = vld [vmem:[#allocation4 + $0x6e8] sm:$0xff] }
 0x70f   :  { %3157 = vmatpush1.bf16.msra.mxu1 %v2612_v23 }
 0x710   :  { %3158 = vmatprep.subr.bf16.mxu1 %v2620_v36  ;;  %v2689_v36 = vunpack.c.l.s8.bf16 %v2237_v35 }
 0x713   :  { %3159 = vmatpush1.bf16.msra.mxu1 %v2619_v7 }
 0x714   :  { %3160 = vmatprep.subr.bf16.mxu1 %v2627_v55  ;;  %v2697_v55 = vunpack.c.h.s8.bf16 %v2238_v20 }
 0x715   :  { %v2856_v61 = vpop.f32.mrb[8].mxu1  ;;  %v3020_v0 = vpop.f32.mrb[20].mxu0 }
 0x716   :  { %v3387_v54 = vmul.f32 %v3355_v33, %v2856_v61  ;;  %v3389_v44 = vmul.f32 %v3363_v39, %v3020_v0  ;;  %v2858_v32 = vpop.f32.mrb[9].mxu1  ;;  %v3022_v49 = vpop.f32.mrb[21].mxu0  ;;  %v2696_v33 = vunpack.c.h.s8.bf16 %v2237_v35 }
 0x717   :  { %v3388_v1 = vmul.f32 %v3359_v47, %v2858_v32  ;;  %v3390_v13 = vmul.f32 %v3367_v63, %v3022_v49  ;;  %v2860_v25 = vpop.f32.mrb[10].mxu1  ;;  %v3024_v6 = vpop.f32.mrb[22].mxu0  ;;  %3161 = vmatpush1.bf16.msra.mxu1 %v2626_v30  ;;  %v3379_v49 = vrot.slane %v4400_v59, %v4233_v57 }
 0x718   :  { %v3430_v11 = vadd.f32 %v3398_v40, %v3387_v54  ;;  %v3432_v14 = vadd.f32 %v3406_v9, %v3389_v44  ;;  %v2861_v17 = vpop.f32.mrb[11].mxu1  ;;  %v3025_v52 = vpop.f32.mrb[23].mxu0  ;;  %3162 = vmatprep.subr.bf16.mxu1 %v2634_v51  ;;  %v3422_v25 = vrot.slane %v4405_v38, %v4233_v57 }
 0x719   :  { %v3431_v15 = vadd.f32 %v3402_v12, %v3388_v1  ;;  %v3433_v48 = vadd.f32 %v3410_v2, %v3390_v13  ;;  %v3414_v17 = vrot.slane %v4405_v38, %v4230_v56 }
 0x71a   :  { %3437 = vst [vmem:[%s4466_s9] sm:$0xff] %v3430_v11  ;;  %3439 = vst [vmem:[%s4466_s9 + $0x10] sm:$0xff] %v3432_v14  ;;  %v3371_v11 = vrot.slane %v4400_v59, %v4230_v56  ;;  %v3375_v14 = vrot.slane %v4400_v59, %v4236_v58 }
 0x71b   :  { %3438 = vst [vmem:[%s4466_s9 + $0x8] sm:$0xff] %v3431_v15  ;;  %3440 = vst [vmem:[%s4466_s9 + $0x18] sm:$0xff] %v3433_v48  ;;  %3163 = vmatpush1.bf16.msra.mxu1 %v2633_v4 }
 0x71c   :  { %3164 = vmatprep.subr.bf16.mxu1 %v2641_v19  ;;  %v3418_v19 = vrot.slane %v4405_v38, %v4236_v58 }
 0x71f   :  { %3165 = vmatpush1.bf16.msra.mxu1 %v2640_v8 }
 0x720   :  { %3166 = vmatprep.subr.bf16.mxu1 %v2648_v29 }
 0x723   :  { %3167 = vmatpush1.bf16.msra.mxu1 %v2647_v46 }
 0x724   :  { %3168 = vmatprep.subr.bf16.mxu1 %v2655_v5 }
 0x727   :  { %3169 = vmatpush1.bf16.msra.mxu1 %v2654_v41 }
 0x728   :  { %3170 = vmatprep.subr.bf16.mxu1 %v2662_v27 }
 0x72b   :  { %3171 = vmatpush1.bf16.msra.mxu1 %v2661_v34 }
 0x72c   :  { %3172 = vmatprep.subr.bf16.mxu1 %v2669_v16 }
 0x72f   :  { %3173 = vmatpush1.bf16.msra.mxu1 %v2668_v18 }
 0x730   :  { %3174 = vmatprep.subr.bf16.mxu1 %v2676_v26 }
 0x733   :  { %3175 = vmatpush1.bf16.msra.mxu1 %v2675_v45 }
 0x734   :  { %3176 = vmatprep.subr.bf16.mxu1 %v2683_v60 }
 0x735   :  { %v3500_v21 = vpop.f32.mrb[24].mxu0 }
 0x736   :  { %v3501_v23 = vpop.f32.mrb[25].mxu0 }
 0x737   :  { %3177 = vmatpush1.bf16.msra.mxu1 %v2682_v22  ;;  %v3502_v37 = vadd.f32 %v3501_v23, %v3500_v21  ;;  %v3503_v7 = vpop.f32.mrb[26].mxu0 }
 0x738   :  { %3178 = vmatprep.subr.bf16.mxu1 %v2690_v62  ;;  %v3504_v43 = vpop.f32.mrb[27].mxu0 }
 0x73b   :  { %3179 = vmatpush1.bf16.msra.mxu1 %v2689_v36 }
 0x73c   :  { %3180 = vmatprep.subr.bf16.mxu1 %v2697_v55 }
 0x73f   :  { %3181 = vmatpush1.bf16.msra.mxu1 %v2696_v33 }
 0x742   :  { %3183 = vmatmul.mubr.bf16.vlgmr.msra.gmra.mrb[12].mxu1 %v4378_v53 }
 0x755   :  { %v3522_v39 = vpop.f32.mrb[28].mxu0 }
 0x756   :  { %v3523_v47 = vpop.f32.mrb[29].mxu0 }
 0x757   :  { %v3524_v63 = vadd.f32 %v3523_v47, %v3522_v39  ;;  %v3525_v30 = vpop.f32.mrb[30].mxu0 }
 0x758   :  { %v3526_v40 = vpop.f32.mrb[31].mxu0 }
 0x759   :  { %v3266_v9 = vadd.f32 %v3524_v63, %v3502_v37 }
 0x775   :  { %v3544_v51 = vpop.f32.mrb[32].mxu0 }
 0x776   :  { %v3545_v42 = vpop.f32.mrb[33].mxu0 }
 0x777   :  { %v3546_v61 = vadd.f32 %v3545_v42, %v3544_v51  ;;  %v3547_v0 = vpop.f32.mrb[34].mxu0 }
 0x778   :  { %v3548_v12 = vpop.f32.mrb[35].mxu0 }
 0x779   :  { %v3306_v2 = vadd.f32 %v3546_v61, %v3266_v9 }
 0x795   :  { %v3566_v54 = vpop.f32.mrb[36].mxu0 }
 0x796   :  { %v3567_v44 = vpop.f32.mrb[37].mxu0 }
 0x797   :  { %v3568_v32 = vadd.f32 %v3567_v44, %v3566_v54  ;;  %v3569_v1 = vpop.f32.mrb[38].mxu0 }
 0x798   :  { %v3570_v53 = vpop.f32.mrb[39].mxu0 }
 0x799   :  { %v3346_v13 = vadd.f32 %v3568_v32, %v3306_v2 }
 0x79b   :  { %v3393_v6 = vmul.f32 %v3379_v49, %v3346_v13 }
 0x79d   :  { %v3436_v4 = vadd.f32 %v3422_v25, %v3393_v6 }
 0x79f   :  { %3443 = vst [vmem:[%s4466_s9 + $0x30] sm:$0xff] %v3436_v4 }
 0x815   :  { %v3184_v52 = vpop.f32.mrb[12].mxu1 }
 0x816   :  { %v3391_v57 = vmul.f32 %v3371_v11, %v3184_v52  ;;  %v3186_v15 = vpop.f32.mrb[13].mxu1 }
 0x817   :  { %v3392_v48 = vmul.f32 %v3375_v14, %v3186_v15  ;;  %v3188_v10 = vpop.f32.mrb[14].mxu1 }
 0x818   :  { %v3434_v8 = vadd.f32 %v3414_v17, %v3391_v57  ;;  %v3189_v29 = vpop.f32.mrb[15].mxu1 }
 0x819   :  { %v3435_v28 = vadd.f32 %v3418_v19, %v3392_v48 }
 0x81a   :  { %3441 = vst [vmem:[%s4466_s9 + $0x20] sm:$0xff] %v3434_v8 }
 0x81b   :  { %3442 = vst [vmem:[%s4466_s9 + $0x28] sm:$0xff] %v3435_v28 }
 0x81c   :  { %3448 = vsyncpa [#allocation7], 1 }
 0x81d   :  { %3449 = vsyncpa [#allocation9], 1 }
 0x81e   :  { %3450 = vsyncpa [#allocation12], 1 }
 0x81f   :  { %3451 = vsyncmov [#allocation5] }
 0x822   :  { %s3452_s5 = vpop.sfrf %3451 }
 0x823   :  { %p3481_p8 = scmp.ne.s32.totalorder %s3452_s5, 0 }
 0x825   :  { %3456 = shalt.err (%p3481_p8)  }
 0x826   :  { %3458 = vsyncmov [#allocation5 + $0x1] }
 0x829   :  { %s3459_s22 = vpop.sfrf %3458 }
 0x82a   :  { %p3482_p9 = scmp.ne.s32.totalorder %s3459_s22, 0 }
 0x82c   :  { %3463 = shalt.err (%p3482_p9)  }
 0x82d   :  { %3465 = vsyncmov [#allocation5 + $0x2] }
 0x830   :  { %s3466_s2 = vpop.sfrf %3465 }
 0x831   :  { %p3483_p10 = scmp.ne.s32.totalorder %s3466_s2, 0 }
 0x833   :  { %3470 = shalt.err (%p3483_p10)  }

</bundles_post_ra>
